<compile_context>
chip_gen: v7x
topology: tpu7x:2x2x1
jax: 0.10.0
libtpu: 0.0.40
codegen_flags: <defaults>
</compile_context>

<pallas_src>
import functools
import numpy as np
import jax
import jax.numpy as jnp
from jax.experimental import pallas as pl
from jax.experimental.pallas import tpu as pltpu


def _clam_mb_kernel(n_valid_ref,
                    h_ref, w1_ref, b1_ref,
                    wab_ref, bab_ref,
                    wc_ref, bc_ref, wcls_ref, bcls_ref,
                    logits_ref, yprob_ref, yhat_ref, araw_ref, m_ref,
                    m_scr, l_scr, acc_scr):
    f32 = jnp.float32
    bf16 = jnp.bfloat16
    step = pl.program_id(0)
    tile_n = h_ref.shape[0]
    L2 = wc_ref.shape[1]
    nv = n_valid_ref[0]                                               # SMEM scalar

    # --- init running stats at the first N tile ---
    @pl.when(step == 0)
    def _():
        m_scr[...] = jnp.full_like(m_scr, -1e30)
        l_scr[...] = jnp.zeros_like(l_scr)
        acc_scr[...] = jnp.zeros_like(acc_scr)

    # --- fc: Linear(L0 -> L1) + ReLU (Dropout == identity in eval) ---
    h = h_ref[...].astype(bf16)                                       # cast per tile
    x = jnp.dot(h, w1_ref[...], preferred_element_type=f32) + b1_ref[...]
    x = jnp.maximum(x, 0.0)                                           # (tn, L1) f32
    # zero rows beyond the true bag length (ragged last tile reads garbage HBM)
    row = jax.lax.broadcasted_iota(jnp.int32, (tile_n, 1), 0) + step * tile_n
    x = jnp.where(row < nv, x, 0.0)
    x_bf = x.astype(bf16)

    # --- gated attention net: single fused (L1, 2*L2) matmul, then split ---
    pre = jnp.dot(x_bf, wab_ref[...], preferred_element_type=f32) + bab_ref[...]
    a = jnp.tanh(pre[:, :L2])
    b = jax.nn.sigmoid(pre[:, L2:])
    ab = (a * b).astype(bf16)                                         # (tn, L2)

    # scores s = Wc @ (a*b)^T + bc  -> (C, tn), computed without a transpose
    s = jax.lax.dot_general(wc_ref[...], ab, (((1,), (1,)), ((), ())),
                            preferred_element_type=f32) + bc_ref[...]
    araw_ref[...] = s                                                 # lane-dense store

    # mask padded instances (cols >= n_valid) out of the softmax
    col = jax.lax.broadcasted_iota(jnp.int32, s.shape, 1) + step * tile_n
    s_m = jnp.where(col < nv, s, -1e30)

    # --- online softmax over instances + unnormalized bag accumulator ---
    m_old = m_scr[...]                                                # (C, 1)
    m_new = jnp.maximum(m_old, jnp.max(s_m, axis=1, keepdims=True))
    corr = jnp.exp(m_old - m_new)                                     # (C, 1)
    p = jnp.exp(s_m - m_new)                                          # (C, tn) f32
    l_scr[...] = corr * l_scr[...] + jnp.sum(p, axis=1, keepdims=True)
    acc_scr[...] = corr * acc_scr[...] + jnp.dot(
        p.astype(bf16), x_bf, preferred_element_type=f32)             # bf16 MXU
    m_scr[...] = m_new

    # --- finalize on the last tile ---
    @pl.when(step == pl.num_programs(0) - 1)
    def _():
        M = acc_scr[...] / l_scr[...]                                 # (C, L1) f32
        m_ref[...] = M

        # per-class bag classifiers via a lane reduce (no 1-row MXU matmul):
        #   logits_c[c, 0] = M[c] . wcls[c] + bcls[c]
        logits_c = jnp.sum(M * wcls_ref[...], axis=1, keepdims=True) + bcls_ref[...]
        logits_ref[...] = logits_c                                    # (C, 1)

        # Y_prob = softmax(logits) (over classes)
        lmax = jnp.max(logits_c, axis=0, keepdims=True)
        e = jnp.exp(logits_c - lmax)
        yprob_ref[...] = e / jnp.sum(e, axis=0, keepdims=True)

        # Y_hat = argmax(logits) (first index of the max, like torch.topk)
        C = logits_c.shape[0]
        idx = jax.lax.broadcasted_iota(jnp.int32, (C, 1), 0)
        yhat_ref[...] = jnp.min(jnp.where(logits_c == lmax, idx, C),
                                axis=0, keepdims=True).astype(jnp.int32)


def prepare_params(params):
    """One-time weight layout prep (transpose + cast + Wa/Wb fusion)."""
    bf16, f32 = jnp.bfloat16, jnp.float32
    L1 = params["w1"].shape[0]
    L2 = params["wa"].shape[0]
    C = params["wc"].shape[0]
    w_ab_t = jnp.concatenate([params["wa"].T, params["wb"].T], axis=1)  # (L1, 2*L2)
    b_ab = jnp.concatenate([params["ba"], params["bb"]]).reshape(1, 2 * L2)
    return {
        "w1_t":   jnp.asarray(params["w1"].T, bf16),            # (L0, L1)
        "b1":     jnp.asarray(params["b1"], f32).reshape(1, L1),
        "w_ab_t": jnp.asarray(w_ab_t, bf16),                    # (L1, 2*L2)
        "b_ab":   jnp.asarray(b_ab, f32),                       # (1, 2*L2)
        "wc":     jnp.asarray(params["wc"], bf16),              # (C, L2)
        "bc":     jnp.asarray(params["bc"], f32).reshape(C, 1),
        "wcls":   jnp.asarray(params["wcls"], f32),             # (C, L1)
        "bcls":   jnp.asarray(params["bcls"], f32).reshape(C, 1),
    }


@functools.partial(jax.jit, static_argnames=("tile_n",))
def clam_mb_forward(h, prep, n_valid=None, tile_n=512):
    """CLAM_MB forward pass as a single N-tiled Pallas kernel call.

    `h` is passed in its native dtype (f32 or bf16) and cast per-tile in the
    kernel; callers who want fully recompile-free operation can pad `h` to a
    bucketed length upstream and pass the true bag length via `n_valid`.
    """
    f32 = jnp.float32
    N, L0 = h.shape
    L1 = prep["w1_t"].shape[1]
    L2 = prep["wc"].shape[1]
    C = prep["wc"].shape[0]

    if n_valid is None:
        n_valid = N
    n_valid_arr = jnp.asarray(n_valid, jnp.int32).reshape((1,))

    tile_n = max(128, (int(tile_n) // 128) * 128)
    tile_n = int(min(tile_n, pl.cdiv(N, 128) * 128))
    num_tiles = pl.cdiv(N, tile_n)
    n_pad = num_tiles * tile_n

    inputs = (h, prep["w1_t"], prep["b1"], prep["w_ab_t"], prep["b_ab"],
              prep["wc"], prep["bc"], prep["wcls"], prep["bcls"])

    # Weight BlockSpecs are N-invariant -> stay VMEM resident across the grid.
    # (pipeline_mode=pl.Buffered(1) on them would halve resident weight VMEM on
    #  v7x at real CLAM dims; omitted here for portability.)
    in_specs = [
        pl.BlockSpec((tile_n, L0), lambda i, nv: (i, 0)),       # h tiles over N
        pl.BlockSpec((L0, L1), lambda i, nv: (0, 0)),
        pl.BlockSpec((1, L1), lambda i, nv: (0, 0)),
        pl.BlockSpec((L1, 2 * L2), lambda i, nv: (0, 0)),
        pl.BlockSpec((1, 2 * L2), lambda i, nv: (0, 0)),
        pl.BlockSpec((C, L2), lambda i, nv: (0, 0)),
        pl.BlockSpec((C, 1), lambda i, nv: (0, 0)),
        pl.BlockSpec((C, L1), lambda i, nv: (0, 0)),
        pl.BlockSpec((C, 1), lambda i, nv: (0, 0)),
    ]
    out_shapes = (
        jax.ShapeDtypeStruct((C, 1), f32),          # per-class logits (column)
        jax.ShapeDtypeStruct((C, 1), f32),          # per-class Y_prob (column)
        jax.ShapeDtypeStruct((1, 1), jnp.int32),    # Y_hat
        jax.ShapeDtypeStruct((C, n_pad), f32),      # A_raw (padded)
        jax.ShapeDtypeStruct((C, L1), f32),         # M (bag features)
    )
    out_specs = [
        pl.BlockSpec((C, 1), lambda i, nv: (0, 0)),
        pl.BlockSpec((C, 1), lambda i, nv: (0, 0)),
        pl.BlockSpec((1, 1), lambda i, nv: (0, 0)),
        pl.BlockSpec((C, tile_n), lambda i, nv: (0, i)),        # lane-dense per tile
        pl.BlockSpec((C, L1), lambda i, nv: (0, 0)),
    ]

    flops = 2 * n_pad * (L0 * L1 + 2 * L1 * L2 + C * L2 + C * L1) + 2 * C * L1
    transcendentals = n_pad * (2 * L2 + 2 * C) + 2 * C
    bytes_accessed = int(
        sum(int(v.size) * v.dtype.itemsize for v in inputs)
        + 4 * (3 * C + 1 + C * n_pad + C * L1))

    grid_spec = pltpu.PrefetchScalarGridSpec(
        num_scalar_prefetch=1,
        grid=(num_tiles,),
        in_specs=in_specs,
        out_specs=out_specs,
        scratch_shapes=[
            pltpu.VMEM((C, 1), jnp.float32),     # running max
            pltpu.VMEM((C, 1), jnp.float32),     # running sum
            pltpu.VMEM((C, L1), jnp.float32),    # unnormalized M accumulator
        ],
    )

    logits_c, yprob_c, y_hat, a_raw_pad, M = pl.pallas_call(
        _clam_mb_kernel,
        out_shape=out_shapes,
        grid_spec=grid_spec,
        compiler_params=pltpu.CompilerParams(
            dimension_semantics=("arbitrary",),
            vmem_limit_bytes=48 * 1024 * 1024,
        ),
        cost_estimate=pl.CostEstimate(flops=flops,
                                      transcendentals=transcendentals,
                                      bytes_accessed=bytes_accessed),
    )(n_valid_arr, *inputs)

    logits = logits_c.reshape(1, C)
    y_prob = yprob_c.reshape(1, C)
    return logits, y_prob, y_hat, a_raw_pad[:, :N], M


def _reference_forward(h, p):
    """Plain-JAX (f32) reference for validation."""
    x = jnp.maximum(h @ p["w1"].T + p["b1"], 0.0)
    a = jnp.tanh(x @ p["wa"].T + p["ba"])
    b = jax.nn.sigmoid(x @ p["wb"].T + p["bb"])
    A = (a * b) @ p["wc"].T + p["bc"]          # (N, C)
    A_t = A.T                                  # (C, N)
    A_soft = jax.nn.softmax(A_t, axis=1)
    M = A_soft @ x                             # (C, L1)
    logits = (jnp.sum(M * p["wcls"], axis=1) + p["bcls"])[None, :]
    y_prob = jax.nn.softmax(logits, axis=1)
    y_hat = jnp.argmax(logits, axis=1, keepdims=True).astype(jnp.int32)
    return logits, y_prob, y_hat, A_t, M


def make_params(key, L0, L1, L2, C):
    ks = jax.random.split(key, 10)
    s = 0.05
    return {
        "w1":   s * jax.random.normal(ks[0], (L1, L0), jnp.float32),
        "b1":   s * jax.random.normal(ks[1], (L1,), jnp.float32),
        "wa":   s * jax.random.normal(ks[2], (L2, L1), jnp.float32),
        "ba":   s * jax.random.normal(ks[3], (L2,), jnp.float32),
        "wb":   s * jax.random.normal(ks[4], (L2, L1), jnp.float32),
        "bb":   s * jax.random.normal(ks[5], (L2,), jnp.float32),
        "wc":   s * jax.random.normal(ks[6], (C, L2), jnp.float32),
        "bc":   s * jax.random.normal(ks[7], (C,), jnp.float32),
        "wcls": s * jax.random.normal(ks[8], (C, L1), jnp.float32),
        "bcls": s * jax.random.normal(ks[9], (C,), jnp.float32),
    }


if __name__ == "__main__":
    # CLAM_MB 'small' config [1024, 512, 256], n_classes=2, scaled down:
    # L0=256, L1=128, L2=128, C=2; bag of N=1000 instances (not a tile multiple,
    # to exercise the online-softmax + ragged-tile masking across 2 tiles of 512).
    N, L0, L1, L2, C = 1000, 256, 128, 128, 2

    key = jax.random.PRNGKey(0)
    k_h, k_p = jax.random.split(key)
    h = jax.random.normal(k_h, (N, L0), jnp.float32)
    params = make_params(k_p, L0, L1, L2, C)
    prep = prepare_params(params)

    logits, y_prob, y_hat, a_raw, M = clam_mb_forward(h, prep)   # tile_n=512 default
    jax.block_until_ready((logits, y_prob, y_hat, a_raw, M))

    # sanity check against a plain-JAX f32 reference (kernel matmuls are bf16)
    r_logits, r_prob, r_hat, r_araw, r_M = _reference_forward(h, params)
    np.testing.assert_allclose(np.asarray(logits), np.asarray(r_logits), rtol=2e-2, atol=2e-2)
    np.testing.assert_allclose(np.asarray(y_prob), np.asarray(r_prob), rtol=2e-2, atol=2e-2)
    np.testing.assert_allclose(np.asarray(a_raw), np.asarray(r_araw), rtol=2e-2, atol=2e-2)
    np.testing.assert_allclose(np.asarray(M), np.asarray(r_M), rtol=3e-2, atol=3e-2)

    # Y_hat must match the kernel's own logits; compare to reference only if not near-tied
    assert int(y_hat[0, 0]) == int(np.argmax(np.asarray(logits)[0]))
    gap = abs(float(r_logits[0, 0] - r_logits[0, 1]))
    if gap > 0.05:
        assert int(y_hat[0, 0]) == int(r_hat[0, 0])

    print("KERNEL_OK")
</pallas_src>

<mosaic_0001>
module attributes {stable_mosaic.version = 11 : i64} {
  func.func @_clam_mb_kernel(%arg0: i32, %arg1: memref<1xi32, #tpu.memory_space<smem>>, %arg2: memref<512x256xf32, #tpu.memory_space<vmem>>, %arg3: memref<256x128xbf16, #tpu.memory_space<vmem>>, %arg4: memref<1x128xf32, #tpu.memory_space<vmem>>, %arg5: memref<128x256xbf16, #tpu.memory_space<vmem>>, %arg6: memref<1x256xf32, #tpu.memory_space<vmem>>, %arg7: memref<2x128xbf16, #tpu.memory_space<vmem>>, %arg8: memref<2x1xf32, #tpu.memory_space<vmem>>, %arg9: memref<2x128xf32, #tpu.memory_space<vmem>>, %arg10: memref<2x1xf32, #tpu.memory_space<vmem>>, %arg11: memref<2x1xf32, #tpu.memory_space<vmem>>, %arg12: memref<2x1xf32, #tpu.memory_space<vmem>>, %arg13: memref<1x1xi32, #tpu.memory_space<vmem>>, %arg14: memref<2x512xf32, #tpu.memory_space<vmem>>, %arg15: memref<2x128xf32, #tpu.memory_space<vmem>>, %arg16: memref<2x1xf32, #tpu.memory_space<vmem>>, %arg17: memref<2x1xf32, #tpu.memory_space<vmem>>, %arg18: memref<2x128xf32, #tpu.memory_space<vmem>>) attributes {dimension_semantics = [#tpu.dimension_semantics<arbitrary>], iteration_bounds = array<i64: 2>, scalar_prefetch = 1 : i64, scratch_operands = 3 : i64, tpu.core_type = #tpu.core_type<tc>, window_params = [{transform_indices = @transform_0, window_bounds = array<i64: 512, 256>}, {pipeline_mode = #tpu.pipeline_mode<synchronous>, transform_indices = @transform_1, window_bounds = array<i64: 256, 128>}, {pipeline_mode = #tpu.pipeline_mode<synchronous>, transform_indices = @transform_2, window_bounds = array<i64: 1, 128>}, {pipeline_mode = #tpu.pipeline_mode<synchronous>, transform_indices = @transform_3, window_bounds = array<i64: 128, 256>}, {pipeline_mode = #tpu.pipeline_mode<synchronous>, transform_indices = @transform_4, window_bounds = array<i64: 1, 256>}, {pipeline_mode = #tpu.pipeline_mode<synchronous>, transform_indices = @transform_5, window_bounds = array<i64: 2, 128>}, {pipeline_mode = #tpu.pipeline_mode<synchronous>, transform_indices = @transform_6, window_bounds = array<i64: 2, 1>}, {pipeline_mode = #tpu.pipeline_mode<synchronous>, transform_indices = @transform_7, window_bounds = array<i64: 2, 128>}, {pipeline_mode = #tpu.pipeline_mode<synchronous>, transform_indices = @transform_8, window_bounds = array<i64: 2, 1>}, {pipeline_mode = #tpu.pipeline_mode<synchronous>, transform_indices = @transform_9, window_bounds = array<i64: 2, 1>}, {pipeline_mode = #tpu.pipeline_mode<synchronous>, transform_indices = @transform_10, window_bounds = array<i64: 2, 1>}, {pipeline_mode = #tpu.pipeline_mode<synchronous>, transform_indices = @transform_11, window_bounds = array<i64: 1, 1>}, {transform_indices = @transform_12, window_bounds = array<i64: 2, 512>}, {pipeline_mode = #tpu.pipeline_mode<synchronous>, transform_indices = @transform_13, window_bounds = array<i64: 2, 128>}]} {
    %c0 = arith.constant 0 : index
    %0 = memref.load %arg1[%c0] : memref<1xi32, #tpu.memory_space<smem>>
    %c0_i32 = arith.constant 0 : i32
    %1 = arith.cmpi eq, %arg0, %c0_i32 : i32
    %2 = arith.extui %1 : i1 to i32
    %c0_i32_0 = arith.constant 0 : i32
    %3 = arith.cmpi ne, %2, %c0_i32_0 : i32
    scf.if %3 {
      %cst_40 = arith.constant -1.000000e+30 : f32
      %79 = vector.broadcast %cst_40 : f32 to vector<2x1xf32>
      %c0_41 = arith.constant 0 : index
      %c0_42 = arith.constant 0 : index
      %80 = vector.load %arg16[%c0_41, %c0_42] : memref<2x1xf32, #tpu.memory_space<vmem>>, vector<2x1xf32>
      tpu.vector_store %arg16[%c0_41, %c0_42], %79 {strides = array<i32>} : memref<2x1xf32, #tpu.memory_space<vmem>>, vector<2x1xf32>,
      %cst_43 = arith.constant 0.000000e+00 : f32
      %81 = vector.broadcast %cst_43 : f32 to vector<2x1xf32>
      %c0_44 = arith.constant 0 : index
      %c0_45 = arith.constant 0 : index
      %82 = vector.load %arg17[%c0_44, %c0_45] : memref<2x1xf32, #tpu.memory_space<vmem>>, vector<2x1xf32>
      tpu.vector_store %arg17[%c0_44, %c0_45], %81 {strides = array<i32>} : memref<2x1xf32, #tpu.memory_space<vmem>>, vector<2x1xf32>,
      %cst_46 = arith.constant 0.000000e+00 : f32
      %83 = vector.broadcast %cst_46 : f32 to vector<2x128xf32>
      %c0_47 = arith.constant 0 : index
      %c0_48 = arith.constant 0 : index
      %84 = vector.load %arg18[%c0_47, %c0_48] : memref<2x128xf32, #tpu.memory_space<vmem>>, vector<2x128xf32>
      tpu.vector_store %arg18[%c0_47, %c0_48], %83 {strides = array<i32>} : memref<2x128xf32, #tpu.memory_space<vmem>>, vector<2x128xf32>,
    } else {
    }
    %c0_1 = arith.constant 0 : index
    %c0_2 = arith.constant 0 : index
    %4 = vector.load %arg2[%c0_1, %c0_2] : memref<512x256xf32, #tpu.memory_space<vmem>>, vector<512x256xf32>
    %5 = arith.truncf %4 : vector<512x256xf32> to vector<512x256xbf16>
    %c0_3 = arith.constant 0 : index
    %c0_4 = arith.constant 0 : index
    %6 = vector.load %arg3[%c0_3, %c0_4] : memref<256x128xbf16, #tpu.memory_space<vmem>>, vector<256x128xbf16>
    %cst = arith.constant dense<0.000000e+00> : vector<512x128xf32>
    %7 = tpu.matmul %5, %6, %cst {dimension_numbers = #tpu.dot_dimension_numbers<[1], [0], [0], [1], [0, 0, 1, 1], [], []>} : vector<512x256xbf16>, vector<256x128xbf16>, vector<512x128xf32> -> vector<512x128xf32>
    %c0_5 = arith.constant 0 : index
    %c0_6 = arith.constant 0 : index
    %8 = vector.load %arg4[%c0_5, %c0_6] : memref<1x128xf32, #tpu.memory_space<vmem>>, vector<1x128xf32>
    %9 = vector.broadcast %8 : vector<1x128xf32> to vector<512x128xf32>
    %10 = arith.addf %7, %9 : vector<512x128xf32>
    %cst_7 = arith.constant 0.000000e+00 : f32
    %11 = vector.broadcast %cst_7 : f32 to vector<512x128xf32>
    %12 = arith.maximumf %10, %11 : vector<512x128xf32>
    %13 = tpu.iota {dimensions = array<i32: 0>} : vector<512x1xi32>
    %c512_i32 = arith.constant 512 : i32
    %14 = arith.muli %arg0, %c512_i32 : i32
    %15 = vector.broadcast %14 : i32 to vector<512x1xi32>
    %16 = arith.addi %13, %15 : vector<512x1xi32>
    %17 = vector.broadcast %0 : i32 to vector<512x1xi32>
    %18 = arith.cmpi slt, %16, %17 : vector<512x1xi32>
    %cst_8 = arith.constant 0.000000e+00 : f32
    %19 = vector.shape_cast %18 : vector<512x1xi1> to vector<512x1xi1>
    %20 = vector.broadcast %19 : vector<512x1xi1> to vector<512x128xi1>
    %21 = vector.broadcast %cst_8 : f32 to vector<512x128xf32>
    %22 = arith.select %20, %12, %21 : vector<512x128xi1>, vector<512x128xf32>
    %23 = arith.truncf %22 : vector<512x128xf32> to vector<512x128xbf16>
    %c0_9 = arith.constant 0 : index
    %c0_10 = arith.constant 0 : index
    %24 = vector.load %arg5[%c0_9, %c0_10] : memref<128x256xbf16, #tpu.memory_space<vmem>>, vector<128x256xbf16>
    %cst_11 = arith.constant dense<0.000000e+00> : vector<512x256xf32>
    %25 = tpu.matmul %23, %24, %cst_11 {dimension_numbers = #tpu.dot_dimension_numbers<[1], [0], [0], [1], [0, 0, 1, 1], [], []>} : vector<512x128xbf16>, vector<128x256xbf16>, vector<512x256xf32> -> vector<512x256xf32>
    %c0_12 = arith.constant 0 : index
    %c0_13 = arith.constant 0 : index
    %26 = vector.load %arg6[%c0_12, %c0_13] : memref<1x256xf32, #tpu.memory_space<vmem>>, vector<1x256xf32>
    %27 = vector.broadcast %26 : vector<1x256xf32> to vector<512x256xf32>
    %28 = arith.addf %25, %27 : vector<512x256xf32>
    %29 = vector.extract_strided_slice %28 {offsets = [0, 0], sizes = [512, 128], strides = [1, 1]} : vector<512x256xf32> to vector<512x128xf32>
    %30 = math.tanh %29 : vector<512x128xf32>
    %31 = vector.extract_strided_slice %28 {offsets = [0, 128], sizes = [512, 128], strides = [1, 1]} : vector<512x256xf32> to vector<512x128xf32>
    %32 = arith.negf %31 : vector<512x128xf32>
    %33 = math.exp %32 : vector<512x128xf32>
    %cst_14 = arith.constant 1.000000e+00 : f32
    %34 = vector.broadcast %cst_14 : f32 to vector<512x128xf32>
    %35 = arith.addf %34, %33 : vector<512x128xf32>
    %36 = arith.divf %34, %35 : vector<512x128xf32>
    %37 = arith.mulf %30, %36 : vector<512x128xf32>
    %38 = arith.truncf %37 : vector<512x128xf32> to vector<512x128xbf16>
    %c0_15 = arith.constant 0 : index
    %c0_16 = arith.constant 0 : index
    %39 = vector.load %arg7[%c0_15, %c0_16] : memref<2x128xbf16, #tpu.memory_space<vmem>>, vector<2x128xbf16>
    %cst_17 = arith.constant dense<0.000000e+00> : vector<2x512xf32>
    %40 = tpu.matmul %39, %38, %cst_17 {dimension_numbers = #tpu.dot_dimension_numbers<[1], [1], [0], [0], [0, 0, 1, 0], [], []>} : vector<2x128xbf16>, vector<512x128xbf16>, vector<2x512xf32> -> vector<2x512xf32>
    %c0_18 = arith.constant 0 : index
    %c0_19 = arith.constant 0 : index
    %41 = vector.load %arg8[%c0_18, %c0_19] : memref<2x1xf32, #tpu.memory_space<vmem>>, vector<2x1xf32>
    %42 = vector.broadcast %41 : vector<2x1xf32> to vector<2x512xf32>
    %43 = arith.addf %40, %42 : vector<2x512xf32>
    %c0_20 = arith.constant 0 : index
    %c0_21 = arith.constant 0 : index
    %44 = vector.load %arg14[%c0_20, %c0_21] : memref<2x512xf32, #tpu.memory_space<vmem>>, vector<2x512xf32>
    tpu.vector_store %arg14[%c0_20, %c0_21], %43 {strides = array<i32>} : memref<2x512xf32, #tpu.memory_space<vmem>>, vector<2x512xf32>,
    %45 = tpu.iota {dimensions = array<i32: 1>} : vector<2x512xi32>
    %c512_i32_22 = arith.constant 512 : i32
    %46 = arith.muli %arg0, %c512_i32_22 : i32
    %47 = vector.broadcast %46 : i32 to vector<2x512xi32>
    %48 = arith.addi %45, %47 : vector<2x512xi32>
    %49 = vector.broadcast %0 : i32 to vector<2x512xi32>
    %50 = arith.cmpi slt, %48, %49 : vector<2x512xi32>
    %cst_23 = arith.constant -1.000000e+30 : f32
    %51 = vector.broadcast %cst_23 : f32 to vector<2x512xf32>
    %52 = arith.select %50, %43, %51 : vector<2x512xi1>, vector<2x512xf32>
    %c0_24 = arith.constant 0 : index
    %c0_25 = arith.constant 0 : index
    %53 = vector.load %arg16[%c0_24, %c0_25] : memref<2x1xf32, #tpu.memory_space<vmem>>, vector<2x1xf32>
    %cst_26 = arith.constant dense<0xFF800000> : vector<2xf32>
    %54 = vector.multi_reduction <maximumf>, %52, %cst_26 [1] : vector<2x512xf32> to vector<2xf32>
    %55 = vector.shape_cast %54 : vector<2xf32> to vector<2x1xf32>
    %56 = arith.maximumf %53, %55 : vector<2x1xf32>
    %57 = arith.subf %53, %56 : vector<2x1xf32>
    %58 = math.exp %57 : vector<2x1xf32>
    %59 = vector.broadcast %56 : vector<2x1xf32> to vector<2x512xf32>
    %60 = arith.subf %52, %59 : vector<2x512xf32>
    %61 = math.exp %60 : vector<2x512xf32>
    %c0_27 = arith.constant 0 : index
    %c0_28 = arith.constant 0 : index
    %62 = vector.load %arg17[%c0_27, %c0_28] : memref<2x1xf32, #tpu.memory_space<vmem>>, vector<2x1xf32>
    %63 = arith.mulf %58, %62 : vector<2x1xf32>
    %cst_29 = arith.constant dense<0.000000e+00> : vector<2xf32>
    %64 = vector.multi_reduction <add>, %61, %cst_29 [1] : vector<2x512xf32> to vector<2xf32>
    %65 = vector.shape_cast %64 : vector<2xf32> to vector<2x1xf32>
    %66 = arith.addf %63, %65 : vector<2x1xf32>
    %c0_30 = arith.constant 0 : index
    %c0_31 = arith.constant 0 : index
    %67 = vector.load %arg17[%c0_30, %c0_31] : memref<2x1xf32, #tpu.memory_space<vmem>>, vector<2x1xf32>
    tpu.vector_store %arg17[%c0_30, %c0_31], %66 {strides = array<i32>} : memref<2x1xf32, #tpu.memory_space<vmem>>, vector<2x1xf32>,
    %c0_32 = arith.constant 0 : index
    %c0_33 = arith.constant 0 : index
    %68 = vector.load %arg18[%c0_32, %c0_33] : memref<2x128xf32, #tpu.memory_space<vmem>>, vector<2x128xf32>
    %69 = vector.broadcast %58 : vector<2x1xf32> to vector<2x128xf32>
    %70 = arith.mulf %69, %68 : vector<2x128xf32>
    %71 = arith.truncf %61 : vector<2x512xf32> to vector<2x512xbf16>
    %cst_34 = arith.constant dense<0.000000e+00> : vector<2x128xf32>
    %72 = tpu.matmul %71, %23, %cst_34 {dimension_numbers = #tpu.dot_dimension_numbers<[1], [0], [0], [1], [0, 0, 1, 1], [], []>} : vector<2x512xbf16>, vector<512x128xbf16>, vector<2x128xf32> -> vector<2x128xf32>
    %73 = arith.addf %70, %72 : vector<2x128xf32>
    %c0_35 = arith.constant 0 : index
    %c0_36 = arith.constant 0 : index
    %74 = vector.load %arg18[%c0_35, %c0_36] : memref<2x128xf32, #tpu.memory_space<vmem>>, vector<2x128xf32>
    tpu.vector_store %arg18[%c0_35, %c0_36], %73 {strides = array<i32>} : memref<2x128xf32, #tpu.memory_space<vmem>>, vector<2x128xf32>,
    %c0_37 = arith.constant 0 : index
    %c0_38 = arith.constant 0 : index
    %75 = vector.load %arg16[%c0_37, %c0_38] : memref<2x1xf32, #tpu.memory_space<vmem>>, vector<2x1xf32>
    tpu.vector_store %arg16[%c0_37, %c0_38], %56 {strides = array<i32>} : memref<2x1xf32, #tpu.memory_space<vmem>>, vector<2x1xf32>,
    %c1_i32 = arith.constant 1 : i32
    %76 = arith.cmpi eq, %arg0, %c1_i32 : i32
    %77 = arith.extui %76 : i1 to i32
    %c0_i32_39 = arith.constant 0 : i32
    %78 = arith.cmpi ne, %77, %c0_i32_39 : i32
    scf.if %78 {
      %c0_40 = arith.constant 0 : index
      %c0_41 = arith.constant 0 : index
      %79 = vector.load %arg18[%c0_40, %c0_41] : memref<2x128xf32, #tpu.memory_space<vmem>>, vector<2x128xf32>
      %c0_42 = arith.constant 0 : index
      %c0_43 = arith.constant 0 : index
      %80 = vector.load %arg17[%c0_42, %c0_43] : memref<2x1xf32, #tpu.memory_space<vmem>>, vector<2x1xf32>
      %81 = vector.broadcast %80 : vector<2x1xf32> to vector<2x128xf32>
      %82 = arith.divf %79, %81 : vector<2x128xf32>
      %c0_44 = arith.constant 0 : index
      %c0_45 = arith.constant 0 : index
      %83 = vector.load %arg15[%c0_44, %c0_45] : memref<2x128xf32, #tpu.memory_space<vmem>>, vector<2x128xf32>
      tpu.vector_store %arg15[%c0_44, %c0_45], %82 {strides = array<i32>} : memref<2x128xf32, #tpu.memory_space<vmem>>, vector<2x128xf32>,
      %c0_46 = arith.constant 0 : index
      %c0_47 = arith.constant 0 : index
      %84 = vector.load %arg9[%c0_46, %c0_47] : memref<2x128xf32, #tpu.memory_space<vmem>>, vector<2x128xf32>
      %85 = arith.mulf %82, %84 : vector<2x128xf32>
      %cst_48 = arith.constant dense<0.000000e+00> : vector<2xf32>
      %86 = vector.multi_reduction <add>, %85, %cst_48 [1] : vector<2x128xf32> to vector<2xf32>
      %87 = vector.shape_cast %86 : vector<2xf32> to vector<2x1xf32>
      %c0_49 = arith.constant 0 : index
      %c0_50 = arith.constant 0 : index
      %88 = vector.load %arg10[%c0_49, %c0_50] : memref<2x1xf32, #tpu.memory_space<vmem>>, vector<2x1xf32>
      %89 = arith.addf %87, %88 : vector<2x1xf32>
      %c0_51 = arith.constant 0 : index
      %c0_52 = arith.constant 0 : index
      %90 = vector.load %arg11[%c0_51, %c0_52] : memref<2x1xf32, #tpu.memory_space<vmem>>, vector<2x1xf32>
      tpu.vector_store %arg11[%c0_51, %c0_52], %89 {strides = array<i32>} : memref<2x1xf32, #tpu.memory_space<vmem>>, vector<2x1xf32>,
      %cst_53 = arith.constant dense<0xFF800000> : vector<1xf32>
      %91 = vector.multi_reduction <maximumf>, %89, %cst_53 [0] : vector<2x1xf32> to vector<1xf32>
      %92 = vector.shape_cast %91 : vector<1xf32> to vector<1x1xf32>
      %93 = vector.broadcast %92 : vector<1x1xf32> to vector<2x1xf32>
      %94 = arith.subf %89, %93 : vector<2x1xf32>
      %95 = math.exp %94 : vector<2x1xf32>
      %cst_54 = arith.constant dense<0.000000e+00> : vector<1xf32>
      %96 = vector.multi_reduction <add>, %95, %cst_54 [0] : vector<2x1xf32> to vector<1xf32>
      %97 = vector.shape_cast %96 : vector<1xf32> to vector<1x1xf32>
      %98 = vector.broadcast %97 : vector<1x1xf32> to vector<2x1xf32>
      %99 = arith.divf %95, %98 : vector<2x1xf32>
      %c0_55 = arith.constant 0 : index
      %c0_56 = arith.constant 0 : index
      %100 = vector.load %arg12[%c0_55, %c0_56] : memref<2x1xf32, #tpu.memory_space<vmem>>, vector<2x1xf32>
      tpu.vector_store %arg12[%c0_55, %c0_56], %99 {strides = array<i32>} : memref<2x1xf32, #tpu.memory_space<vmem>>, vector<2x1xf32>,
      %101 = tpu.iota {dimensions = array<i32: 0>} : vector<2x1xi32>
      %102 = vector.broadcast %92 : vector<1x1xf32> to vector<2x1xf32>
      %103 = arith.cmpf oeq, %89, %102 : vector<2x1xf32>
      %c2_i32 = arith.constant 2 : i32
      %104 = vector.broadcast %c2_i32 : i32 to vector<2x1xi32>
      %105 = arith.select %103, %101, %104 : vector<2x1xi1>, vector<2x1xi32>
      %cst_57 = arith.constant dense<2147483647> : vector<1xi32>
      %106 = vector.multi_reduction <minsi>, %105, %cst_57 [0] : vector<2x1xi32> to vector<1xi32>
      %107 = vector.shape_cast %106 : vector<1xi32> to vector<1x1xi32>
      %c0_58 = arith.constant 0 : index
      %c0_59 = arith.constant 0 : index
      %108 = vector.load %arg13[%c0_58, %c0_59] : memref<1x1xi32, #tpu.memory_space<vmem>>, vector<1x1xi32>
      tpu.vector_store %arg13[%c0_58, %c0_59], %107 {strides = array<i32>} : memref<1x1xi32, #tpu.memory_space<vmem>>, vector<1x1xi32>,
    } else {
    }
    return
  }
  func.func @transform_0(%arg0: i32, %arg1: memref<1xi32, #tpu.memory_space<smem>>) -> (i32, i32) {
    %c0_i32 = arith.constant 0 : i32
    %c0_i32_0 = arith.constant 0 : i32
    return %arg0, %c0_i32 : i32, i32
  }
  func.func @transform_1(%arg0: i32, %arg1: memref<1xi32, #tpu.memory_space<smem>>) -> (i32, i32) {
    %c0_i32 = arith.constant 0 : i32
    %c0_i32_0 = arith.constant 0 : i32
    %c0_i32_1 = arith.constant 0 : i32
    return %c0_i32, %c0_i32_0 : i32, i32
  }
  func.func @transform_2(%arg0: i32, %arg1: memref<1xi32, #tpu.memory_space<smem>>) -> (i32, i32) {
    %c0_i32 = arith.constant 0 : i32
    %c0_i32_0 = arith.constant 0 : i32
    %c0_i32_1 = arith.constant 0 : i32
    return %c0_i32, %c0_i32_0 : i32, i32
  }
  func.func @transform_3(%arg0: i32, %arg1: memref<1xi32, #tpu.memory_space<smem>>) -> (i32, i32) {
    %c0_i32 = arith.constant 0 : i32
    %c0_i32_0 = arith.constant 0 : i32
    %c0_i32_1 = arith.constant 0 : i32
    return %c0_i32, %c0_i32_0 : i32, i32
  }
  func.func @transform_4(%arg0: i32, %arg1: memref<1xi32, #tpu.memory_space<smem>>) -> (i32, i32) {
    %c0_i32 = arith.constant 0 : i32
    %c0_i32_0 = arith.constant 0 : i32
    %c0_i32_1 = arith.constant 0 : i32
    return %c0_i32, %c0_i32_0 : i32, i32
  }
  func.func @transform_5(%arg0: i32, %arg1: memref<1xi32, #tpu.memory_space<smem>>) -> (i32, i32) {
    %c0_i32 = arith.constant 0 : i32
    %c0_i32_0 = arith.constant 0 : i32
    %c0_i32_1 = arith.constant 0 : i32
    return %c0_i32, %c0_i32_0 : i32, i32
  }
  func.func @transform_6(%arg0: i32, %arg1: memref<1xi32, #tpu.memory_space<smem>>) -> (i32, i32) {
    %c0_i32 = arith.constant 0 : i32
    %c0_i32_0 = arith.constant 0 : i32
    %c0_i32_1 = arith.constant 0 : i32
    return %c0_i32, %c0_i32_0 : i32, i32
  }
  func.func @transform_7(%arg0: i32, %arg1: memref<1xi32, #tpu.memory_space<smem>>) -> (i32, i32) {
    %c0_i32 = arith.constant 0 : i32
    %c0_i32_0 = arith.constant 0 : i32
    %c0_i32_1 = arith.constant 0 : i32
    return %c0_i32, %c0_i32_0 : i32, i32
  }
  func.func @transform_8(%arg0: i32, %arg1: memref<1xi32, #tpu.memory_space<smem>>) -> (i32, i32) {
    %c0_i32 = arith.constant 0 : i32
    %c0_i32_0 = arith.constant 0 : i32
    %c0_i32_1 = arith.constant 0 : i32
    return %c0_i32, %c0_i32_0 : i32, i32
  }
  func.func @transform_9(%arg0: i32, %arg1: memref<1xi32, #tpu.memory_space<smem>>) -> (i32, i32) {
    %c0_i32 = arith.constant 0 : i32
    %c0_i32_0 = arith.constant 0 : i32
    %c0_i32_1 = arith.constant 0 : i32
    return %c0_i32, %c0_i32_0 : i32, i32
  }
  func.func @transform_10(%arg0: i32, %arg1: memref<1xi32, #tpu.memory_space<smem>>) -> (i32, i32) {
    %c0_i32 = arith.constant 0 : i32
    %c0_i32_0 = arith.constant 0 : i32
    %c0_i32_1 = arith.constant 0 : i32
    return %c0_i32, %c0_i32_0 : i32, i32
  }
  func.func @transform_11(%arg0: i32, %arg1: memref<1xi32, #tpu.memory_space<smem>>) -> (i32, i32) {
    %c0_i32 = arith.constant 0 : i32
    %c0_i32_0 = arith.constant 0 : i32
    %c0_i32_1 = arith.constant 0 : i32
    return %c0_i32, %c0_i32_0 : i32, i32
  }
  func.func @transform_12(%arg0: i32, %arg1: memref<1xi32, #tpu.memory_space<smem>>) -> (i32, i32) {
    %c0_i32 = arith.constant 0 : i32
    %c0_i32_0 = arith.constant 0 : i32
    return %c0_i32, %arg0 : i32, i32
  }
  func.func @transform_13(%arg0: i32, %arg1: memref<1xi32, #tpu.memory_space<smem>>) -> (i32, i32) {
    %c0_i32 = arith.constant 0 : i32
    %c0_i32_0 = arith.constant 0 : i32
    %c0_i32_1 = arith.constant 0 : i32
    return %c0_i32, %c0_i32_0 : i32, i32
  }
}

</mosaic_0001>

<bundles_post_ra>
// kernel: clam_mb_forward.1
= control target key start
LH: loop header
LB: loop body
LE: loop exit
PB: predicated region body
PF: predicated region fallthrough
CT: control target
= control target key end

     0   :  { %s5821_s0 = inlined_call_operand.<no memory space> [shape: s32[1], index: 0, kind: input, shape index: {}]   ;;  %s5822_s1 = inlined_call_operand.hbm [shape: f32[1000,256], index: 1, kind: input, shape index: {}]   ;;  %s5823_s2 = inlined_call_operand.hbm [shape: bf16[256,128], index: 2, kind: input, shape index: {}]   ;;  %s5824_s3 = inlined_call_operand.vmem [shape: f32[1,128], index: 3, kind: input, shape index: {}]   ;;  %s5825_s4 = inlined_call_operand.hbm [shape: bf16[128,256], index: 4, kind: input, shape index: {}]   ;;  %s5826_s5 = inlined_call_operand.vmem [shape: f32[1,256], index: 5, kind: input, shape index: {}]   ;;  %s5827_s6 = inlined_call_operand.vmem [shape: bf16[2,128], index: 6, kind: input, shape index: {}]   ;;  %s5828_s7 = inlined_call_operand.vmem [shape: f32[2,1], index: 7, kind: input, shape index: {}]   ;;  %s5829_s8 = inlined_call_operand.vmem [shape: f32[2,128], index: 8, kind: input, shape index: {}]   ;;  %s5830_s9 = inlined_call_operand.vmem [shape: f32[2,1], index: 9, kind: input, shape index: {}]   ;;  %s5831_s10 = inlined_call_operand.vmem [shape: f32[2,1], index: 10, kind: output, shape index: {0}]   ;;  %s5832_s11 = inlined_call_operand.vmem [shape: f32[2,1], index: 11, kind: output, shape index: {1}]   ;;  %s5833_s12 = inlined_call_operand.hbm [shape: s32[1,1], index: 12, kind: output, shape index: {2}]   ;;  %s5834_s13 = inlined_call_operand.hbm [shape: f32[2,1024], index: 13, kind: output, shape index: {3}]   ;;  %s5835_s14 = inlined_call_operand.hbm [shape: f32[2,128], index: 14, kind: output, shape index: {4}]  }
   0x1   :  { %5918 = sst [smem:[#allocation71_spill]] %s5832_s11 }
   0x2   :  { %5919 = sst [smem:[#allocation72_spill]] %s5833_s12 }
   0x3   :  { %5920 = sst [smem:[#allocation73_spill]] %s5834_s13 }
   0x4   :  { %5921 = sst [smem:[#allocation74_spill]] %s5835_s14 }
   0x5   :  { %20 = sst [smem:[#allocation6]] %s5821_s0 }
   0x6   :  { %21 = vsyncpa [#allocation8], 0 }
   0x7   :  { %23 = vsyncpa [#allocation8 + $0x1], 0 }
   0x8   :  { %24 = vsyncpa [#allocation11], 0 }
   0x9   :  { %25 = vsyncpa [#allocation9], 0 }
   0xa   :  { %26 = vsyncpa [#allocation15], 0 }
   0xb   :  { %28 = vsyncpa [#allocation15 + $0x1], 0  ;;  %s4342_s15 = smov 0   ;;  %s4344_s16 = smov 0  }
   0xc   :  { %s4346_s17 = smov 0   ;;  %s4348_s18 = smov 0  }
   0xd LB: > { %s4361_s0 = sadd.s32 4294967295, %s4245_s18   ;;  %s5836_s19 = sadd.s32 4294967294, %s4245_s18   ;;  %s4245_s18 = sphi %s4348_s18, %s6139_s18   ;;  %s4241_s17 = sphi %s4346_s17, %s6143_s17   ;;  %s4237_s16 = sphi %s4344_s16, %s6142_s16   ;;  %s4233_s15 = sphi %s4342_s15, %s6141_s15  }
   0xe   : > { %s4365_s20 = sadd.s32 1, %s4245_s18   ;;  %s41_s21 = sadd.s32 1, %s4241_s17 }
   0xf   : > { %5922 = sst [smem:[#allocation22_spill]] %s4365_s20  ;;  %s38_s22 = ssub.s32 %s4245_s18, %s4365_s20 }
  0x10   : > { %p48_p0 = scmp.ne.s32.totalorder %s4241_s17, %s4237_s16  ;;  %p39_p1 = scmp.eq.s32.totalorder %s38_s22, 0 }
  0x11   : > { %p49_p2 = scmp.eq.s32.totalorder %s4245_s18, 0  ;;  %p54_p3 = scmp.ne.s32.totalorder %s4237_s16, %s4233_s15 }
  0x12   : > { %p5843_p4 = scmp.eq.s32.totalorder %s4361_s0, 0  ;;  %p5842_p7 = scmp.eq.s32.totalorder %s4361_s0, 1 }
  0x13   : > { %s4376_s23 = scalar_select %p39_p1, %s4241_s17, %s41_s21  }
  0x14   : > { %p4378_p5 = por %p49_p2, %p48_p0  ;;  %p4384_p6 = por %p5843_p4, %p54_p3 }
  0x15   : > { %5923 = sst [smem:[#allocation23_spill]] %s4376_s23  ;;  %p315_p8 = scmp.eq.s32.totalorder %s5836_s19, 1 }
  0x16   : > { %s5924_s24 = scalar_select %p4378_p5, 1, 0 }
  0x17   : > { %s5925_s25 = scalar_select %p4384_p6, 1, 0 }
  0x18   : > { %p3097_p9 = scmp.ge.s32.totalorder %s4245_s18, 1  ;;  %p343_p10 = scmp.lt.s32.totalorder %s4245_s18, 3 }
  0x19   : > { %p4395_p11 = por %p5842_p7, %p48_p0  ;;  %p4399_p12 = por %p315_p8, %p54_p3 }
  0x1a   : > { %p4403_p13 = pnand %p3097_p9, %p343_p10  ;;  %s4247_s29 = smov [#allocation10]  }
  0x1b   : > { %s5926_s26 = scalar_select %p4395_p11, 1, 0 }
  0x1c   : > { %s5928_s27 = scalar_select %p4399_p12, 1, 0 }
  0x1d   : > { %5927 = sst [smem:[#allocation24_spill]] %s5926_s26  ;;  %p3519_p2 = pneg %p4403_p13 }
  0x1e   : > { %5929 = sst [smem:[#allocation25_spill]] %s5928_s27  ;;  %s355_s30 = sshll.u32 %s4247_s29, 4  ;;  %s356_s30 = int_to_ptr.vmem [resolvable:$true] %s355_s30 }
  0x1f   : > { %s5930_s28 = scalar_select %p4403_p13, 1, 0 }
  0x20   : > { %p4412_p0 = pnand %p3519_p2, %p5843_p4  ;;  %s4248_s21 = smov [#allocation12]  }
  0x21   : > { %s371_s22 = sshll.u32 %s4248_s21, 4  ;;  %s4031_s20 = scalar_lea.hbm %s5823_s2, 2048  ;;  %s4416_s22 = int_to_ptr.vmem [resolvable:$true] %s371_s22 }
  0x22   : > { %p4032_p3 = scmp.ne.s32.totalorder %s5823_s2, %s4031_s20  ;;  %p4033_p8 = pneg %p4412_p0 }
  0x23   : > { %p4038_p2 = scmp.lt.u32.totalorder %s4031_s20, %s5823_s2 }
  0x24   : > { %p4034_p9 = pnand %p4033_p8, %p4032_p3 }
  0x26   : > { %p4035_p10 = pneg %p4034_p9 }
  0x28   : > { %p4040_p7 = pnand %p4038_p2, %p4035_p10 }
  0x2a   : > { %4043 = shalt.err (!%p4040_p7)
}
  0x2b   : > { %s4044_s21 = scalar_lea.vmem %s356_s30, 2048  ;;  %p4052_p11 = scmp.lt.s32.totalorder %s356_s30, %s356_s30 }
  0x2c   : > { %p4045_p1 = scmp.ne.s32.totalorder %s356_s30, %s4044_s21  ;;  %p4053_p6 = scmp.lt.s32.totalorder %s4044_s21, %s4044_s21 }
  0x2e   : > { %p4047_p4 = pnand %p4045_p1, %p4033_p8  ;;  %p4054_p13 = por %p4053_p6, %p4052_p11 }
  0x30   : > { %p4048_p12 = pneg %p4047_p4 }
  0x32   : > { %p4055_p5 = pnand %p4054_p13, %p4048_p12 }
  0x34   : > { %4058 = shalt.err (!%p4055_p5)
}
  0x35   : > { %s4249_s14 = smov 64   ;;  %s4250_s19 = smov 4  }
  0x36   : > { %3522 = dma.hbm_to_vmem [thread:$0]  (!%p4412_p0), %s5823_s2, 2048, %s356_s30, [#allocation11], %s4249_s14, %s4249_s14, %s4250_s19  }
  0x37   : > { %s4059_s29 = scalar_lea.hbm %s5825_s4, 2048 }
  0x38   : > { %p4060_p4 = scmp.ne.s32.totalorder %s5825_s4, %s4059_s29  ;;  %p4066_p7 = scmp.lt.u32.totalorder %s4059_s29, %s5825_s4 }
  0x3a   : > { %p4062_p5 = pnand %p4060_p4, %p4033_p8 }
  0x3c   : > { %p4063_p6 = pneg %p4062_p5 }
  0x3e   : > { %p4068_p11 = pnand %p4066_p7, %p4063_p6 }
  0x40   : > { %4071 = shalt.err (!%p4068_p11)
}
  0x41   : > { %s4072_s30 = scalar_lea.vmem %s4416_s22, 2048  ;;  %p4080_p3 = scmp.lt.s32.totalorder %s4416_s22, %s4416_s22 }
  0x42   : > { %p4073_p12 = scmp.ne.s32.totalorder %s4416_s22, %s4072_s30  ;;  %p4081_p9 = scmp.lt.s32.totalorder %s4072_s30, %s4072_s30 }
  0x44   : > { %p4075_p13 = pnand %p4073_p12, %p4033_p8  ;;  %p4082_p10 = por %p4081_p9, %p4080_p3 }
  0x46   : > { %p4076_p1 = pneg %p4075_p13 }
  0x48   : > { %p4083_p2 = pnand %p4082_p10, %p4076_p1 }
  0x4a   : > { %4086 = shalt.err (!%p4083_p2)
}
  0x4b   : > { %s4251_s11 = smov 128   ;;  %s4252_s13 = smov 8  }
  0x4c   : > { %3525 = dma.hbm_to_vmem [thread:$0]  (!%p4412_p0), %s5825_s4, 2048, %s4416_s22, [#allocation11], %s4251_s11, %s4251_s11, %s4252_s13  }
  0x4d   : > { %p3100_p4 = scmp.ge.s32.totalorder %s4245_s18, 2 }
  0x4e   : > { %p5932_p8 = scmp.ne.s32.totalorder (!%p3100_p4), %s5924_s24, 0 }
  0x4f   : > { %396 = sbr.rel (%p3100_p4) target bundleno = 121 (0x79), region = 48 }
  0x56   : > { %399 = sbr.rel (!%p5932_p8) target bundleno = 121 (0x79), region = 52  ;;  %s400_s19 = sand.u32 (%p5932_p8), 1, %s4241_s17  }
  0x57   : > { %s3102_s12 = sshll.u32 (%p5932_p8), %s4245_s18, 6  ;;  %s3101_s20 = sshll.u32 (%p5932_p8), %s400_s19, 10 }
  0x58   : > { %s406_s23 = ssub.s32 (%p5932_p8), 125, %s3102_s12  ;;  %s4475_s27 = scalar_lea.sflag (%p5932_p8), [#allocation8], %s400_s19 }
  0x59   : > { %p407_p5 = scmp.lt.s32.totalorder (%p5932_p8), %s406_s23, 64  ;;  %s404_s29 = scalar_lea.vmem (%p5932_p8), [#allocation7], %s3101_s20 }
  0x5d   : > { %s6145_s23 = smov (!%p407_p5, %s406_s23), 64 }
  0x5e   : > { %s4472_s15 = sshll.u32 %s6145_s23, 8 }
  0x5f   : > { %s412_s22 = ssub.s32 16384, %s4472_s15 }
  0x60   : > { %413 = vsyncadd %s4475_s27, %s412_s22  ;;  %p3105_p0 = scmp.ne.s32.totalorder %s4472_s15, 0  ;;  %s3418_s24 = sshll.u32 %s4245_s18, 14 }
  0x61   : > { %s4483_s11 = scalar_lea.hbm %s5822_s1, %s3418_s24  ;;  %s419_s13 = sshll.u32 %s404_s29, 4  ;;  %s4485_s13 = int_to_ptr.vmem [resolvable:$true] %s419_s13 }
  0x62   : > { %s4087_s26 = scalar_lea.hbm %s4483_s11, %s4472_s15  ;;  %s4091_s12 = scalar_lea.hbm %s5822_s1, 32000 }
  0x63   : > { %p4088_p6 = scmp.ne.s32.totalorder %s4483_s11, %s4087_s26  ;;  %p4092_p12 = scmp.lt.u32.totalorder %s4483_s11, %s5822_s1 }
  0x64   : > { %p4093_p13 = scmp.lt.u32.totalorder %s4091_s12, %s4087_s26  ;;  %p4095_p3 = scmp.lt.u32.totalorder %s4087_s26, %s4483_s11 }
  0x65   : > { %p4089_p7 = pnand %p4088_p6, %p3105_p0 }
  0x66   : > { %p4094_p1 = por %p4093_p13, %p4092_p12 }
  0x67   : > { %p4090_p11 = pneg %p4089_p7 }
  0x68   : > { %p4096_p9 = por %p4095_p3, %p4094_p1 }
  0x6a   : > { %p4097_p10 = pnand %p4096_p9, %p4090_p11 }
  0x6c   : > { %4100 = shalt.err (!%p4097_p10)
}
  0x6d   : > { %s4101_s22 = scalar_lea.vmem %s4485_s13, %s4472_s15  ;;  %s4253_s29 = smov [#allocation7]  }
  0x6e   : > { %p4102_p2 = scmp.ne.s32.totalorder %s4485_s13, %s4101_s22  ;;  %s4105_s24 = sshll.u32 %s4253_s29, 4  ;;  %s4106_s24 = int_to_ptr.vmem [resolvable:$false] %s4105_s24 }
  0x6f   : > { %s4107_s21 = scalar_lea.vmem %s4106_s24, 32768  ;;  %p4108_p6 = scmp.lt.s32.totalorder %s4485_s13, %s4106_s24 }
  0x70   : > { %p4103_p8 = pnand %p4102_p2, %p3105_p0  ;;  %p4109_p7 = scmp.lt.s32.totalorder %s4107_s21, %s4101_s22 }
  0x72   : > { %p4104_p5 = pneg %p4103_p8  ;;  %p4110_p12 = por %p4109_p7, %p4108_p6 }
  0x74   : > { %p4111_p13 = pnand %p4110_p12, %p4104_p5 }
  0x76   : > { %4114 = shalt.err (!%p4111_p13)
}
  0x77   : > { %s4254_s30 = smov 256   ;;  %s4255_s26 = smov 16  }
  0x78   : > { %425 = dma.hbm_to_vmem [thread:$0]  (%p3105_p0), %s4483_s11, %s4472_s15, %s4485_s13, %s4475_s27, %s4254_s30, %s4254_s30, %s4255_s26  }
  0x79 PF: > { %p5933_p11 = scmp.ne.s32.totalorder %s5930_s28, 0 }
  0x7b   : > { %431 = sbr.rel (%p5933_p11) target bundleno = 2036 (0x7f4), region = 56 }
  0x82   : > { %s433_s14 = sand.u32 1, %s4237_s16   ;;  %p5934_p1 = scmp.ne.s32.totalorder %s5925_s25, 0 }
  0x83   : > { %s3111_s19 = sshll.u32 %s433_s14, 10  ;;  %s434_s12 = scalar_lea.sflag [#allocation8], %s433_s14 }
  0x84   : > { %s4515_s20 = scalar_lea.vmem [#allocation7], %s3111_s19 }
  0x85   : > { %4212 = dma.done.wait (%p5934_p1), %s434_s12, 16384  }
  0x86   : > { %4214 = vsyncadd (%p5934_p1), %s434_s12, 4294950912  ;;  %p5935_p3 = scmp.eq.s32.totalorder %s4361_s0, 0 }
  0x88   : > { %4216 = dma.done.wait (%p5935_p3), [#allocation11], 4096   ;;  %p5936_p0 = pmov %p5935_p3 }
  0x89   : > { %s3114_s28 = sshll.u32 %s433_s14, 3  ;;  %s4525_s15 = sld [smem:[#allocation6]] }
  0x8a   : > { %4218 = vsyncadd (%p5936_p0), [#allocation11], 4294963200  ;;  %s4527_s27 = scalar_lea.vmem [#allocation14], %s3114_s28  ;;  %p5937_p9 = scmp.ne.s32.totalorder %s4361_s0, 0 }
  0x8b   : > { %vm501_vm0 = vcmask (!%p5937_p9), 1024   ;;  %v4256_v0 = vmov (!%p5937_p9), -1e+30   ;;  %v4257_v1 = vmov (!%p5937_p9), 0.0  }
  0x8c   : > { %500 = sbr.rel (%p5937_p9) target bundleno = 147 (0x93), region = 72  ;;  %502 = vst.msk [vmem:[#allocation2] sm:$0x3] (!%p5937_p9), %vm501_vm0, %v4256_v0  ;;  %503 = vst.msk [vmem:[#allocation3] sm:$0x3] (!%p5937_p9), %vm501_vm0, %v4257_v1 }
  0x8d   : > { %504 = vst [vmem:[#allocation4] sm:$0x3] (!%p5937_p9), %v4257_v1 }
  0x93 PF: > { %v3588_v2 = vld [vmem:[#allocation10] sm:$0xff]   ;;  %v5861_v3 = vmov 0   ;;  %v3589_v4 = vld [vmem:[#allocation10 + $0x8] sm:$0xff]   ;;  %v3590_v5 = vld [vmem:[#allocation10 + $0x10] sm:$0xff]   ;;  %s3133_s25 = sshll.u32 %s4361_s0, 9  ;;  %p3406_p10 = scmp.ne.s32.totalorder %s4361_s0, 1 }
  0x94   : > { %832 = vmatprep.subr.bf16.mxu0 %v5861_v3  ;;  %1745 = vmatprep.mubr.bf16.mxu1 %v5861_v3  ;;  %v3591_v6 = vld [vmem:[#allocation10 + $0x18] sm:$0xff]   ;;  %v3592_v7 = vld [vmem:[#allocation10 + $0x20] sm:$0xff]   ;;  %v506_v8 = vld [vmem:[%s4515_s20 + $0x8] sm:$0xff]  ;;  %s6121_s29 = sld [smem:[#allocation71_spill]] (!%p3406_p10) }
  0x95   : > { %833 = vmatpush1.bf16.msra.mxu0 %v3588_v2  ;;  %3586 = vset.pattern.permute.xlu0 %v5861_v3  ;;  %v508_v9 = vld [vmem:[%s4515_s20 + $0x18] sm:$0xff]  ;;  %v3593_v11 = vld [vmem:[#allocation10 + $0x28] sm:$0xff]   ;;  %v3594_v12 = vld [vmem:[#allocation10 + $0x30] sm:$0xff]  }
  0x96   : > { %834 = vmatprep.subr.bf16.mxu0 %v5861_v3  ;;  %3587 = vset.pattern.permute.xlu1 %v5861_v3  ;;  %v634_v10 = vpack.c.bf16 %v508_v9, %v506_v8  ;;  %v3595_v13 = vld [vmem:[#allocation10 + $0x38] sm:$0xff]   ;;  %v3596_v14 = vld [vmem:[#allocation10 + $0x40] sm:$0xff]   ;;  %v3597_v15 = vld [vmem:[#allocation10 + $0x48] sm:$0xff]  }
  0x97   : > { %v3598_v16 = vld [vmem:[#allocation10 + $0x50] sm:$0xff]   ;;  %v3599_v17 = vld [vmem:[#allocation10 + $0x58] sm:$0xff]   ;;  %v3600_v18 = vld [vmem:[#allocation10 + $0x60] sm:$0xff]  }
  0x98   : > { %864 = vmatprep.mubr.bf16.mxu0 %v634_v10  ;;  %v3601_v19 = vld [vmem:[#allocation10 + $0x68] sm:$0xff]   ;;  %v3602_v20 = vld [vmem:[#allocation10 + $0x70] sm:$0xff]   ;;  %v3603_v21 = vld [vmem:[#allocation10 + $0x78] sm:$0xff]  }
  0x99   : > { %835 = vmatpush1.bf16.msra.mxu0 %v3589_v4  ;;  %v505_v22 = vld [vmem:[%s4515_s20] sm:$0xff]  ;;  %v507_v23 = vld [vmem:[%s4515_s20 + $0x10] sm:$0xff]  ;;  %v510_v24 = vld [vmem:[%s4515_s20 + $0x28] sm:$0xff] }
  0x9a   : > { %836 = vmatprep.subr.bf16.mxu0 %v5861_v3  ;;  %v512_v25 = vld [vmem:[%s4515_s20 + $0x38] sm:$0xff]  ;;  %v633_v26 = vpack.c.bf16 %v507_v23, %v505_v22  ;;  %v509_v28 = vld [vmem:[%s4515_s20 + $0x20] sm:$0xff]  ;;  %v511_v29 = vld [vmem:[%s4515_s20 + $0x30] sm:$0xff] }
  0x9b   : > { %v636_v27 = vpack.c.bf16 %v512_v25, %v510_v24  ;;  %v514_v30 = vld [vmem:[%s4515_s20 + $0x48] sm:$0xff]  ;;  %v516_v31 = vld [vmem:[%s4515_s20 + $0x58] sm:$0xff]  ;;  %v635_v32 = vpack.c.bf16 %v511_v29, %v509_v28  ;;  %v513_v34 = vld [vmem:[%s4515_s20 + $0x40] sm:$0xff] }
  0x9c   : > { %v638_v33 = vpack.c.bf16 %v516_v31, %v514_v30  ;;  %v515_v35 = vld [vmem:[%s4515_s20 + $0x50] sm:$0xff]  ;;  %v518_v36 = vld [vmem:[%s4515_s20 + $0x68] sm:$0xff]  ;;  %v520_v37 = vld [vmem:[%s4515_s20 + $0x78] sm:$0xff] }
  0x9d   : > { %837 = vmatpush1.bf16.msra.mxu0 %v3590_v5  ;;  %v637_v38 = vpack.c.bf16 %v515_v35, %v513_v34  ;;  %v640_v39 = vpack.c.bf16 %v520_v37, %v518_v36  ;;  %v517_v40 = vld [vmem:[%s4515_s20 + $0x60] sm:$0xff]  ;;  %v519_v41 = vld [vmem:[%s4515_s20 + $0x70] sm:$0xff]  ;;  %v522_v42 = vld [vmem:[%s4515_s20 + $0x88] sm:$0xff] }
  0x9e   : > { %838 = vmatprep.subr.bf16.mxu0 %v5861_v3  ;;  %v524_v43 = vld [vmem:[%s4515_s20 + $0x98] sm:$0xff]  ;;  %v639_v44 = vpack.c.bf16 %v519_v41, %v517_v40  ;;  %v521_v46 = vld [vmem:[%s4515_s20 + $0x80] sm:$0xff]  ;;  %v523_v47 = vld [vmem:[%s4515_s20 + $0x90] sm:$0xff] }
  0x9f   : > { %v642_v45 = vpack.c.bf16 %v524_v43, %v522_v42  ;;  %v526_v48 = vld [vmem:[%s4515_s20 + $0xa8] sm:$0xff]  ;;  %v528_v49 = vld [vmem:[%s4515_s20 + $0xb8] sm:$0xff]  ;;  %v641_v50 = vpack.c.bf16 %v523_v47, %v521_v46  ;;  %v525_v52 = vld [vmem:[%s4515_s20 + $0xa0] sm:$0xff] }
  0xa0   : > { %v644_v51 = vpack.c.bf16 %v528_v49, %v526_v48  ;;  %v527_v53 = vld [vmem:[%s4515_s20 + $0xb0] sm:$0xff]  ;;  %v530_v54 = vld [vmem:[%s4515_s20 + $0xc8] sm:$0xff]  ;;  %v532_v55 = vld [vmem:[%s4515_s20 + $0xd8] sm:$0xff] }
  0xa1   : > { %839 = vmatpush1.bf16.msra.mxu0 %v3591_v6  ;;  %v643_v56 = vpack.c.bf16 %v527_v53, %v525_v52  ;;  %v646_v57 = vpack.c.bf16 %v532_v55, %v530_v54  ;;  %v529_v58 = vld [vmem:[%s4515_s20 + $0xc0] sm:$0xff]  ;;  %v531_v59 = vld [vmem:[%s4515_s20 + $0xd0] sm:$0xff]  ;;  %v534_v60 = vld [vmem:[%s4515_s20 + $0xe8] sm:$0xff] }
  0xa2   : > { %840 = vmatprep.subr.bf16.mxu0 %v5861_v3  ;;  %v536_v61 = vld [vmem:[%s4515_s20 + $0xf8] sm:$0xff]  ;;  %v645_v62 = vpack.c.bf16 %v531_v59, %v529_v58  ;;  %v533_v0 = vld [vmem:[%s4515_s20 + $0xe0] sm:$0xff]  ;;  %v535_v1 = vld [vmem:[%s4515_s20 + $0xf0] sm:$0xff] }
  0xa3   : > { %v648_v63 = vpack.c.bf16 %v536_v61, %v534_v60  ;;  %v538_v2 = vld [vmem:[%s4515_s20 + $0x108] sm:$0xff]  ;;  %v540_v4 = vld [vmem:[%s4515_s20 + $0x118] sm:$0xff]  ;;  %v647_v5 = vpack.c.bf16 %v535_v1, %v533_v0  ;;  %v537_v9 = vld [vmem:[%s4515_s20 + $0x100] sm:$0xff] }
  0xa4   : > { %v650_v6 = vpack.c.bf16 %v540_v4, %v538_v2  ;;  %v3606_v8 = vld [vmem:[#allocation12] ss:$8 sps:$4 sm:$0xff]   ;;  %v539_v10 = vld [vmem:[%s4515_s20 + $0x110] sm:$0xff]  ;;  %v548_v22 = vld [vmem:[%s4515_s20 + $0x158] sm:$0xff] }
  0xa5   : > { %841 = vmatpush1.bf16.msra.mxu0 %v3592_v7  ;;  %v3604_v7 = vld [vmem:[#allocation12 + $0x4] ss:$8 sps:$4 sm:$0xff]   ;;  %v3613_v25 = vld [vmem:[#allocation12 + $0x34] ss:$8 sps:$4 sm:$0xff]   ;;  %v3618_v30 = vld [vmem:[#allocation12 + $0x40] ss:$8 sps:$4 sm:$0xff]  }
  0xa6   : > { %842 = vmatprep.subr.bf16.mxu0 %v5861_v3  ;;  %1713 = vmatprep.subr.bf16.mxu1 %v3604_v7  ;;  %v545_v28 = vld [vmem:[%s4515_s20 + $0x140] sm:$0xff]  ;;  %v547_v29 = vld [vmem:[%s4515_s20 + $0x150] sm:$0xff]  ;;  %v550_v31 = vld [vmem:[%s4515_s20 + $0x168] sm:$0xff] }
  0xa7   : > { %1714 = vmatpush1.bf16.msra.mxu1 %v3606_v8  ;;  %v3619_v35 = vld [vmem:[#allocation12 + $0x54] ss:$8 sps:$4 sm:$0xff]   ;;  %v3621_v36 = vld [vmem:[#allocation12 + $0x50] ss:$8 sps:$4 sm:$0xff]   ;;  %v549_v37 = vld [vmem:[%s4515_s20 + $0x160] sm:$0xff] }
  0xa8   : > { %v556_v40 = vld [vmem:[%s4515_s20 + $0x198] sm:$0xff]  ;;  %v3622_v41 = vld [vmem:[#allocation12 + $0x64] ss:$8 sps:$4 sm:$0xff]   ;;  %v3624_v42 = vld [vmem:[#allocation12 + $0x60] ss:$8 sps:$4 sm:$0xff]  }
  0xa9   : > { %843 = vmatpush1.bf16.msra.mxu0 %v3593_v11  ;;  %v542_v11 = vld [vmem:[%s4515_s20 + $0x128] sm:$0xff]  ;;  %v3627_v46 = vld [vmem:[#allocation12 + $0x70] ss:$8 sps:$4 sm:$0xff]   ;;  %v553_v47 = vld [vmem:[%s4515_s20 + $0x180] sm:$0xff] }
  0xaa   : > { %844 = vmatprep.subr.bf16.mxu0 %v5861_v3  ;;  %v555_v48 = vld [vmem:[%s4515_s20 + $0x190] sm:$0xff]  ;;  %v558_v49 = vld [vmem:[%s4515_s20 + $0x1a8] sm:$0xff]  ;;  %v557_v53 = vld [vmem:[%s4515_s20 + $0x1a0] sm:$0xff] }
  0xab   : > { %v559_v54 = vld [vmem:[%s4515_s20 + $0x1b0] sm:$0xff]  ;;  %v562_v55 = vld [vmem:[%s4515_s20 + $0x1c8] sm:$0xff]  ;;  %v561_v59 = vld [vmem:[%s4515_s20 + $0x1c0] sm:$0xff] }
  0xac   : > { %v563_v60 = vld [vmem:[%s4515_s20 + $0x1d0] sm:$0xff]  ;;  %v566_v61 = vld [vmem:[%s4515_s20 + $0x1e8] sm:$0xff]  ;;  %v565_v1 = vld [vmem:[%s4515_s20 + $0x1e0] sm:$0xff] }
  0xad   : > { %845 = vmatpush1.bf16.msra.mxu0 %v3594_v12  ;;  %v544_v12 = vld [vmem:[%s4515_s20 + $0x138] sm:$0xff]  ;;  %v567_v2 = vld [vmem:[%s4515_s20 + $0x1f0] sm:$0xff]  ;;  %v570_v4 = vld [vmem:[%s4515_s20 + $0x208] sm:$0xff] }
  0xae   : > { %846 = vmatprep.subr.bf16.mxu0 %v5861_v3  ;;  %v569_v8 = vld [vmem:[%s4515_s20 + $0x200] sm:$0xff] }
  0xb1   : > { %847 = vmatpush1.bf16.msra.mxu0 %v3595_v13  ;;  %v649_v13 = vpack.c.bf16 %v539_v10, %v537_v9  ;;  %v571_v9 = vld [vmem:[%s4515_s20 + $0x210] sm:$0xff]  ;;  %v574_v10 = vld [vmem:[%s4515_s20 + $0x228] sm:$0xff] }
  0xb2   : > { %848 = vmatprep.subr.bf16.mxu0 %v5861_v3 }
  0xb5   : > { %849 = vmatpush1.bf16.msra.mxu0 %v3596_v14  ;;  %v652_v14 = vpack.c.bf16 %v544_v12, %v542_v11  ;;  %v576_v11 = vld [vmem:[%s4515_s20 + $0x238] sm:$0xff]  ;;  %v665_v12 = vpack.c.bf16 %v571_v9, %v569_v8  ;;  %v614_v8 = vld [vmem:[%s4515_s20 + $0x368] sm:$0xff] }
  0xb6   : > { %850 = vmatprep.subr.bf16.mxu0 %v5861_v3  ;;  %v616_v9 = vld [vmem:[%s4515_s20 + $0x378] sm:$0xff] }
  0xb9   : > { %851 = vmatpush1.bf16.msra.mxu0 %v3597_v15  ;;  %v3607_v15 = vld [vmem:[#allocation12 + $0x14] ss:$8 sps:$4 sm:$0xff]  }
  0xba   : > { %852 = vmatprep.subr.bf16.mxu0 %v5861_v3  ;;  %1715 = vmatprep.subr.bf16.mxu1 %v3607_v15  ;;  %v575_v15 = vld [vmem:[%s4515_s20 + $0x230] sm:$0xff] }
  0xbd   : > { %853 = vmatpush1.bf16.msra.mxu0 %v3598_v16  ;;  %v3609_v16 = vld [vmem:[#allocation12 + $0x10] ss:$8 sps:$4 sm:$0xff]  }
  0xbe   : > { %854 = vmatprep.subr.bf16.mxu0 %v5861_v3  ;;  %1716 = vmatpush1.bf16.msra.mxu1 %v3609_v16  ;;  %v578_v16 = vld [vmem:[%s4515_s20 + $0x248] sm:$0xff] }
  0xc1   : > { %855 = vmatpush1.bf16.msra.mxu0 %v3599_v17  ;;  %v3610_v17 = vld [vmem:[#allocation12 + $0x24] ss:$8 sps:$4 sm:$0xff]  }
  0xc2   : > { %856 = vmatprep.subr.bf16.mxu0 %v5861_v3  ;;  %1717 = vmatprep.subr.bf16.mxu1 %v3610_v17  ;;  %v580_v17 = vld [vmem:[%s4515_s20 + $0x258] sm:$0xff] }
  0xc5   : > { %857 = vmatpush1.bf16.msra.mxu0 %v3600_v18  ;;  %v541_v18 = vld [vmem:[%s4515_s20 + $0x120] sm:$0xff] }
  0xc6   : > { %858 = vmatprep.subr.bf16.mxu0 %v5861_v3 }
  0xc9   : > { %859 = vmatpush1.bf16.msra.mxu0 %v3601_v19  ;;  %v543_v19 = vld [vmem:[%s4515_s20 + $0x130] sm:$0xff] }
  0xca   : > { %860 = vmatprep.subr.bf16.mxu0 %v5861_v3  ;;  %v651_v23 = vpack.c.bf16 %v543_v19, %v541_v18  ;;  %v670_v19 = vpack.c.bf16 %v580_v17, %v578_v16  ;;  %v613_v16 = vld [vmem:[%s4515_s20 + $0x360] sm:$0xff]  ;;  %v615_v17 = vld [vmem:[%s4515_s20 + $0x370] sm:$0xff] }
  0xcd   : > { %861 = vmatpush1.bf16.msra.mxu0 %v3602_v20  ;;  %v3612_v20 = vld [vmem:[#allocation12 + $0x20] ss:$8 sps:$4 sm:$0xff]  }
  0xce   : > { %862 = vmatprep.subr.bf16.mxu0 %v5861_v3  ;;  %1718 = vmatpush1.bf16.msra.mxu1 %v3612_v20  ;;  %v577_v20 = vld [vmem:[%s4515_s20 + $0x240] sm:$0xff] }
  0xcf   : > { %1719 = vmatprep.subr.bf16.mxu1 %v3613_v25 }
  0xd1   : > { %863 = vmatpush1.bf16.msra.mxu0 %v3603_v21  ;;  %v546_v21 = vld [vmem:[%s4515_s20 + $0x148] sm:$0xff] }
  0xd2   : > { %v654_v24 = vpack.c.bf16 %v548_v22, %v546_v21  ;;  %v579_v21 = vld [vmem:[%s4515_s20 + $0x250] sm:$0xff]  ;;  %v582_v22 = vld [vmem:[%s4515_s20 + $0x268] sm:$0xff] }
  0xd4   : > { %865 = vmatmul.mubr.bf16.vlgmr.msra.gmra.mrb[0].mxu0 %v633_v26  ;;  %v3615_v26 = vld [vmem:[#allocation12 + $0x30] ss:$8 sps:$4 sm:$0xff]  }
  0xd5   : > { %872 = vmatprep.mubr.bf16.mxu0 %v636_v27  ;;  %v3616_v27 = vld [vmem:[#allocation12 + $0x44] ss:$8 sps:$4 sm:$0xff]   ;;  %1720 = vmatpush1.bf16.msra.mxu1 %v3615_v26 }
  0xd6   : > { %1721 = vmatprep.subr.bf16.mxu1 %v3616_v27  ;;  %v581_v26 = vld [vmem:[%s4515_s20 + $0x260] sm:$0xff]  ;;  %v583_v27 = vld [vmem:[%s4515_s20 + $0x270] sm:$0xff] }
  0xd9   : > { %1722 = vmatpush1.bf16.msra.mxu1 %v3618_v30  ;;  %v671_v30 = vpack.c.bf16 %v583_v27, %v581_v26  ;;  %v687_v26 = vpack.c.bf16 %v615_v17, %v613_v16  ;;  %v625_v17 = vld [vmem:[%s4515_s20 + $0x3c0] sm:$0xff] }
  0xda   : > { %1723 = vmatprep.subr.bf16.mxu1 %v3619_v35  ;;  %v592_v35 = vld [vmem:[%s4515_s20 + $0x2b8] sm:$0xff] }
  0xdc   : > { %873 = vmatmul.mubr.bf16.gmra.mrb[4].mxu0 %v635_v32  ;;  %v552_v32 = vld [vmem:[%s4515_s20 + $0x178] sm:$0xff] }
  0xdd   : > { %880 = vmatprep.mubr.bf16.mxu0 %v638_v33  ;;  %v653_v33 = vpack.c.bf16 %v547_v29, %v545_v28  ;;  %v656_v34 = vpack.c.bf16 %v552_v32, %v550_v31  ;;  %1724 = vmatpush1.bf16.msra.mxu1 %v3621_v36  ;;  %v586_v28 = vld [vmem:[%s4515_s20 + $0x288] sm:$0xff]  ;;  %v588_v29 = vld [vmem:[%s4515_s20 + $0x298] sm:$0xff]  ;;  %v585_v32 = vld [vmem:[%s4515_s20 + $0x280] sm:$0xff] }
  0xde   : > { %1725 = vmatprep.subr.bf16.mxu1 %v3622_v41  ;;  %v674_v31 = vpack.c.bf16 %v588_v29, %v586_v28  ;;  %v596_v41 = vld [vmem:[%s4515_s20 + $0x2d8] sm:$0xff] }
  0xe1   : > { %1726 = vmatpush1.bf16.msra.mxu1 %v3624_v42 }
  0xe4   : > { %881 = vmatmul.mubr.bf16.gmra.mrb[8].mxu0 %v637_v38  ;;  %v551_v38 = vld [vmem:[%s4515_s20 + $0x170] sm:$0xff] }
  0xe5   : > { %888 = vmatprep.mubr.bf16.mxu0 %v640_v39  ;;  %v554_v39 = vld [vmem:[%s4515_s20 + $0x188] sm:$0xff]  ;;  %v655_v43 = vpack.c.bf16 %v551_v38, %v549_v37  ;;  %v589_v38 = vld [vmem:[%s4515_s20 + $0x2a0] sm:$0xff] }
  0xec   : > { %889 = vmatmul.mubr.bf16.gmra.mrb[12].mxu0 %v639_v44  ;;  %v658_v44 = vpack.c.bf16 %v556_v40, %v554_v39  ;;  %v591_v39 = vld [vmem:[%s4515_s20 + $0x2b0] sm:$0xff]  ;;  %v594_v40 = vld [vmem:[%s4515_s20 + $0x2c8] sm:$0xff] }
  0xed   : > { %896 = vmatprep.mubr.bf16.mxu0 %v642_v45  ;;  %v3625_v45 = vld [vmem:[#allocation12 + $0x74] ss:$8 sps:$4 sm:$0xff]   ;;  %v675_v42 = vpack.c.bf16 %v591_v39, %v589_v38 }
  0xee   : > { %1727 = vmatprep.subr.bf16.mxu1 %v3625_v45  ;;  %v595_v45 = vld [vmem:[%s4515_s20 + $0x2d0] sm:$0xff] }
  0xef   : > { %1728 = vmatpush1.bf16.msra.mxu1 %v3627_v46  ;;  %v598_v46 = vld [vmem:[%s4515_s20 + $0x2e8] sm:$0xff] }
  0xf4   : > { %897 = vmatmul.mubr.bf16.gmra.mrb[16].mxu0 %v641_v50  ;;  %v560_v50 = vld [vmem:[%s4515_s20 + $0x1b8] sm:$0xff] }
  0xf5   : > { %904 = vmatprep.mubr.bf16.mxu0 %v644_v51  ;;  %v657_v51 = vpack.c.bf16 %v555_v48, %v553_v47  ;;  %v660_v52 = vpack.c.bf16 %v560_v50, %v558_v49  ;;  %v600_v47 = vld [vmem:[%s4515_s20 + $0x2f8] sm:$0xff]  ;;  %v597_v50 = vld [vmem:[%s4515_s20 + $0x2e0] sm:$0xff] }
  0xf6   : > { %v680_v49 = vpack.c.bf16 %v600_v47, %v598_v46 }
  0xfc   : > { %905 = vmatmul.mubr.bf16.gmra.mrb[20].mxu0 %v643_v56  ;;  %v564_v56 = vld [vmem:[%s4515_s20 + $0x1d8] sm:$0xff] }
  0xfd   : > { %912 = vmatprep.mubr.bf16.mxu0 %v646_v57  ;;  %v659_v57 = vpack.c.bf16 %v559_v54, %v557_v53  ;;  %v662_v58 = vpack.c.bf16 %v564_v56, %v562_v55  ;;  %v604_v53 = vld [vmem:[%s4515_s20 + $0x318] sm:$0xff]  ;;  %v601_v56 = vld [vmem:[%s4515_s20 + $0x300] sm:$0xff] }
 0x104   : > { %913 = vmatmul.mubr.bf16.gmra.mrb[24].mxu0 %v645_v62  ;;  %v568_v62 = vld [vmem:[%s4515_s20 + $0x1f8] sm:$0xff] }
 0x105   : > { %920 = vmatprep.mubr.bf16.mxu0 %v648_v63  ;;  %v661_v63 = vpack.c.bf16 %v563_v60, %v561_v59  ;;  %v664_v0 = vpack.c.bf16 %v568_v62, %v566_v61  ;;  %v608_v59 = vld [vmem:[%s4515_s20 + $0x338] sm:$0xff]  ;;  %v605_v62 = vld [vmem:[%s4515_s20 + $0x320] sm:$0xff] }
 0x10c   : > { %921 = vmatmul.mubr.bf16.gmra.mrb[28].mxu0 %v647_v5  ;;  %v572_v5 = vld [vmem:[%s4515_s20 + $0x218] sm:$0xff] }
 0x10d   : > { %928 = vmatprep.mubr.bf16.mxu0 %v650_v6  ;;  %v663_v6 = vpack.c.bf16 %v567_v2, %v565_v1  ;;  %v666_v7 = vpack.c.bf16 %v572_v5, %v570_v4  ;;  %v612_v1 = vld [vmem:[%s4515_s20 + $0x358] sm:$0xff]  ;;  %v5860_v5 = vlaneseq }
 0x114   : > { %929 = vmatmul.mubr.bf16.gmra.mrb[32].mxu0 %v649_v13  ;;  %v668_v13 = vpack.c.bf16 %v576_v11, %v574_v10  ;;  %v4661_v10 = vshrl.u32 %v5860_v5, 7 }
 0x115   : > { %936 = vmatprep.mubr.bf16.mxu0 %v652_v14  ;;  %v573_v14 = vld [vmem:[%s4515_s20 + $0x220] sm:$0xff] }
 0x116   : > { %v667_v18 = vpack.c.bf16 %v575_v15, %v573_v14  ;;  %5938 = vst [vmem:[#allocation26_spill] sm:$0xff] %v4661_v10  ;;  %v4665_v14 = vstv %s3133_s25  ;;  %v4670_v15 = vld [vmem:[%s5824_s3] ss:$0 sm:$0xff] }
 0x117   : > { %5939 = vst [vmem:[#allocation27_spill] sm:$0xff] %v4665_v14 }
 0x11c   : > { %937 = vmatmul.mubr.bf16.gmra.mrb[36].mxu0 %v651_v23  ;;  %v584_v23 = vld [vmem:[%s4515_s20 + $0x278] sm:$0xff] }
 0x11d   : > { %944 = vmatprep.mubr.bf16.mxu0 %v654_v24  ;;  %v669_v24 = vpack.c.bf16 %v579_v21, %v577_v20  ;;  %v672_v25 = vpack.c.bf16 %v584_v23, %v582_v22  ;;  %v4678_v20 = vstv %s4525_s15  ;;  %v618_v21 = vld [vmem:[%s4515_s20 + $0x388] sm:$0xff]  ;;  %v620_v22 = vld [vmem:[%s4515_s20 + $0x398] sm:$0xff] }
 0x11e   : > { %5940 = vst [vmem:[#allocation28_spill] sm:$0xff] %v4678_v20  ;;  %v690_v28 = vpack.c.bf16 %v620_v22, %v618_v21 }
 0x124   : > { %945 = vmatmul.mubr.bf16.gmra.mrb[40].mxu0 %v653_v33  ;;  %v587_v33 = vld [vmem:[%s4515_s20 + $0x290] sm:$0xff] }
 0x125   : > { %952 = vmatprep.mubr.bf16.mxu0 %v656_v34  ;;  %v590_v34 = vld [vmem:[%s4515_s20 + $0x2a8] sm:$0xff]  ;;  %v673_v36 = vpack.c.bf16 %v587_v33, %v585_v32  ;;  %v1189_v32 = vadd.s32 24, %v4661_v10 }
 0x126   : > { %v676_v37 = vpack.c.bf16 %v592_v35, %v590_v34 }
 0x12c   : > { %953 = vmatmul.mubr.bf16.gmra.mrb[44].mxu0 %v655_v43  ;;  %v678_v43 = vpack.c.bf16 %v596_v41, %v594_v40  ;;  %v1255_v40 = vadd.s32 %v4665_v14, %v1189_v32  ;;  %v622_v41 = vld [vmem:[%s4515_s20 + $0x3a8] sm:$0xff] }
 0x12d   : > { %960 = vmatprep.mubr.bf16.mxu0 %v658_v44  ;;  %v593_v44 = vld [vmem:[%s4515_s20 + $0x2c0] sm:$0xff] }
 0x12e   : > { %v677_v48 = vpack.c.bf16 %v595_v45, %v593_v44  ;;  %vm1320_vm5 = vcmp.lt.s32.totalorder %v1255_v40, %v4678_v20  ;;  %v629_v40 = vld [vmem:[%s4515_s20 + $0x3e0] sm:$0xff] }
 0x134   : > { %961 = vmatmul.mubr.bf16.gmra.mrb[48].mxu0 %v657_v51  ;;  %v599_v51 = vld [vmem:[%s4515_s20 + $0x2f0] sm:$0xff] }
 0x135   : > { %968 = vmatprep.mubr.bf16.mxu0 %v660_v52  ;;  %v602_v52 = vld [vmem:[%s4515_s20 + $0x308] sm:$0xff]  ;;  %v679_v54 = vpack.c.bf16 %v599_v51, %v597_v50 }
 0x136   : > { %v682_v55 = vpack.c.bf16 %v604_v53, %v602_v52  ;;  %v1191_v52 = vadd.s32 40, %v4661_v10 }
 0x13c   : > { %969 = vmatmul.mubr.bf16.gmra.mrb[52].mxu0 %v659_v57  ;;  %v603_v57 = vld [vmem:[%s4515_s20 + $0x310] sm:$0xff] }
 0x13d   : > { %976 = vmatprep.mubr.bf16.mxu0 %v662_v58  ;;  %v606_v58 = vld [vmem:[%s4515_s20 + $0x328] sm:$0xff]  ;;  %v681_v60 = vpack.c.bf16 %v603_v57, %v601_v56  ;;  %v621_v56 = vld [vmem:[%s4515_s20 + $0x3a0] sm:$0xff]  ;;  %v623_v57 = vld [vmem:[%s4515_s20 + $0x3b0] sm:$0xff] }
 0x13e   : > { %v684_v61 = vpack.c.bf16 %v608_v59, %v606_v58 }
 0x144   : > { %977 = vmatmul.mubr.bf16.gmra.mrb[56].mxu0 %v661_v63  ;;  %v607_v63 = vld [vmem:[%s4515_s20 + $0x330] sm:$0xff] }
 0x145   : > { %984 = vmatprep.mubr.bf16.mxu0 %v664_v0  ;;  %v610_v0 = vld [vmem:[%s4515_s20 + $0x348] sm:$0xff]  ;;  %v683_v2 = vpack.c.bf16 %v607_v63, %v605_v62  ;;  %v628_v62 = vld [vmem:[%s4515_s20 + $0x3d8] sm:$0xff] }
 0x146   : > { %v686_v4 = vpack.c.bf16 %v612_v1, %v610_v0 }
 0x14c   : > { %985 = vmatmul.mubr.bf16.gmra.mrb[60].mxu0 %v663_v6  ;;  %v609_v6 = vld [vmem:[%s4515_s20 + $0x340] sm:$0xff] }
 0x14d   : > { %992 = vmatprep.mubr.bf16.mxu0 %v666_v7  ;;  %v611_v7 = vld [vmem:[%s4515_s20 + $0x350] sm:$0xff] }
 0x14e   : > { %v685_v11 = vpack.c.bf16 %v611_v7, %v609_v6 }
 0x154   : > { %993 = vmatmul.mubr.bf16.gmra.mrb[64].mxu0 %v665_v12  ;;  %v688_v12 = vpack.c.bf16 %v616_v9, %v614_v8  ;;  %v1192_v9 = vadd.s32 48, %v4661_v10 }
 0x155   : > { %1000 = vmatprep.mubr.bf16.mxu0 %v668_v13  ;;  %v1187_v13 = vadd.s32 8, %v4661_v10 }
 0x156   : > { %v1258_v21 = vadd.s32 %v4665_v14, %v1192_v9 }
 0x158   : > { %vm1323_vm10 = vcmp.lt.s32.totalorder %v1258_v21, %v4678_v20 }
 0x15c   : > { %1001 = vmatmul.mubr.bf16.gmra.mrb[68].mxu0 %v667_v18  ;;  %v1252_v18 = vadd.s32 %v4665_v14, %v4661_v10 }
 0x15d   : > { %1008 = vmatprep.mubr.bf16.mxu0 %v670_v19  ;;  %v1253_v19 = vadd.s32 %v4665_v14, %v1187_v13 }
 0x15e   : > { %vm1317_vm1 = vcmp.lt.s32.totalorder %v1252_v18, %v4678_v20  ;;  %v627_v18 = vld [vmem:[%s4515_s20 + $0x3d0] sm:$0xff] }
 0x15f   : > { %vm1318_vm2 = vcmp.lt.s32.totalorder %v1253_v19, %v4678_v20 }
 0x160   : > { %vm4688_vm3 = vmpackc.low %vm1318_vm2, %vm1317_vm1 }
 0x164   : > { %1009 = vmatmul.mubr.bf16.gmra.mrb[72].mxu0 %v669_v24 }
 0x165   : > { %1016 = vmatprep.mubr.bf16.mxu0 %v672_v25 }
 0x16c   : > { %1017 = vmatmul.mubr.bf16.gmra.mrb[76].mxu0 %v671_v30 }
 0x16d   : > { %1024 = vmatprep.mubr.bf16.mxu0 %v674_v31  ;;  %v1188_v31 = vadd.s32 16, %v4661_v10 }
 0x16f   : > { %v1254_v39 = vadd.s32 %v4665_v14, %v1188_v31  ;;  %v1194_v31 = vadd.s32 64, %v4661_v10 }
 0x171   : > { %vm1319_vm4 = vcmp.lt.s32.totalorder %v1254_v39, %v4678_v20 }
 0x172   : > { %vm4710_vm6 = vmpackc.low %vm1320_vm5, %vm1319_vm4 }
 0x174   : > { %1025 = vmatmul.mubr.bf16.gmra.mrb[80].mxu0 %v673_v36  ;;  %v617_v36 = vld [vmem:[%s4515_s20 + $0x380] sm:$0xff] }
 0x175   : > { %1032 = vmatprep.mubr.bf16.mxu0 %v676_v37  ;;  %v619_v37 = vld [vmem:[%s4515_s20 + $0x390] sm:$0xff] }
 0x176   : > { %v689_v46 = vpack.c.bf16 %v619_v37, %v617_v36 }
 0x17c   : > { %1033 = vmatmul.mubr.bf16.gmra.mrb[84].mxu0 %v675_v42  ;;  %v624_v42 = vld [vmem:[%s4515_s20 + $0x3b8] sm:$0xff] }
 0x17d   : > { %1040 = vmatprep.mubr.bf16.mxu0 %v678_v43 }
 0x184   : > { %1041 = vmatmul.mubr.bf16.gmra.mrb[88].mxu0 %v677_v48  ;;  %v692_v48 = vpack.c.bf16 %v624_v42, %v622_v41  ;;  %v631_v41 = vld [vmem:[%s4515_s20 + $0x3f0] sm:$0xff]  ;;  %v1260_v42 = vadd.s32 %v4665_v14, %v1194_v31 }
 0x185   : > { %1048 = vmatprep.mubr.bf16.mxu0 %v680_v49  ;;  %v1190_v49 = vadd.s32 32, %v4661_v10 }
 0x186   : > { %vm1325_vm13 = vcmp.lt.s32.totalorder %v1260_v42, %v4678_v20 }
 0x187   : > { %v1256_v58 = vadd.s32 %v4665_v14, %v1190_v49 }
 0x189   : > { %vm1321_vm7 = vcmp.lt.s32.totalorder %v1256_v58, %v4678_v20 }
 0x18c   : > { %1049 = vmatmul.mubr.bf16.gmra.mrb[92].mxu0 %v679_v54 }
 0x18d   : > { %1056 = vmatprep.mubr.bf16.mxu0 %v682_v55 }
 0x194   : > { %1057 = vmatmul.mubr.bf16.gmra.mrb[96].mxu0 %v681_v60  ;;  %v1257_v60 = vadd.s32 %v4665_v14, %v1191_v52  ;;  %v1196_v52 = vadd.s32 80, %v4661_v10 }
 0x195   : > { %1064 = vmatprep.mubr.bf16.mxu0 %v684_v61  ;;  %v626_v61 = vld [vmem:[%s4515_s20 + $0x3c8] sm:$0xff] }
 0x196   : > { %v694_v6 = vpack.c.bf16 %v628_v62, %v626_v61  ;;  %vm1322_vm8 = vcmp.lt.s32.totalorder %v1257_v60, %v4678_v20  ;;  %v1262_v60 = vadd.s32 %v4665_v14, %v1196_v52 }
 0x197   : > { %vm4732_vm9 = vmpackc.low %vm1322_vm8, %vm1321_vm7 }
 0x198   : > { %vm1327_vm0 = vcmp.lt.s32.totalorder %v1262_v60, %v4678_v20 }
 0x19c   : > { %1065 = vmatmul.mubr.bf16.gmra.mrb[100].mxu0 %v683_v2  ;;  %v691_v2 = vpack.c.bf16 %v623_v57, %v621_v56 }
 0x19d   : > { %1072 = vmatprep.mubr.bf16.mxu0 %v686_v4 }
 0x1a4   : > { %1073 = vmatmul.mubr.bf16.gmra.mrb[104].mxu0 %v685_v11  ;;  %v1193_v11 = vadd.s32 56, %v4661_v10 }
 0x1a5   : > { %1080 = vmatprep.mubr.bf16.mxu0 %v688_v12 }
 0x1a6   : > { %v1259_v22 = vadd.s32 %v4665_v14, %v1193_v11  ;;  %v5951_v11 = vmov 0 }
 0x1a7   : > { %v866_v23 = vpop.f32.mrb[0].mxu0 }
 0x1a8   : > { %v867_v24 = vadd.f32 %v4670_v15, %v866_v23  ;;  %v868_v25 = vpop.f32.mrb[1].mxu0  ;;  %v630_v23 = vld [vmem:[%s4515_s20 + $0x3e8] sm:$0xff]  ;;  %vm1324_vm11 = vcmp.lt.s32.totalorder %v1259_v22, %v4678_v20 }
 0x1a9   : > { %v869_v27 = vpop.f32.mrb[2].mxu0  ;;  %vm4754_vm12 = vmpackc.low %vm1324_vm11, %vm1323_vm10 }
 0x1aa   : > { %v870_v29 = vadd.f32 %v4670_v15, %v869_v27  ;;  %v871_v30 = vpop.f32.mrb[3].mxu0  ;;  %v1121_v33 = vmax.f32 %v867_v24, 0.0  ;;  %v632_v24 = vld [vmem:[%s4515_s20 + $0x3f8] sm:$0xff] }
 0x1ab   : > { %v696_v30 = vpack.c.bf16 %v632_v24, %v630_v23 }
 0x1ac   : > { %v1122_v34 = vmax.f32 %v870_v29, 0.0  ;;  %1081 = vmatmul.mubr.bf16.gmra.mrb[108].mxu0 %v687_v26 }
 0x1ad   : > { %1088 = vmatprep.mubr.bf16.mxu0 %v690_v28  ;;  %v693_v28 = vpack.c.bf16 %v627_v18, %v625_v17 }
 0x1ae   : > { %v4694_v38 = vpack.c.bf16 %v1122_v34, %v1121_v33  ;;  %v1195_v34 = vadd.s32 72, %v4661_v10 }
 0x1af   : > { %v874_v43 = vpop.f32.mrb[4].mxu0 }
 0x1b0   : > { %v875_v44 = vadd.f32 %v4670_v15, %v874_v43  ;;  %v876_v45 = vpop.f32.mrb[5].mxu0  ;;  %3152 = vmatmul.mubr.msk.bf16.vlgmr.msra.gmra.mrb[0].mxu1 %vm4688_vm3, %v4694_v38 }
 0x1b1   : > { %v877_v47 = vpop.f32.mrb[6].mxu0  ;;  %1755 = vmatprep.mubr.bf16.mxu1 %v5861_v3 }
 0x1b2   : > { %v878_v50 = vadd.f32 %v4670_v15, %v877_v47  ;;  %v879_v51 = vpop.f32.mrb[7].mxu0  ;;  %v1123_v53 = vmax.f32 %v875_v44, 0.0  ;;  %v1261_v44 = vadd.s32 %v4665_v14, %v1195_v34 }
 0x1b4   : > { %v1124_v54 = vmax.f32 %v878_v50, 0.0  ;;  %1089 = vmatmul.mubr.bf16.gmra.mrb[112].mxu0 %v689_v46  ;;  %vm1326_vm14 = vcmp.lt.s32.totalorder %v1261_v44, %v4678_v20 }
 0x1b5   : > { %1096 = vmatprep.mubr.bf16.mxu0 %v692_v48  ;;  %v695_v48 = vpack.c.bf16 %v631_v41, %v629_v40  ;;  %vm4774_vm15 = vmpackc.low %vm1326_vm14, %vm1325_vm13  ;;  %v1202_v41 = vadd.s32 128, %v4661_v10 }
 0x1b6   : > { %v4717_v59 = vpack.c.bf16 %v1124_v54, %v1123_v53  ;;  %v1197_v53 = vadd.s32 88, %v4661_v10 }
 0x1b7   : > { %v882_v63 = vpop.f32.mrb[8].mxu0 }
 0x1b8   : > { %v883_v0 = vadd.f32 %v4670_v15, %v882_v63  ;;  %v884_v1 = vpop.f32.mrb[9].mxu0  ;;  %3155 = vmatmul.mubr.msk.bf16.gmra.mrb[4].mxu1 %vm4710_vm6, %v4717_v59  ;;  %v1263_v61 = vadd.s32 %v4665_v14, %v1197_v53 }
 0x1b9   : > { %v885_v4 = vpop.f32.mrb[10].mxu0  ;;  %1765 = vmatprep.mubr.bf16.mxu1 %v5861_v3 }
 0x1ba   : > { %v886_v7 = vadd.f32 %v4670_v15, %v885_v4  ;;  %v887_v8 = vpop.f32.mrb[11].mxu0  ;;  %v1125_v12 = vmax.f32 %v883_v0, 0.0  ;;  %vm1328_vm1 = vcmp.lt.s32.totalorder %v1263_v61, %v4678_v20 }
 0x1bb   : > { %vm4792_vm2 = vmpackc.low %vm1328_vm1, %vm1327_vm0 }
 0x1bc   : > { %v1126_v13 = vmax.f32 %v886_v7, 0.0  ;;  %1097 = vmatmul.mubr.bf16.gmra.mrb[116].mxu0 %v691_v2  ;;  %v1198_v2 = vadd.s32 96, %v4661_v10  ;;  %v1199_v7 = vadd.s32 104, %v4661_v10  ;;  %v5952_v11 = vsel %vm4792_vm2, 4294967295, %v5951_v11 }
 0x1bd   : > { %1104 = vmatprep.mubr.bf16.mxu0 %v694_v6  ;;  %5953 = vst [vmem:[#allocation29_spill] sm:$0xff] %v5952_v11 }
 0x1be   : > { %v4738_v19 = vpack.c.bf16 %v1126_v13, %v1125_v12  ;;  %v1264_v12 = vadd.s32 %v4665_v14, %v1198_v2  ;;  %v1265_v17 = vadd.s32 %v4665_v14, %v1199_v7 }
 0x1bf   : > { %v890_v25 = vpop.f32.mrb[12].mxu0 }
 0x1c0   : > { %v891_v26 = vadd.f32 %v4670_v15, %v890_v25  ;;  %v892_v27 = vpop.f32.mrb[13].mxu0  ;;  %3158 = vmatmul.mubr.msk.bf16.gmra.mrb[8].mxu1 %vm4732_vm9, %v4738_v19  ;;  %vm1329_vm4 = vcmp.lt.s32.totalorder %v1264_v12, %v4678_v20  ;;  %vm1330_vm5 = vcmp.lt.s32.totalorder %v1265_v17, %v4678_v20 }
 0x1c1   : > { %v893_v29 = vpop.f32.mrb[14].mxu0  ;;  %1775 = vmatprep.mubr.bf16.mxu1 %v5861_v3  ;;  %v1201_v27 = vadd.s32 120, %v4661_v10  ;;  %vm4810_vm7 = vmpackc.low %vm1330_vm5, %vm1329_vm4 }
 0x1c2   : > { %v894_v32 = vadd.f32 %v4670_v15, %v893_v29  ;;  %v895_v33 = vpop.f32.mrb[15].mxu0  ;;  %v1127_v36 = vmax.f32 %v891_v26, 0.0  ;;  %v1200_v26 = vadd.s32 112, %v4661_v10 }
 0x1c3   : > { %v1267_v33 = vadd.s32 %v4665_v14, %v1201_v27 }
 0x1c4   : > { %v1128_v37 = vmax.f32 %v894_v32, 0.0  ;;  %1105 = vmatmul.mubr.bf16.gmra.mrb[120].mxu0 %v693_v28  ;;  %v1266_v32 = vadd.s32 %v4665_v14, %v1200_v26 }
 0x1c5   : > { %1112 = vmatprep.mubr.bf16.mxu0 %v696_v30  ;;  %v5955_v30 = vmov 0  ;;  %vm1332_vm10 = vcmp.lt.s32.totalorder %v1267_v33, %v4678_v20 }
 0x1c6   : > { %v4761_v43 = vpack.c.bf16 %v1128_v37, %v1127_v36  ;;  %v5956_v30 = vsel %vm4810_vm7, 4294967295, %v5955_v30  ;;  %vm1331_vm8 = vcmp.lt.s32.totalorder %v1266_v32, %v4678_v20 }
 0x1c7   : > { %v898_v45 = vpop.f32.mrb[16].mxu0  ;;  %5957 = vst [vmem:[#allocation31_spill] sm:$0xff] %v5956_v30  ;;  %vm4828_vm11 = vmpackc.low %vm1332_vm10, %vm1331_vm8 }
 0x1c8   : > { %v899_v46 = vadd.f32 %v4670_v15, %v898_v45  ;;  %v900_v47 = vpop.f32.mrb[17].mxu0  ;;  %3161 = vmatmul.mubr.msk.bf16.gmra.mrb[12].mxu1 %vm4754_vm12, %v4761_v43  ;;  %v1203_v45 = vadd.s32 136, %v4661_v10 }
 0x1c9   : > { %v901_v49 = vpop.f32.mrb[18].mxu0  ;;  %1785 = vmatprep.mubr.bf16.mxu1 %v5861_v3 }
 0x1ca   : > { %v902_v50 = vadd.f32 %v4670_v15, %v901_v49  ;;  %v903_v51 = vpop.f32.mrb[19].mxu0  ;;  %v1129_v54 = vmax.f32 %v899_v46, 0.0  ;;  %v1268_v49 = vadd.s32 %v4665_v14, %v1202_v41  ;;  %v1208_v41 = vadd.s32 176, %v4661_v10 }
 0x1cb   : > { %v1269_v51 = vadd.s32 %v4665_v14, %v1203_v45 }
 0x1cc   : > { %v1130_v56 = vmax.f32 %v902_v50, 0.0  ;;  %1113 = vmatmul.mubr.bf16.gmra.mrb[124].mxu0 %v695_v48  ;;  %v5959_v48 = vmov 0  ;;  %vm1333_vm13 = vcmp.lt.s32.totalorder %v1268_v49, %v4678_v20  ;;  %v1274_v49 = vadd.s32 %v4665_v14, %v1208_v41 }
 0x1cd   : > { %v5960_v48 = vsel %vm4828_vm11, 4294967295, %v5959_v48  ;;  %vm1334_vm14 = vcmp.lt.s32.totalorder %v1269_v51, %v4678_v20 }
 0x1ce   : > { %v4778_v58 = vpack.c.bf16 %v1130_v56, %v1129_v54  ;;  %5961 = vst [vmem:[#allocation33_spill] sm:$0xff] %v5960_v48  ;;  %vm4846_vm0 = vmpackc.low %vm1334_vm14, %vm1333_vm13  ;;  %vm1339_vm14 = vcmp.lt.s32.totalorder %v1274_v49, %v4678_v20 }
 0x1cf   : > { %v906_v62 = vpop.f32.mrb[20].mxu0 }
 0x1d0   : > { %v907_v63 = vadd.f32 %v4670_v15, %v906_v62  ;;  %v908_v0 = vpop.f32.mrb[21].mxu0  ;;  %3164 = vmatmul.mubr.msk.bf16.gmra.mrb[16].mxu1 %vm4774_vm15, %v4778_v58  ;;  %v1204_v62 = vadd.s32 144, %v4661_v10 }
 0x1d1   : > { %v909_v1 = vpop.f32.mrb[22].mxu0  ;;  %1795 = vmatprep.mubr.bf16.mxu1 %v5861_v3 }
 0x1d2   : > { %v910_v4 = vadd.f32 %v4670_v15, %v909_v1  ;;  %v911_v6 = vpop.f32.mrb[23].mxu0  ;;  %v1131_v8 = vmax.f32 %v907_v63, 0.0  ;;  %v1205_v63 = vadd.s32 152, %v4661_v10 }
 0x1d3   : > { %v1270_v6 = vadd.s32 %v4665_v14, %v1204_v62 }
 0x1d4   : > { %v1132_v9 = vmax.f32 %v910_v4, 0.0  ;;  %v1271_v7 = vadd.s32 %v4665_v14, %v1205_v63  ;;  %v1211_v63 = vadd.s32 200, %v4661_v10 }
 0x1d5   : > { %vm1335_vm1 = vcmp.lt.s32.totalorder %v1270_v6, %v4678_v20 }
 0x1d6   : > { %v4797_v13 = vpack.c.bf16 %v1132_v9, %v1131_v8  ;;  %vm1336_vm4 = vcmp.lt.s32.totalorder %v1271_v7, %v4678_v20 }
 0x1d7   : > { %v914_v18 = vpop.f32.mrb[24].mxu0  ;;  %vm4864_vm5 = vmpackc.low %vm1336_vm4, %vm1335_vm1 }
 0x1d8   : > { %5954 = vst [vmem:[#allocation30_spill] sm:$0xff] %v4797_v13  ;;  %v915_v21 = vadd.f32 %v4670_v15, %v914_v18  ;;  %v916_v22 = vpop.f32.mrb[25].mxu0  ;;  %3167 = vmatmul.mubr.msk.bf16.gmra.mrb[20].mxu1 %vm4792_vm2, %v4797_v13  ;;  %v1206_v18 = vadd.s32 160, %v4661_v10 }
 0x1d9   : > { %v917_v23 = vpop.f32.mrb[26].mxu0  ;;  %1805 = vmatprep.mubr.bf16.mxu1 %v5861_v3 }
 0x1da   : > { %v918_v24 = vadd.f32 %v4670_v15, %v917_v23  ;;  %v919_v25 = vpop.f32.mrb[27].mxu0  ;;  %v1133_v28 = vmax.f32 %v915_v21, 0.0  ;;  %v1207_v23 = vadd.s32 168, %v4661_v10  ;;  %v1272_v27 = vadd.s32 %v4665_v14, %v1206_v18 }
 0x1dc   : > { %v1134_v29 = vmax.f32 %v918_v24, 0.0  ;;  %vm1337_vm8 = vcmp.lt.s32.totalorder %v1272_v27, %v4678_v20 }
 0x1de   : > { %v4814_v31 = vpack.c.bf16 %v1134_v29, %v1133_v28  ;;  %v1273_v29 = vadd.s32 %v4665_v14, %v1207_v23 }
 0x1df   : > { %v922_v34 = vpop.f32.mrb[28].mxu0 }
 0x1e0   : > { %5958 = vst [vmem:[#allocation32_spill] sm:$0xff] %v4814_v31  ;;  %v923_v36 = vadd.f32 %v4670_v15, %v922_v34  ;;  %v924_v37 = vpop.f32.mrb[29].mxu0  ;;  %3170 = vmatmul.mubr.msk.bf16.gmra.mrb[24].mxu1 %vm4810_vm7, %v4814_v31  ;;  %vm1338_vm10 = vcmp.lt.s32.totalorder %v1273_v29, %v4678_v20 }
 0x1e1   : > { %v925_v40 = vpop.f32.mrb[30].mxu0  ;;  %1815 = vmatprep.mubr.bf16.mxu1 %v5861_v3  ;;  %vm4882_vm13 = vmpackc.low %vm1338_vm10, %vm1337_vm8 }
 0x1e2   : > { %v926_v42 = vadd.f32 %v4670_v15, %v925_v40  ;;  %v927_v44 = vpop.f32.mrb[31].mxu0  ;;  %v1135_v46 = vmax.f32 %v923_v36, 0.0 }
 0x1e4   : > { %v1136_v47 = vmax.f32 %v926_v42, 0.0  ;;  %v1209_v42 = vadd.s32 184, %v4661_v10 }
 0x1e6   : > { %v4833_v50 = vpack.c.bf16 %v1136_v47, %v1135_v46  ;;  %v1275_v51 = vadd.s32 %v4665_v14, %v1209_v42 }
 0x1e7   : > { %v930_v52 = vpop.f32.mrb[32].mxu0 }
 0x1e8   : > { %5962 = vst [vmem:[#allocation34_spill] sm:$0xff] %v4833_v50  ;;  %v931_v53 = vadd.f32 %v4670_v15, %v930_v52  ;;  %v932_v54 = vpop.f32.mrb[33].mxu0  ;;  %3173 = vmatmul.mubr.msk.bf16.gmra.mrb[28].mxu1 %vm4828_vm11, %v4833_v50  ;;  %vm1340_vm1 = vcmp.lt.s32.totalorder %v1275_v51, %v4678_v20  ;;  %v1215_v51 = vadd.s32 232, %v4661_v10 }
 0x1e9   : > { %v933_v56 = vpop.f32.mrb[34].mxu0  ;;  %1825 = vmatprep.mubr.bf16.mxu1 %v5861_v3  ;;  %vm4900_vm4 = vmpackc.low %vm1340_vm1, %vm1339_vm14 }
 0x1ea   : > { %v934_v60 = vadd.f32 %v4670_v15, %v933_v56  ;;  %v935_v61 = vpop.f32.mrb[35].mxu0  ;;  %v1137_v0 = vmax.f32 %v931_v53, 0.0 }
 0x1ec   : > { %v1138_v1 = vmax.f32 %v934_v60, 0.0  ;;  %v1210_v60 = vadd.s32 192, %v4661_v10 }
 0x1ee   : > { %v4850_v4 = vpack.c.bf16 %v1138_v1, %v1137_v0  ;;  %v1276_v7 = vadd.s32 %v4665_v14, %v1210_v60 }
 0x1ef   : > { %v938_v8 = vpop.f32.mrb[36].mxu0 }
 0x1f0   : > { %v939_v9 = vadd.f32 %v4670_v15, %v938_v8  ;;  %v940_v12 = vpop.f32.mrb[37].mxu0  ;;  %3176 = vmatmul.mubr.msk.bf16.gmra.mrb[32].mxu1 %vm4846_vm0, %v4850_v4  ;;  %vm1341_vm8 = vcmp.lt.s32.totalorder %v1276_v7, %v4678_v20 }
 0x1f1   : > { %v941_v17 = vpop.f32.mrb[38].mxu0  ;;  %1835 = vmatprep.mubr.bf16.mxu1 %v5861_v3 }
 0x1f2   : > { %v942_v21 = vadd.f32 %v4670_v15, %v941_v17  ;;  %v943_v22 = vpop.f32.mrb[39].mxu0  ;;  %v1139_v24 = vmax.f32 %v939_v9, 0.0  ;;  %v1277_v9 = vadd.s32 %v4665_v14, %v1211_v63 }
 0x1f4   : > { %v1140_v25 = vmax.f32 %v942_v21, 0.0  ;;  %vm1342_vm10 = vcmp.lt.s32.totalorder %v1277_v9, %v4678_v20 }
 0x1f5   : > { %vm4918_vm14 = vmpackc.low %vm1342_vm10, %vm1341_vm8 }
 0x1f6   : > { %v4869_v28 = vpack.c.bf16 %v1140_v25, %v1139_v24  ;;  %v1212_v24 = vadd.s32 208, %v4661_v10  ;;  %v1213_v25 = vadd.s32 216, %v4661_v10 }
 0x1f7   : > { %v946_v32 = vpop.f32.mrb[40].mxu0 }
 0x1f8   : > { %v947_v33 = vadd.f32 %v4670_v15, %v946_v32  ;;  %v948_v34 = vpop.f32.mrb[41].mxu0  ;;  %3179 = vmatmul.mubr.msk.bf16.gmra.mrb[36].mxu1 %vm4864_vm5, %v4869_v28 }
 0x1f9   : > { %v949_v36 = vpop.f32.mrb[42].mxu0  ;;  %1845 = vmatprep.mubr.bf16.mxu1 %v5861_v3  ;;  %v1278_v34 = vadd.s32 %v4665_v14, %v1212_v24 }
 0x1fa   : > { %v950_v37 = vadd.f32 %v4670_v15, %v949_v36  ;;  %v951_v40 = vpop.f32.mrb[43].mxu0  ;;  %v1141_v44 = vmax.f32 %v947_v33, 0.0  ;;  %v1279_v36 = vadd.s32 %v4665_v14, %v1213_v25 }
 0x1fb   : > { %vm1343_vm1 = vcmp.lt.s32.totalorder %v1278_v34, %v4678_v20 }
 0x1fc   : > { %v1142_v45 = vmax.f32 %v950_v37, 0.0  ;;  %vm1344_vm8 = vcmp.lt.s32.totalorder %v1279_v36, %v4678_v20 }
 0x1fd   : > { %vm4936_vm10 = vmpackc.low %vm1344_vm8, %vm1343_vm1 }
 0x1fe   : > { %v4886_v47 = vpack.c.bf16 %v1142_v45, %v1141_v44  ;;  %v1214_v44 = vadd.s32 224, %v4661_v10 }
 0x1ff   : > { %v954_v52 = vpop.f32.mrb[44].mxu0 }
 0x200   : > { %v955_v53 = vadd.f32 %v4670_v15, %v954_v52  ;;  %v956_v54 = vpop.f32.mrb[45].mxu0  ;;  %3182 = vmatmul.mubr.msk.bf16.gmra.mrb[40].mxu1 %vm4882_vm13, %v4886_v47 }
 0x201   : > { %v957_v56 = vpop.f32.mrb[46].mxu0  ;;  %1855 = vmatprep.mubr.bf16.mxu1 %v5861_v3 }
 0x202   : > { %v958_v61 = vadd.f32 %v4670_v15, %v957_v56  ;;  %v959_v62 = vpop.f32.mrb[47].mxu0  ;;  %v1143_v0 = vmax.f32 %v955_v53, 0.0  ;;  %v1280_v56 = vadd.s32 %v4665_v14, %v1214_v44 }
 0x204   : > { %v1144_v1 = vmax.f32 %v958_v61, 0.0  ;;  %v1281_v61 = vadd.s32 %v4665_v14, %v1215_v51  ;;  %vm1345_vm1 = vcmp.lt.s32.totalorder %v1280_v56, %v4678_v20 }
 0x206   : > { %v4905_v8 = vpack.c.bf16 %v1144_v1, %v1143_v0  ;;  %vm1346_vm8 = vcmp.lt.s32.totalorder %v1281_v61, %v4678_v20 }
 0x207   : > { %v962_v12 = vpop.f32.mrb[48].mxu0  ;;  %vm4954_vm11 = vmpackc.low %vm1346_vm8, %vm1345_vm1 }
 0x208   : > { %v963_v17 = vadd.f32 %v4670_v15, %v962_v12  ;;  %v964_v18 = vpop.f32.mrb[49].mxu0  ;;  %3185 = vmatmul.mubr.msk.bf16.gmra.mrb[44].mxu1 %vm4900_vm4, %v4905_v8  ;;  %v1216_v12 = vadd.s32 240, %v4661_v10 }
 0x209   : > { %v965_v21 = vpop.f32.mrb[50].mxu0  ;;  %1865 = vmatprep.mubr.bf16.mxu1 %v5861_v3 }
 0x20a   : > { %v966_v22 = vadd.f32 %v4670_v15, %v965_v21  ;;  %v967_v23 = vpop.f32.mrb[51].mxu0  ;;  %v1145_v27 = vmax.f32 %v963_v17, 0.0  ;;  %v1217_v17 = vadd.s32 248, %v4661_v10  ;;  %v1282_v24 = vadd.s32 %v4665_v14, %v1216_v12 }
 0x20c   : > { %v1146_v29 = vmax.f32 %v966_v22, 0.0  ;;  %v5975_v22 = vmov 0  ;;  %v1283_v25 = vadd.s32 %v4665_v14, %v1217_v17  ;;  %vm1347_vm1 = vcmp.lt.s32.totalorder %v1282_v24, %v4678_v20 }
 0x20d   : > { %v5976_v22 = vsel %vm4954_vm11, 4294967295, %v5975_v22 }
 0x20e   : > { %v4922_v33 = vpack.c.bf16 %v1146_v29, %v1145_v27  ;;  %5977 = vst [vmem:[#allocation35_spill] sm:$0xff] %v5976_v22  ;;  %vm1348_vm8 = vcmp.lt.s32.totalorder %v1283_v25, %v4678_v20 }
 0x20f   : > { %v970_v37 = vpop.f32.mrb[52].mxu0  ;;  %vm4972_vm7 = vmpackc.low %vm1348_vm8, %vm1347_vm1 }
 0x210   : > { %v971_v40 = vadd.f32 %v4670_v15, %v970_v37  ;;  %v972_v41 = vpop.f32.mrb[53].mxu0  ;;  %3188 = vmatmul.mubr.msk.bf16.gmra.mrb[48].mxu1 %vm4918_vm14, %v4922_v33  ;;  %v1218_v37 = vadd.s32 256, %v4661_v10 }
 0x211   : > { %v973_v42 = vpop.f32.mrb[54].mxu0  ;;  %1875 = vmatprep.mubr.bf16.mxu1 %v5861_v3 }
 0x212   : > { %v974_v45 = vadd.f32 %v4670_v15, %v973_v42  ;;  %v975_v49 = vpop.f32.mrb[55].mxu0  ;;  %v1147_v52 = vmax.f32 %v971_v40, 0.0  ;;  %v1219_v42 = vadd.s32 264, %v4661_v10  ;;  %v1284_v51 = vadd.s32 %v4665_v14, %v1218_v37 }
 0x213   : > { %v5979_v49 = vmov 0  ;;  %v1222_v37 = vadd.s32 288, %v4661_v10 }
 0x214   : > { %v1148_v53 = vmax.f32 %v974_v45, 0.0  ;;  %v5980_v49 = vsel %vm4972_vm7, 4294967295, %v5979_v49  ;;  %vm1349_vm1 = vcmp.lt.s32.totalorder %v1284_v51, %v4678_v20  ;;  %v5987_v51 = vmov 0 }
 0x215   : > { %5981 = vst [vmem:[#allocation37_spill] sm:$0xff] %v5980_v49 }
 0x216   : > { %v4941_v60 = vpack.c.bf16 %v1148_v53, %v1147_v52  ;;  %v1285_v53 = vadd.s32 %v4665_v14, %v1219_v42  ;;  %v1223_v42 = vadd.s32 296, %v4661_v10 }
 0x217   : > { %v978_v62 = vpop.f32.mrb[56].mxu0 }
 0x218   : > { %v979_v63 = vadd.f32 %v4670_v15, %v978_v62  ;;  %v980_v0 = vpop.f32.mrb[57].mxu0  ;;  %3191 = vmatmul.mubr.msk.bf16.gmra.mrb[52].mxu1 %vm4936_vm10, %v4941_v60  ;;  %vm1350_vm8 = vcmp.lt.s32.totalorder %v1285_v53, %v4678_v20  ;;  %v1288_v53 = vadd.s32 %v4665_v14, %v1222_v37 }
 0x219   : > { %v981_v1 = vpop.f32.mrb[58].mxu0  ;;  %1885 = vmatprep.mubr.bf16.mxu1 %v5861_v3 }
 0x21a   : > { %v982_v7 = vadd.f32 %v4670_v15, %v981_v1  ;;  %v983_v9 = vpop.f32.mrb[59].mxu0  ;;  %v1149_v18 = vmax.f32 %v979_v63, 0.0 }
 0x21b   : > { %v1221_v9 = vadd.s32 280, %v4661_v10 }
 0x21c   : > { %v1150_v21 = vmax.f32 %v982_v7, 0.0  ;;  %v1220_v7 = vadd.s32 272, %v4661_v10 }
 0x21d   : > { %v1287_v25 = vadd.s32 %v4665_v14, %v1221_v9 }
 0x21e   : > { %v4958_v23 = vpack.c.bf16 %v1150_v21, %v1149_v18  ;;  %v5983_v18 = vmov 0  ;;  %v1286_v24 = vadd.s32 %v4665_v14, %v1220_v7 }
 0x21f   : > { %v986_v27 = vpop.f32.mrb[60].mxu0 }
 0x220   : > { %5978 = vst [vmem:[#allocation36_spill] sm:$0xff] %v4958_v23  ;;  %v987_v29 = vadd.f32 %v4670_v15, %v986_v27  ;;  %v988_v34 = vpop.f32.mrb[61].mxu0  ;;  %3194 = vmatmul.mubr.msk.bf16.gmra.mrb[56].mxu1 %vm4954_vm11, %v4958_v23  ;;  %vm4990_vm11 = vmpackc.low %vm1350_vm8, %vm1349_vm1  ;;  %vm1351_vm1 = vcmp.lt.s32.totalorder %v1286_v24, %v4678_v20  ;;  %vm1352_vm8 = vcmp.lt.s32.totalorder %v1287_v25, %v4678_v20 }
 0x221   : > { %v989_v36 = vpop.f32.mrb[62].mxu0  ;;  %1895 = vmatprep.mubr.bf16.mxu1 %v5861_v3  ;;  %v5984_v18 = vsel %vm4990_vm11, 4294967295, %v5983_v18 }
 0x222   : > { %v990_v40 = vadd.f32 %v4670_v15, %v989_v36  ;;  %v991_v41 = vpop.f32.mrb[63].mxu0  ;;  %v1151_v44 = vmax.f32 %v987_v29, 0.0  ;;  %5985 = vst [vmem:[#allocation39_spill] sm:$0xff] %v5984_v18 }
 0x224   : > { %v1152_v45 = vmax.f32 %v990_v40, 0.0 }
 0x226   : > { %v4977_v52 = vpack.c.bf16 %v1152_v45, %v1151_v44 }
 0x227   : > { %v994_v56 = vpop.f32.mrb[64].mxu0 }
 0x228   : > { %5982 = vst [vmem:[#allocation38_spill] sm:$0xff] %v4977_v52  ;;  %v995_v61 = vadd.f32 %v4670_v15, %v994_v56  ;;  %v996_v62 = vpop.f32.mrb[65].mxu0  ;;  %3197 = vmatmul.mubr.msk.bf16.gmra.mrb[60].mxu1 %vm4972_vm7, %v4977_v52  ;;  %vm5008_vm7 = vmpackc.low %vm1352_vm8, %vm1351_vm1  ;;  %vm1353_vm1 = vcmp.lt.s32.totalorder %v1288_v53, %v4678_v20 }
 0x229   : > { %v997_v63 = vpop.f32.mrb[66].mxu0  ;;  %1905 = vmatprep.mubr.bf16.mxu1 %v5861_v3  ;;  %v5988_v51 = vsel %vm5008_vm7, 4294967295, %v5987_v51 }
 0x22a   : > { %v998_v0 = vadd.f32 %v4670_v15, %v997_v63  ;;  %v999_v1 = vpop.f32.mrb[67].mxu0  ;;  %v1153_v12 = vmax.f32 %v995_v61, 0.0  ;;  %5989 = vst [vmem:[#allocation41_spill] sm:$0xff] %v5988_v51  ;;  %v1289_v61 = vadd.s32 %v4665_v14, %v1223_v42 }
 0x22c   : > { %v1154_v17 = vmax.f32 %v998_v0, 0.0  ;;  %vm1354_vm8 = vcmp.lt.s32.totalorder %v1289_v61, %v4678_v20  ;;  %v1227_v61 = vadd.s32 328, %v4661_v10 }
 0x22e   : > { %v4994_v21 = vpack.c.bf16 %v1154_v17, %v1153_v12  ;;  %v1224_v12 = vadd.s32 304, %v4661_v10  ;;  %v1225_v17 = vadd.s32 312, %v4661_v10 }
 0x22f   : > { %v1002_v27 = vpop.f32.mrb[68].mxu0 }
 0x230   : > { %5986 = vst [vmem:[#allocation40_spill] sm:$0xff] %v4994_v21  ;;  %v1003_v29 = vadd.f32 %v4670_v15, %v1002_v27  ;;  %v1004_v34 = vpop.f32.mrb[69].mxu0  ;;  %3200 = vmatmul.mubr.msk.bf16.gmra.mrb[64].mxu1 %vm4990_vm11, %v4994_v21  ;;  %vm5026_vm11 = vmpackc.low %vm1354_vm8, %vm1353_vm1  ;;  %v5991_v27 = vmov 0 }
 0x231   : > { %v1005_v36 = vpop.f32.mrb[70].mxu0  ;;  %1915 = vmatprep.mubr.bf16.mxu1 %v5861_v3  ;;  %v5992_v27 = vsel %vm5026_vm11, 4294967295, %v5991_v27  ;;  %v1290_v34 = vadd.s32 %v4665_v14, %v1224_v12 }
 0x232   : > { %v1006_v40 = vadd.f32 %v4670_v15, %v1005_v36  ;;  %v1007_v41 = vpop.f32.mrb[71].mxu0  ;;  %v1155_v44 = vmax.f32 %v1003_v29, 0.0  ;;  %5993 = vst [vmem:[#allocation43_spill] sm:$0xff] %v5992_v27  ;;  %v1291_v36 = vadd.s32 %v4665_v14, %v1225_v17 }
 0x233   : > { %vm1355_vm1 = vcmp.lt.s32.totalorder %v1290_v34, %v4678_v20 }
 0x234   : > { %v1156_v45 = vmax.f32 %v1006_v40, 0.0  ;;  %vm1356_vm8 = vcmp.lt.s32.totalorder %v1291_v36, %v4678_v20 }
 0x236   : > { %v5013_v56 = vpack.c.bf16 %v1156_v45, %v1155_v44  ;;  %v1226_v44 = vadd.s32 320, %v4661_v10 }
 0x237   : > { %v1010_v62 = vpop.f32.mrb[72].mxu0 }
 0x238   : > { %5990 = vst [vmem:[#allocation42_spill] sm:$0xff] %v5013_v56  ;;  %v1011_v63 = vadd.f32 %v4670_v15, %v1010_v62  ;;  %v1012_v0 = vpop.f32.mrb[73].mxu0  ;;  %3203 = vmatmul.mubr.msk.bf16.gmra.mrb[68].mxu1 %vm5008_vm7, %v5013_v56  ;;  %vm5044_vm7 = vmpackc.low %vm1356_vm8, %vm1355_vm1 }
 0x239   : > { %v1013_v1 = vpop.f32.mrb[74].mxu0  ;;  %1925 = vmatprep.mubr.bf16.mxu1 %v5861_v3  ;;  %v5995_v0 = vmov 0 }
 0x23a   : > { %v1014_v7 = vadd.f32 %v4670_v15, %v1013_v1  ;;  %v1015_v9 = vpop.f32.mrb[75].mxu0  ;;  %v1157_v24 = vmax.f32 %v1011_v63, 0.0  ;;  %v5996_v0 = vsel %vm5044_vm7, 4294967295, %v5995_v0  ;;  %v1292_v1 = vadd.s32 %v4665_v14, %v1226_v44 }
 0x23b   : > { %5997 = vst [vmem:[#allocation45_spill] sm:$0xff] %v5996_v0  ;;  %v1293_v9 = vadd.s32 %v4665_v14, %v1227_v61  ;;  %v5999_v44 = vmov 0 }
 0x23c   : > { %v1158_v25 = vmax.f32 %v1014_v7, 0.0  ;;  %vm1357_vm1 = vcmp.lt.s32.totalorder %v1292_v1, %v4678_v20 }
 0x23d   : > { %vm1358_vm8 = vcmp.lt.s32.totalorder %v1293_v9, %v4678_v20 }
 0x23e   : > { %v5030_v29 = vpack.c.bf16 %v1158_v25, %v1157_v24 }
 0x23f   : > { %v1018_v37 = vpop.f32.mrb[76].mxu0 }
 0x240   : > { %5994 = vst [vmem:[#allocation44_spill] sm:$0xff] %v5030_v29  ;;  %v1019_v40 = vadd.f32 %v4670_v15, %v1018_v37  ;;  %v1020_v41 = vpop.f32.mrb[77].mxu0  ;;  %3206 = vmatmul.mubr.msk.bf16.gmra.mrb[72].mxu1 %vm5026_vm11, %v5030_v29  ;;  %v1228_v37 = vadd.s32 336, %v4661_v10  ;;  %vm5062_vm11 = vmpackc.low %vm1358_vm8, %vm1357_vm1  ;;  %v6028_v29 = vmov 0 }
 0x241   : > { %v1021_v42 = vpop.f32.mrb[78].mxu0  ;;  %1935 = vmatprep.mubr.bf16.mxu1 %v5861_v3  ;;  %v6000_v44 = vsel %vm5062_vm11, 4294967295, %v5999_v44 }
 0x242   : > { %v1022_v45 = vadd.f32 %v4670_v15, %v1021_v42  ;;  %v1023_v53 = vpop.f32.mrb[79].mxu0  ;;  %v1159_v62 = vmax.f32 %v1019_v40, 0.0  ;;  %v1229_v40 = vadd.s32 344, %v4661_v10  ;;  %6001 = vst [vmem:[#allocation47_spill] sm:$0xff] %v6000_v44 }
 0x243   : > { %v1294_v53 = vadd.s32 %v4665_v14, %v1228_v37  ;;  %v6003_v37 = vmov 0 }
 0x244   : > { %v1160_v63 = vmax.f32 %v1022_v45, 0.0  ;;  %v1295_v61 = vadd.s32 %v4665_v14, %v1229_v40 }
 0x245   : > { %vm1359_vm1 = vcmp.lt.s32.totalorder %v1294_v53, %v4678_v20 }
 0x246   : > { %v5049_v7 = vpack.c.bf16 %v1160_v63, %v1159_v62  ;;  %vm1360_vm8 = vcmp.lt.s32.totalorder %v1295_v61, %v4678_v20 }
 0x247   : > { %v1026_v12 = vpop.f32.mrb[80].mxu0 }
 0x248   : > { %5998 = vst [vmem:[#allocation46_spill] sm:$0xff] %v5049_v7  ;;  %v1027_v17 = vadd.f32 %v4670_v15, %v1026_v12  ;;  %v1028_v24 = vpop.f32.mrb[81].mxu0  ;;  %3209 = vmatmul.mubr.msk.bf16.gmra.mrb[76].mxu1 %vm5044_vm7, %v5049_v7  ;;  %v1230_v12 = vadd.s32 352, %v4661_v10  ;;  %vm5080_vm7 = vmpackc.low %vm1360_vm8, %vm1359_vm1 }
 0x249   : > { %v1029_v25 = vpop.f32.mrb[82].mxu0  ;;  %1945 = vmatprep.mubr.bf16.mxu1 %v5861_v3  ;;  %v6004_v37 = vsel %vm5080_vm7, 4294967295, %v6003_v37 }
 0x24a   : > { %v1030_v34 = vadd.f32 %v4670_v15, %v1029_v25  ;;  %v1031_v36 = vpop.f32.mrb[83].mxu0  ;;  %v1161_v41 = vmax.f32 %v1027_v17, 0.0  ;;  %v1231_v25 = vadd.s32 360, %v4661_v10  ;;  %6005 = vst [vmem:[#allocation49_spill] sm:$0xff] %v6004_v37  ;;  %v1296_v40 = vadd.s32 %v4665_v14, %v1230_v12 }
 0x24b   : > { %v1232_v12 = vadd.s32 368, %v4661_v10 }
 0x24c   : > { %v1162_v42 = vmax.f32 %v1030_v34, 0.0  ;;  %vm1361_vm1 = vcmp.lt.s32.totalorder %v1296_v40, %v4678_v20 }
 0x24e   : > { %v5066_v45 = vpack.c.bf16 %v1162_v42, %v1161_v41  ;;  %v1297_v42 = vadd.s32 %v4665_v14, %v1231_v25 }
 0x24f   : > { %v1034_v62 = vpop.f32.mrb[84].mxu0 }
 0x250   : > { %6002 = vst [vmem:[#allocation48_spill] sm:$0xff] %v5066_v45  ;;  %v1035_v63 = vadd.f32 %v4670_v15, %v1034_v62  ;;  %v1036_v1 = vpop.f32.mrb[85].mxu0  ;;  %3212 = vmatmul.mubr.msk.bf16.gmra.mrb[80].mxu1 %vm5062_vm11, %v5066_v45  ;;  %vm1362_vm8 = vcmp.lt.s32.totalorder %v1297_v42, %v4678_v20 }
 0x251   : > { %v1037_v9 = vpop.f32.mrb[86].mxu0  ;;  %1955 = vmatprep.mubr.bf16.mxu1 %v5861_v3  ;;  %vm5098_vm11 = vmpackc.low %vm1362_vm8, %vm1361_vm1 }
 0x252   : > { %v1038_v17 = vadd.f32 %v4670_v15, %v1037_v9  ;;  %v1039_v24 = vpop.f32.mrb[87].mxu0  ;;  %v1163_v34 = vmax.f32 %v1035_v63, 0.0 }
 0x254   : > { %v1164_v36 = vmax.f32 %v1038_v17, 0.0  ;;  %v1233_v17 = vadd.s32 376, %v4661_v10 }
 0x256   : > { %v5085_v41 = vpack.c.bf16 %v1164_v36, %v1163_v34  ;;  %v6007_v34 = vmov 0  ;;  %v1299_v40 = vadd.s32 %v4665_v14, %v1233_v17 }
 0x257   : > { %v1042_v62 = vpop.f32.mrb[88].mxu0  ;;  %v6008_v34 = vsel %vm5098_vm11, 4294967295, %v6007_v34 }
 0x258   : > { %6006 = vst [vmem:[#allocation50_spill] sm:$0xff] %v5085_v41  ;;  %v1043_v1 = vadd.f32 %v4670_v15, %v1042_v62  ;;  %v1044_v53 = vpop.f32.mrb[89].mxu0  ;;  %3215 = vmatmul.mubr.msk.bf16.gmra.mrb[84].mxu1 %vm5080_vm7, %v5085_v41  ;;  %6009 = vst [vmem:[#allocation51_spill] sm:$0xff] %v6008_v34  ;;  %v1298_v62 = vadd.s32 %v4665_v14, %v1232_v12  ;;  %vm1364_vm8 = vcmp.lt.s32.totalorder %v1299_v40, %v4678_v20 }
 0x259   : > { %v1045_v61 = vpop.f32.mrb[90].mxu0  ;;  %1965 = vmatprep.mubr.bf16.mxu1 %v5861_v3  ;;  %v1235_v12 = vadd.s32 392, %v4661_v10 }
 0x25a   : > { %v1046_v63 = vadd.f32 %v4670_v15, %v1045_v61  ;;  %v1047_v9 = vpop.f32.mrb[91].mxu0  ;;  %v1165_v24 = vmax.f32 %v1043_v1, 0.0  ;;  %vm1363_vm1 = vcmp.lt.s32.totalorder %v1298_v62, %v4678_v20 }
 0x25b   : > { %vm5116_vm7 = vmpackc.low %vm1364_vm8, %vm1363_vm1 }
 0x25c   : > { %v1166_v25 = vmax.f32 %v1046_v63, 0.0  ;;  %v1234_v63 = vadd.s32 384, %v4661_v10 }
 0x25e   : > { %v5102_v36 = vpack.c.bf16 %v1166_v25, %v1165_v24 }
 0x25f   : > { %v1050_v53 = vpop.f32.mrb[92].mxu0 }
 0x260   : > { %6010 = vst [vmem:[#allocation52_spill] sm:$0xff] %v5102_v36  ;;  %v1051_v61 = vadd.f32 %v4670_v15, %v1050_v53  ;;  %v1052_v42 = vpop.f32.mrb[93].mxu0  ;;  %3218 = vmatmul.mubr.msk.bf16.gmra.mrb[88].mxu1 %vm5098_vm11, %v5102_v36  ;;  %v6011_v53 = vmov 0 }
 0x261   : > { %v1053_v1 = vpop.f32.mrb[94].mxu0  ;;  %1975 = vmatprep.mubr.bf16.mxu1 %v5861_v3  ;;  %v6012_v53 = vsel %vm5116_vm7, 4294967295, %v6011_v53  ;;  %v1300_v42 = vadd.s32 %v4665_v14, %v1234_v63  ;;  %v1301_v3 = vadd.s32 %v4665_v14, %v1235_v12  ;;  %v1236_v12 = vadd.s32 400, %v4661_v10 }
 0x262   : > { %v1054_v9 = vadd.f32 %v4670_v15, %v1053_v1  ;;  %v1055_v24 = vpop.f32.mrb[95].mxu0  ;;  %v1167_v17 = vmax.f32 %v1051_v61, 0.0  ;;  %6013 = vst [vmem:[#allocation53_spill] sm:$0xff] %v6012_v53  ;;  %v6015_v61 = vmov 0  }
 0x263   : > { %vm1365_vm1 = vcmp.lt.s32.totalorder %v1300_v42, %v4678_v20  ;;  %vm1366_vm8 = vcmp.lt.s32.totalorder %v1301_v3, %v4678_v20 }
 0x264   : > { %v1168_v25 = vmax.f32 %v1054_v9, 0.0  ;;  %vm5134_vm11 = vmpackc.low %vm1366_vm8, %vm1365_vm1 }
 0x266   : > { %v5121_v5 = vpack.c.bf16 %v1168_v25, %v1167_v17  ;;  %v1237_v17 = vadd.s32 408, %v4661_v10 }
 0x267   : > { %v1058_v1 = vpop.f32.mrb[96].mxu0 }
 0x268   : > { %6014 = vst [vmem:[#allocation54_spill] sm:$0xff] %v5121_v5  ;;  %v1059_v24 = vadd.f32 %v4670_v15, %v1058_v1  ;;  %v1060_v62 = vpop.f32.mrb[97].mxu0  ;;  %3221 = vmatmul.mubr.msk.bf16.gmra.mrb[92].mxu1 %vm5116_vm7, %v5121_v5  ;;  %v1302_v5 = vadd.s32 %v4665_v14, %v1236_v12  ;;  %v1303_v42 = vadd.s32 %v4665_v14, %v1237_v17  ;;  %v1239_v12 = vadd.s32 424, %v4661_v10 }
 0x269   : > { %v1061_v40 = vpop.f32.mrb[98].mxu0  ;;  %1985 = vmatprep.mubr.bf16.mxu1 %v6015_v61  ;;  %v6016_v62 = vmov 0 }
 0x26a   : > { %v1062_v9 = vadd.f32 %v4670_v15, %v1061_v40  ;;  %v1063_v63 = vpop.f32.mrb[99].mxu0  ;;  %v1169_v25 = vmax.f32 %v1059_v24, 0.0  ;;  %v6017_v62 = vsel %vm5134_vm11, 4294967295, %v6016_v62  ;;  %vm1367_vm1 = vcmp.lt.s32.totalorder %v1302_v5, %v4678_v20 }
 0x26b   : > { %6018 = vst [vmem:[#allocation55_spill] sm:$0xff] %v6017_v62  ;;  %vm1368_vm8 = vcmp.lt.s32.totalorder %v1303_v42, %v4678_v20  ;;  %v1305_v37 = vadd.s32 %v4665_v14, %v1239_v12  ;;  %v1241_v12 = vadd.s32 440, %v4661_v10 }
 0x26c   : > { %v1170_v1 = vmax.f32 %v1062_v9, 0.0  ;;  %v1238_v9 = vadd.s32 416, %v4661_v10  ;;  %vm5152_vm7 = vmpackc.low %vm1368_vm8, %vm1367_vm1 }
 0x26d   : > { %vm1370_vm8 = vcmp.lt.s32.totalorder %v1305_v37, %v4678_v20 }
 0x26e   : > { %v5138_v53 = vpack.c.bf16 %v1170_v1, %v1169_v25  ;;  %v1304_v34 = vadd.s32 %v4665_v14, %v1238_v9 }
 0x26f   : > { %v1066_v40 = vpop.f32.mrb[100].mxu0 }
 0x270   : > { %6019 = vst [vmem:[#allocation56_spill] sm:$0xff] %v5138_v53  ;;  %v1067_v63 = vadd.f32 %v4670_v15, %v1066_v40  ;;  %v1068_v3 = vpop.f32.mrb[101].mxu0  ;;  %3224 = vmatmul.mubr.msk.bf16.gmra.mrb[96].mxu1 %vm5134_vm11, %v5138_v53  ;;  %vm1369_vm1 = vcmp.lt.s32.totalorder %v1304_v34, %v4678_v20  ;;  %v1629_v34 = vsub.s32 1, %v4661_v10 }
 0x271   : > { %v1069_v24 = vpop.f32.mrb[102].mxu0  ;;  %1995 = vmatprep.mubr.bf16.mxu1 %v6015_v61  ;;  %v6020_v3 = vmov 0 }
 0x272   : > { %v1070_v25 = vadd.f32 %v4670_v15, %v1069_v24  ;;  %v1071_v1 = vpop.f32.mrb[103].mxu0  ;;  %v1171_v17 = vmax.f32 %v1067_v63, 0.0  ;;  %v6021_v3 = vsel %vm5152_vm7, 4294967295, %v6020_v3  ;;  %v5169_v63 = vld [vmem:[%s5824_s3] ss:$0 sm:$0xff] }
 0x273   : > { %6022 = vst [vmem:[#allocation57_spill] sm:$0xff] %v6021_v3 }
 0x274   : > { %v1172_v40 = vmax.f32 %v1070_v25, 0.0 }
 0x276   : > { %v5157_v36 = vpack.c.bf16 %v1172_v40, %v1171_v17 }
 0x277   : > { %v1074_v24 = vpop.f32.mrb[104].mxu0 }
 0x278   : > { %6023 = vst [vmem:[#allocation58_spill] sm:$0xff] %v5157_v36  ;;  %v1075_v1 = vadd.f32 %v4670_v15, %v1074_v24  ;;  %v1076_v5 = vpop.f32.mrb[105].mxu0  ;;  %3227 = vmatmul.mubr.msk.bf16.gmra.mrb[100].mxu1 %vm5152_vm7, %v5157_v36  ;;  %v1240_v15 = vadd.s32 432, %v4661_v10  ;;  %vm5175_vm7 = vmpackc.low %vm1370_vm8, %vm1369_vm1  ;;  %v6024_v24 = vmov 0 }
 0x279   : > { %v1077_v42 = vpop.f32.mrb[106].mxu0  ;;  %2005 = vmatprep.mubr.bf16.mxu1 %v6015_v61  ;;  %v6025_v24 = vsel %vm5175_vm7, 4294967295, %v6024_v24 }
 0x27a   : > { %v1078_v9 = vadd.f32 %v5169_v63, %v1077_v42  ;;  %v1079_v25 = vpop.f32.mrb[107].mxu0  ;;  %v1173_v17 = vmax.f32 %v1075_v1, 0.0  ;;  %6026 = vst [vmem:[#allocation59_spill] sm:$0xff] %v6025_v24  ;;  %v1621_v42 = vld [vmem:[%s5826_s5] sm:$0x3]  ;;  %v1306_v37 = vadd.s32 %v4665_v14, %v1240_v15 }
 0x27b   : > { %v1307_v25 = vadd.s32 %v4665_v14, %v1241_v12  ;;  %v5191_v45 = vrot.slane %v1621_v42, %v1629_v34 }
 0x27c   : > { %v1174_v40 = vmax.f32 %v1078_v9, 0.0  ;;  %vm1371_vm1 = vcmp.lt.s32.totalorder %v1306_v37, %v4678_v20 }
 0x27d   : > { %vm1372_vm8 = vcmp.lt.s32.totalorder %v1307_v25, %v4678_v20 }
 0x27e   : > { %v5180_v5 = vpack.c.bf16 %v1174_v40, %v1173_v17  ;;  %v1242_v17 = vadd.s32 448, %v4661_v10 }
 0x27f   : > { %v1082_v41 = vpop.f32.mrb[108].mxu0 }
 0x280   : > { %6027 = vst [vmem:[#allocation60_spill] sm:$0xff] %v5180_v5  ;;  %v1083_v1 = vadd.f32 %v5169_v63, %v1082_v41  ;;  %v1084_v9 = vpop.f32.mrb[109].mxu0  ;;  %3230 = vmatmul.mubr.msk.bf16.gmra.mrb[104].mxu1 %vm5175_vm7, %v5180_v5  ;;  %v1243_v41 = vadd.s32 456, %v4661_v10  ;;  %vm5200_vm7 = vmpackc.low %vm1372_vm8, %vm1371_vm1 }
 0x281   : > { %v1085_v44 = vpop.f32.mrb[110].mxu0  ;;  %2015 = vmatprep.mubr.bf16.mxu1 %v6015_v61  ;;  %v6029_v29 = vsel %vm5200_vm7, 4294967295, %v6028_v29 }
 0x282   : > { %v1086_v40 = vadd.f32 %v5169_v63, %v1085_v44  ;;  %v1087_v15 = vpop.f32.mrb[111].mxu0  ;;  %v1175_v9 = vmax.f32 %v1083_v1, 0.0  ;;  %6030 = vst [vmem:[#allocation61_spill] sm:$0xff] %v6029_v29  ;;  %v1308_v44 = vadd.s32 %v4665_v14, %v1242_v17  ;;  %v1309_v25 = vadd.s32 %v4665_v14, %v1243_v41 }
 0x283   : > { %v1747_v12 = vpop.f32.mrb[0].mxu1 }
 0x284   : > { %v1176_v0 = vmax.f32 %v1086_v40, 0.0  ;;  %v1749_v7 = vpop.f32.mrb[1].mxu1  ;;  %vm1373_vm1 = vcmp.lt.s32.totalorder %v1308_v44, %v4678_v20  ;;  %vm1374_vm8 = vcmp.lt.s32.totalorder %v1309_v25, %v4678_v20  ;;  %v6032_v44 = vmov 0 }
 0x285   : > { %v1750_v34 = vadd.f32 %v1749_v7, %v5191_v45  ;;  %v1751_v27 = vpop.f32.mrb[2].mxu1  ;;  %v1625_v7 = vsub.s32 0, %v4661_v10 }
 0x286   : > { %v5205_v15 = vpack.c.bf16 %v1176_v0, %v1175_v9  ;;  %v1753_v37 = vpop.f32.mrb[3].mxu1 }
 0x287   : > { %v3246_v24 = vmul.f32 -1.442695, %v1750_v34  ;;  %v1754_v5 = vadd.f32 %v1753_v37, %v5191_v45  ;;  %v1090_v1 = vpop.f32.mrb[112].mxu0  ;;  %v1245_v34 = vadd.s32 472, %v4661_v10 }
 0x288   : > { %6031 = vst [vmem:[#allocation62_spill] sm:$0xff] %v5205_v15  ;;  %v1091_v40 = vadd.f32 %v5169_v63, %v1090_v1  ;;  %v1092_v51 = vpop.f32.mrb[113].mxu0  ;;  %3233 = vmatmul.mubr.msk.bf16.gmra.mrb[108].mxu1 %vm5200_vm7, %v5205_v15  ;;  %vm5223_vm7 = vmpackc.low %vm1374_vm8, %vm1373_vm1 }
 0x289   : > { %3628 = vpow2.f32 %v3246_v24  ;;  %v3247_v17 = vmul.f32 -1.442695, %v1754_v5  ;;  %v1093_v0 = vpop.f32.mrb[114].mxu0  ;;  %2025 = vmatprep.mubr.bf16.mxu1 %v6015_v61  ;;  %v1244_v51 = vadd.s32 464, %v4661_v10  ;;  %v5220_v5 = vrot.slane %v1621_v42, %v1625_v7 }
 0x28a   : > { %v1094_v41 = vadd.f32 %v5169_v63, %v1093_v0  ;;  %v1095_v9 = vpop.f32.mrb[115].mxu0  ;;  %v1177_v1 = vmax.f32 %v1091_v40, 0.0  ;;  %v6033_v44 = vsel %vm5223_vm7, 4294967295, %v6032_v44 }
 0x28b   : > { %3630 = vpow2.f32 %v3247_v17  ;;  %v1757_v37 = vpop.f32.mrb[4].mxu1  ;;  %6034 = vst [vmem:[#allocation63_spill] sm:$0xff] %v6033_v44  ;;  %v1310_v9 = vadd.s32 %v4665_v14, %v1244_v51  ;;  %v1311_v17 = vadd.s32 %v4665_v14, %v1245_v34  ;;  %v1246_v51 = vadd.s32 480, %v4661_v10 }
 0x28c   : > { %v1178_v29 = vmax.f32 %v1094_v41, 0.0  ;;  %v1759_v24 = vpop.f32.mrb[5].mxu1 }
 0x28d   : > { %v1760_v15 = vadd.f32 %v1759_v24, %v5191_v45  ;;  %v1761_v56 = vpop.f32.mrb[6].mxu1  ;;  %v1748_v24 = vadd.f32 %v1747_v12, %v5220_v5  ;;  %vm1375_vm1 = vcmp.lt.s32.totalorder %v1310_v9, %v4678_v20  ;;  %vm1376_vm8 = vcmp.lt.s32.totalorder %v1311_v17, %v4678_v20 }
 0x28e   : > { %v5227_v0 = vpack.c.bf16 %v1178_v29, %v1177_v1  ;;  %v1763_v25 = vpop.f32.mrb[7].mxu1  ;;  %v6036_v17 = vmov 0 }
 0x28f   : > { %v3248_v3 = vmul.f32 -1.442695, %v1760_v15  ;;  %v1764_v40 = vadd.f32 %v1763_v25, %v5191_v45  ;;  %v1098_v41 = vpop.f32.mrb[116].mxu0  ;;  %v1247_v25 = vadd.s32 488, %v4661_v10 }
 0x290   : > { %6035 = vst [vmem:[#allocation64_spill] sm:$0xff] %v5227_v0  ;;  %v1099_v42 = vadd.f32 %v5169_v63, %v1098_v41  ;;  %v1100_v7 = vpop.f32.mrb[117].mxu0  ;;  %3236 = vmatmul.mubr.msk.bf16.gmra.mrb[112].mxu1 %vm5223_vm7, %v5227_v0  ;;  %vm5251_vm7 = vmpackc.low %vm1376_vm8, %vm1375_vm1 }
 0x291   : > { %3632 = vpow2.f32 %v3248_v3  ;;  %v3249_v29 = vmul.f32 -1.442695, %v1764_v40  ;;  %v1101_v1 = vpop.f32.mrb[118].mxu0  ;;  %2035 = vmatprep.mubr.bf16.mxu1 %v6015_v61  ;;  %v1752_v7 = vadd.f32 %v1751_v27, %v5220_v5  ;;  %v6037_v17 = vsel %vm5251_vm7, 4294967295, %v6036_v17 }
 0x292   : > { %v1102_v15 = vadd.f32 %v5169_v63, %v1101_v1  ;;  %v1103_v34 = vpop.f32.mrb[119].mxu0  ;;  %v1179_v40 = vmax.f32 %v1099_v42, 0.0  ;;  %6038 = vst [vmem:[#allocation65_spill] sm:$0xff] %v6037_v17  ;;  %v1312_v27 = vadd.s32 %v4665_v14, %v1246_v51 }
 0x293   : > { %v3629_v41 = vpop.eup %3628  ;;  %3634 = vpow2.f32 %v3249_v29  ;;  %v5244_v3 = vpop.f32.mrb[8].mxu1 }
 0x294   : > { %v2322_v12 = vadd.f32 1.0, %v3629_v41  ;;  %v1180_v44 = vmax.f32 %v1102_v15, 0.0  ;;  %v1769_v0 = vpop.f32.mrb[9].mxu1  ;;  %3636 = vtanh.f32 %v1748_v24  ;;  %v1313_v15 = vadd.s32 %v4665_v14, %v1247_v25 }
 0x295   : > { %v3631_v36 = vpop.eup %3630  ;;  %v1770_v1 = vadd.f32 %v1769_v0, %v5191_v45  ;;  %v5247_v34 = vpop.f32.mrb[10].mxu1  ;;  %v1248_v25 = vadd.s32 496, %v4661_v10  ;;  %vm1377_vm1 = vcmp.lt.s32.totalorder %v1312_v27, %v4678_v20 }
 0x296   : > { %3638 = vrcp.f32 %v2322_v12  ;;  %v2323_v29 = vadd.f32 1.0, %v3631_v36  ;;  %v5256_v41 = vpack.c.bf16 %v1180_v44, %v1179_v40  ;;  %v1773_v42 = vpop.f32.mrb[11].mxu1  ;;  %v1758_v36 = vadd.f32 %v1757_v37, %v5220_v5 }
 0x297   : > { %3640 = vtanh.f32 %v1752_v7  ;;  %v3250_v24 = vmul.f32 -1.442695, %v1770_v1  ;;  %v1774_v0 = vadd.f32 %v1773_v42, %v5191_v45  ;;  %v1106_v18 = vpop.f32.mrb[120].mxu0  ;;  %vm1378_vm8 = vcmp.lt.s32.totalorder %v1313_v15, %v4678_v20 }
 0x298   : > { %6039 = vst [vmem:[#allocation66_spill] sm:$0xff] %v5256_v41  ;;  %3642 = vrcp.f32 %v2323_v29  ;;  %v1107_v9 = vadd.f32 %v5169_v63, %v1106_v18  ;;  %v1108_v21 = vpop.f32.mrb[121].mxu0  ;;  %3239 = vmatmul.mubr.msk.bf16.gmra.mrb[116].mxu1 %vm5251_vm7, %v5256_v41  ;;  %v1249_v18 = vadd.s32 504, %v4661_v10  ;;  %v1762_v40 = vadd.f32 %v1761_v56, %v5220_v5  ;;  %vm5279_vm7 = vmpackc.low %vm1378_vm8, %vm1377_vm1 }
 0x299   : > { %3644 = vpow2.f32 %v3250_v24  ;;  %v3251_v44 = vmul.f32 -1.442695, %v1774_v0  ;;  %v1109_v51 = vpop.f32.mrb[122].mxu0  ;;  %2045 = vmatprep.mubr.bf16.mxu1 %v6015_v61  ;;  %v6040_v15 = vmov 0  ;;  %v1314_v56 = vadd.s32 %v4665_v14, %v1248_v25 }
 0x29a   : > { %v1110_v7 = vadd.f32 %v5169_v63, %v1109_v51  ;;  %v1111_v12 = vpop.f32.mrb[123].mxu0  ;;  %v1181_v29 = vmax.f32 %v1107_v9, 0.0  ;;  %v6041_v15 = vsel %vm5279_vm7, 4294967295, %v6040_v15 }
 0x29b   : > { %v3633_v21 = vpop.eup %3632  ;;  %3646 = vpow2.f32 %v3251_v44  ;;  %v5272_v37 = vpop.f32.mrb[12].mxu1  ;;  %6042 = vst [vmem:[#allocation67_spill] sm:$0xff] %v6041_v15  ;;  %vm1379_vm1 = vcmp.lt.s32.totalorder %v1314_v56, %v4678_v20 }
 0x29c   : > { %v2324_v1 = vadd.f32 1.0, %v3633_v21  ;;  %v1182_v42 = vmax.f32 %v1110_v7, 0.0  ;;  %v1779_v24 = vpop.f32.mrb[13].mxu1  ;;  %3648 = vtanh.f32 %v1758_v36  ;;  %v1315_v7 = vadd.s32 %v4665_v14, %v1249_v18 }
 0x29d   : > { %v3635_v0 = vpop.eup %3634  ;;  %v1780_v51 = vadd.f32 %v1779_v24, %v5191_v45  ;;  %v5275_v12 = vpop.f32.mrb[14].mxu1 }
 0x29e   : > { %3650 = vrcp.f32 %v2324_v1  ;;  %v2325_v44 = vadd.f32 1.0, %v3635_v0  ;;  %v5284_v21 = vpack.c.bf16 %v1182_v42, %v1181_v29  ;;  %v1783_v9 = vpop.f32.mrb[15].mxu1  ;;  %v3637_v36 = vpop.eup %3636  ;;  %v1768_v1 = vadd.f32 %v5244_v3, %v5220_v5 }
 0x29f   : > { %3652 = vtanh.f32 %v1762_v40  ;;  %v3252_v24 = vmul.f32 -1.442695, %v1780_v51  ;;  %v1784_v10 = vadd.f32 %v1783_v9, %v5191_v45  ;;  %v1114_v17 = vpop.f32.mrb[124].mxu0  ;;  %vm1380_vm8 = vcmp.lt.s32.totalorder %v1315_v7, %v4678_v20  ;;  %v5324_v7 = vld [vmem:[%s5827_s6] sm:$0x1] }
 0x2a0   : > { %6043 = vst [vmem:[#allocation68_spill] sm:$0xff] %v5284_v21  ;;  %v3639_v27 = vpop.eup %3638  ;;  %3654 = vrcp.f32 %v2325_v44  ;;  %v1115_v41 = vadd.f32 %v5169_v63, %v1114_v17  ;;  %v1116_v62 = vpop.f32.mrb[125].mxu0  ;;  %3242 = vmatmul.mubr.msk.bf16.gmra.mrb[120].mxu1 %vm5279_vm7, %v5284_v21  ;;  %v1772_v51 = vadd.f32 %v5247_v34, %v5220_v5  ;;  %vm5309_vm7 = vmpackc.low %vm1380_vm8, %vm1379_vm1  ;;  %3454 = vmatprep.mubr.bf16.mxu0 %v5324_v7 }
 0x2a1   : > { %v3641_v25 = vpop.eup %3640  ;;  %3656 = vpow2.f32 %v3252_v24  ;;  %v3253_v18 = vmul.f32 -1.442695, %v1784_v10  ;;  %v1117_v40 = vpop.f32.mrb[126].mxu0  ;;  %2055 = vmatprep.mubr.bf16.mxu1 %v6015_v61  ;;  %v5295_v29 = vmul.f32 %v3639_v27, %v3637_v36 }
 0x2a2   : > { %v3643_v42 = vpop.eup %3642  ;;  %v1118_v0 = vadd.f32 %v5169_v63, %v1117_v40  ;;  %v1119_v62 = vpop.f32.mrb[127].mxu0  ;;  %v1183_v61 = vmax.f32 %v1115_v41, 0.0  ;;  %v6044_v40 = vmov 0 }
 0x2a3   : > { %v3645_v17 = vpop.eup %3644  ;;  %3658 = vpow2.f32 %v3253_v18  ;;  %v1787_v3 = vpop.f32.mrb[16].mxu1  ;;  %v5302_v10 = vmul.f32 %v3643_v42, %v3641_v25  ;;  %v6045_v40 = vsel %vm5309_vm7, 4294967295, %v6044_v40 }
 0x2a4   : > { %v2326_v44 = vadd.f32 1.0, %v3645_v17  ;;  %v1184_v9 = vmax.f32 %v1118_v0, 0.0  ;;  %v1789_v36 = vpop.f32.mrb[17].mxu1  ;;  %3660 = vtanh.f32 %v1768_v1  ;;  %6046 = vst [vmem:[#allocation69_spill] sm:$0xff] %v6045_v40  ;;  %v1778_v17 = vadd.f32 %v5272_v37, %v5220_v5 }
 0x2a5   : > { %v3647_v24 = vpop.eup %3646  ;;  %v1790_v63 = vadd.f32 %v1789_v36, %v5191_v45  ;;  %v1791_v27 = vpop.f32.mrb[18].mxu1  ;;  %v1782_v36 = vadd.f32 %v5275_v12, %v5220_v5 }
 0x2a6   : > { %3662 = vrcp.f32 %v2326_v44  ;;  %v2327_v41 = vadd.f32 1.0, %v3647_v24  ;;  %v5315_v25 = vpack.c.bf16 %v1184_v9, %v1183_v61  ;;  %v1793_v18 = vpop.f32.mrb[19].mxu1  ;;  %v3649_v1 = vpop.eup %3648 }
 0x2a7   : > { %3664 = vtanh.f32 %v1772_v51  ;;  %v3254_v42 = vmul.f32 -1.442695, %v1790_v63  ;;  %v1794_v0 = vadd.f32 %v1793_v18, %v5191_v45 }
 0x2a8   : > { %6047 = vst [vmem:[#allocation70_spill] sm:$0xff] %v5315_v25  ;;  %v3651_v56 = vpop.eup %3650  ;;  %3666 = vrcp.f32 %v2327_v41  ;;  %3245 = vmatmul.mubr.msk.bf16.gmra.mrb[124].mxu1 %vm5309_vm7, %v5315_v25 }
 0x2a9   : > { %v3653_v62 = vpop.eup %3652  ;;  %3668 = vpow2.f32 %v3254_v42  ;;  %v3255_v51 = vmul.f32 -1.442695, %v1794_v0  ;;  %v5328_v44 = vmul.f32 %v3651_v56, %v3649_v1  ;;  %3436 = vmatprep.mubr.bf16.mxu1 %v5324_v7 }
 0x2aa   : > { %v3655_v61 = vpop.eup %3654 }
 0x2ab   : > { %v3657_v9 = vpop.eup %3656  ;;  %3670 = vpow2.f32 %v3255_v51  ;;  %v1797_v24 = vpop.f32.mrb[20].mxu1  ;;  %v5334_v63 = vmul.f32 %v3655_v61, %v3653_v62 }
 0x2ac   : > { %v2328_v41 = vadd.f32 1.0, %v3657_v9  ;;  %v1799_v18 = vpop.f32.mrb[21].mxu1  ;;  %3672 = vtanh.f32 %v1778_v17  ;;  %v1788_v9 = vadd.f32 %v1787_v3, %v5220_v5 }
 0x2ad   : > { %v3659_v37 = vpop.eup %3658  ;;  %v1800_v1 = vadd.f32 %v1799_v18, %v5191_v45  ;;  %v1801_v42 = vpop.f32.mrb[22].mxu1 }
 0x2ae   : > { %3674 = vrcp.f32 %v2328_v41  ;;  %v2329_v56 = vadd.f32 1.0, %v3659_v37  ;;  %v1803_v34 = vpop.f32.mrb[23].mxu1  ;;  %v3661_v20 = vpop.eup %3660  ;;  %v1792_v41 = vadd.f32 %v1791_v27, %v5220_v5 }
 0x2af   : > { %3676 = vtanh.f32 %v1782_v36  ;;  %v3256_v12 = vmul.f32 -1.442695, %v1800_v1  ;;  %v1804_v51 = vadd.f32 %v1803_v34, %v5191_v45 }
 0x2b0   : > { %v3663_v62 = vpop.eup %3662  ;;  %3678 = vrcp.f32 %v2329_v56 }
 0x2b1   : > { %v3665_v61 = vpop.eup %3664  ;;  %3680 = vpow2.f32 %v3256_v12  ;;  %v3257_v17 = vmul.f32 -1.442695, %v1804_v51  ;;  %v5341_v18 = vmul.f32 %v3663_v62, %v3661_v20 }
 0x2b2   : > { %v3667_v14 = vpop.eup %3666 }
 0x2b3   : > { %v3669_v40 = vpop.eup %3668  ;;  %3682 = vpow2.f32 %v3257_v17  ;;  %v1807_v37 = vpop.f32.mrb[24].mxu1  ;;  %v5344_v0 = vmul.f32 %v3667_v14, %v3665_v61  ;;  %v1798_v61 = vadd.f32 %v1797_v24, %v5220_v5 }
 0x2b4   : > { %v2330_v36 = vadd.f32 1.0, %v3669_v40  ;;  %v1809_v1 = vpop.f32.mrb[25].mxu1  ;;  %3684 = vtanh.f32 %v1788_v9 }
 0x2b5   : > { %v3671_v34 = vpop.eup %3670  ;;  %v1810_v56 = vadd.f32 %v1809_v1, %v5191_v45  ;;  %v1811_v25 = vpop.f32.mrb[26].mxu1 }
 0x2b6   : > { %3686 = vrcp.f32 %v2330_v36  ;;  %v2331_v20 = vadd.f32 1.0, %v3671_v34  ;;  %v1813_v12 = vpop.f32.mrb[27].mxu1  ;;  %v3673_v51 = vpop.eup %3672  ;;  %v1802_v36 = vadd.f32 %v1801_v42, %v5220_v5 }
 0x2b7   : > { %3688 = vtanh.f32 %v1792_v41  ;;  %v3258_v27 = vmul.f32 -1.442695, %v1810_v56  ;;  %v1814_v62 = vadd.f32 %v1813_v12, %v5191_v45 }
 0x2b8   : > { %v3675_v14 = vpop.eup %3674  ;;  %3690 = vrcp.f32 %v2331_v20 }
 0x2b9   : > { %v3677_v40 = vpop.eup %3676  ;;  %3692 = vpow2.f32 %v3258_v27  ;;  %v3259_v9 = vmul.f32 -1.442695, %v1814_v62  ;;  %v5351_v17 = vmul.f32 %v3675_v14, %v3673_v51 }
 0x2ba   : > { %v3679_v1 = vpop.eup %3678 }
 0x2bb   : > { %v3681_v15 = vpop.eup %3680  ;;  %3694 = vpow2.f32 %v3259_v9  ;;  %v1817_v34 = vpop.f32.mrb[28].mxu1  ;;  %v5354_v3 = vmul.f32 %v3679_v1, %v3677_v40  ;;  %v1808_v9 = vadd.f32 %v1807_v37, %v5220_v5 }
 0x2bc   : > { %v2332_v41 = vadd.f32 1.0, %v3681_v15  ;;  %v1819_v56 = vpop.f32.mrb[29].mxu1  ;;  %3696 = vtanh.f32 %v1798_v61 }
 0x2bd   : > { %v3683_v12 = vpop.eup %3682  ;;  %v1820_v20 = vadd.f32 %v1819_v56, %v5191_v45  ;;  %v1821_v21 = vpop.f32.mrb[30].mxu1 }
 0x2be   : > { %3698 = vrcp.f32 %v2332_v41  ;;  %v2333_v51 = vadd.f32 1.0, %v3683_v12  ;;  %v1823_v27 = vpop.f32.mrb[31].mxu1  ;;  %v3685_v62 = vpop.eup %3684  ;;  %v1812_v41 = vadd.f32 %v1811_v25, %v5220_v5 }
 0x2bf   : > { %3700 = vtanh.f32 %v1802_v36  ;;  %v3260_v42 = vmul.f32 -1.442695, %v1820_v20  ;;  %v1824_v14 = vadd.f32 %v1823_v27, %v5191_v45 }
 0x2c0   : > { %v3687_v40 = vpop.eup %3686  ;;  %3702 = vrcp.f32 %v2333_v51 }
 0x2c1   : > { %v3689_v15 = vpop.eup %3688  ;;  %3704 = vpow2.f32 %v3260_v42  ;;  %v3261_v61 = vmul.f32 -1.442695, %v1824_v14  ;;  %v5361_v1 = vmul.f32 %v3687_v40, %v3685_v62 }
 0x2c2   : > { %v3691_v56 = vpop.eup %3690 }
 0x2c3   : > { %v3693_v53 = vpop.eup %3692  ;;  %3706 = vpow2.f32 %v3261_v61  ;;  %v1827_v12 = vpop.f32.mrb[32].mxu1  ;;  %v5364_v24 = vmul.f32 %v3691_v56, %v3689_v15  ;;  %v1818_v61 = vadd.f32 %v1817_v34, %v5220_v5 }
 0x2c4   : > { %v2334_v36 = vadd.f32 1.0, %v3693_v53  ;;  %v1829_v20 = vpop.f32.mrb[33].mxu1  ;;  %3708 = vtanh.f32 %v1808_v9 }
 0x2c5   : > { %v3695_v27 = vpop.eup %3694  ;;  %v1830_v51 = vadd.f32 %v1829_v20, %v5191_v45  ;;  %v1831_v48 = vpop.f32.mrb[34].mxu1 }
 0x2c6   : > { %3710 = vrcp.f32 %v2334_v36  ;;  %v2335_v62 = vadd.f32 1.0, %v3695_v27  ;;  %v1833_v42 = vpop.f32.mrb[35].mxu1  ;;  %v3697_v14 = vpop.eup %3696  ;;  %v1822_v36 = vadd.f32 %v1821_v21, %v5220_v5 }
 0x2c7   : > { %3712 = vtanh.f32 %v1812_v41  ;;  %v3262_v25 = vmul.f32 -1.442695, %v1830_v51  ;;  %v1834_v40 = vadd.f32 %v1833_v42, %v5191_v45 }
 0x2c8   : > { %v3699_v15 = vpop.eup %3698  ;;  %3714 = vrcp.f32 %v2335_v62 }
 0x2c9   : > { %v3701_v53 = vpop.eup %3700  ;;  %3716 = vpow2.f32 %v3262_v25  ;;  %v3263_v9 = vmul.f32 -1.442695, %v1834_v40  ;;  %v5371_v56 = vmul.f32 %v3699_v15, %v3697_v14 }
 0x2ca   : > { %v3703_v20 = vpop.eup %3702 }
 0x2cb   : > { %v3705_v50 = vpop.eup %3704  ;;  %3718 = vpow2.f32 %v3263_v9  ;;  %v1837_v27 = vpop.f32.mrb[36].mxu1  ;;  %v5374_v37 = vmul.f32 %v3703_v20, %v3701_v53  ;;  %v1828_v9 = vadd.f32 %v1827_v12, %v5220_v5 }
 0x2cc   : > { %v2336_v41 = vadd.f32 1.0, %v3705_v50  ;;  %v1839_v51 = vpop.f32.mrb[37].mxu1  ;;  %3720 = vtanh.f32 %v1818_v61 }
 0x2cd   : > { %v3707_v42 = vpop.eup %3706  ;;  %v1840_v62 = vadd.f32 %v1839_v51, %v5191_v45  ;;  %v1841_v49 = vpop.f32.mrb[38].mxu1 }
 0x2ce   : > { %3722 = vrcp.f32 %v2336_v41  ;;  %v2337_v14 = vadd.f32 1.0, %v3707_v42  ;;  %v1843_v25 = vpop.f32.mrb[39].mxu1  ;;  %v3709_v40 = vpop.eup %3708  ;;  %v1832_v41 = vadd.f32 %v1831_v48, %v5220_v5 }
 0x2cf   : > { %3724 = vtanh.f32 %v1822_v36  ;;  %v3264_v21 = vmul.f32 -1.442695, %v1840_v62  ;;  %v1844_v15 = vadd.f32 %v1843_v25, %v5191_v45 }
 0x2d0   : > { %v3711_v53 = vpop.eup %3710  ;;  %3726 = vrcp.f32 %v2337_v14 }
 0x2d1   : > { %v3713_v50 = vpop.eup %3712  ;;  %3728 = vpow2.f32 %v3264_v21  ;;  %v3265_v61 = vmul.f32 -1.442695, %v1844_v15  ;;  %v5381_v20 = vmul.f32 %v3711_v53, %v3709_v40 }
 0x2d2   : > { %v3715_v51 = vpop.eup %3714 }
 0x2d3   : > { %v3717_v52 = vpop.eup %3716  ;;  %3730 = vpow2.f32 %v3265_v61  ;;  %v1847_v42 = vpop.f32.mrb[40].mxu1  ;;  %v5384_v34 = vmul.f32 %v3715_v51, %v3713_v50  ;;  %v1838_v61 = vadd.f32 %v1837_v27, %v5220_v5 }
 0x2d4   : > { %v2338_v36 = vadd.f32 1.0, %v3717_v52  ;;  %v1849_v62 = vpop.f32.mrb[41].mxu1  ;;  %3732 = vtanh.f32 %v1828_v9 }
 0x2d5   : > { %v3719_v25 = vpop.eup %3718  ;;  %v1850_v14 = vadd.f32 %v1849_v62, %v5191_v45  ;;  %v1851_v30 = vpop.f32.mrb[42].mxu1 }
 0x2d6   : > { %3734 = vrcp.f32 %v2338_v36  ;;  %v2339_v40 = vadd.f32 1.0, %v3719_v25  ;;  %v1853_v21 = vpop.f32.mrb[43].mxu1  ;;  %v3721_v15 = vpop.eup %3720  ;;  %v1842_v36 = vadd.f32 %v1841_v49, %v5220_v5  ;;  %v1852_v27 = vadd.f32 %v1851_v30, %v5220_v5 }
 0x2d7   : > { %3736 = vtanh.f32 %v1832_v41  ;;  %v3266_v48 = vmul.f32 -1.442695, %v1850_v14  ;;  %v1854_v53 = vadd.f32 %v1853_v21, %v5191_v45 }
 0x2d8   : > { %v3723_v50 = vpop.eup %3722  ;;  %3738 = vrcp.f32 %v2339_v40 }
 0x2d9   : > { %v3725_v52 = vpop.eup %3724  ;;  %3740 = vpow2.f32 %v3266_v48  ;;  %v3267_v9 = vmul.f32 -1.442695, %v1854_v53  ;;  %v5391_v51 = vmul.f32 %v3723_v50, %v3721_v15 }
 0x2da   : > { %v3727_v62 = vpop.eup %3726 }
 0x2db   : > { %v3729_v31 = vpop.eup %3728  ;;  %3742 = vpow2.f32 %v3267_v9  ;;  %v1857_v25 = vpop.f32.mrb[44].mxu1  ;;  %v5394_v12 = vmul.f32 %v3727_v62, %v3725_v52  ;;  %v1848_v9 = vadd.f32 %v1847_v42, %v5220_v5 }
 0x2dc   : > { %v2340_v41 = vadd.f32 1.0, %v3729_v31  ;;  %v1859_v14 = vpop.f32.mrb[45].mxu1  ;;  %3744 = vtanh.f32 %v1838_v61 }
 0x2dd   : > { %v3731_v21 = vpop.eup %3730  ;;  %v1860_v40 = vadd.f32 %v1859_v14, %v5191_v45  ;;  %v1861_v22 = vpop.f32.mrb[46].mxu1 }
 0x2de   : > { %3746 = vrcp.f32 %v2340_v41  ;;  %v2341_v15 = vadd.f32 1.0, %v3731_v21  ;;  %v1863_v48 = vpop.f32.mrb[47].mxu1  ;;  %v3733_v53 = vpop.eup %3732 }
 0x2df   : > { %3748 = vtanh.f32 %v1842_v36  ;;  %v3268_v49 = vmul.f32 -1.442695, %v1860_v40  ;;  %v1864_v50 = vadd.f32 %v1863_v48, %v5191_v45 }
 0x2e0   : > { %v3735_v52 = vpop.eup %3734  ;;  %3750 = vrcp.f32 %v2341_v15 }
 0x2e1   : > { %v3737_v31 = vpop.eup %3736  ;;  %3752 = vpow2.f32 %v3268_v49  ;;  %v3269_v61 = vmul.f32 -1.442695, %v1864_v50  ;;  %v2530_v62 = vmul.f32 %v3735_v52, %v3733_v53 }
 0x2e2   : > { %v3739_v14 = vpop.eup %3738 }
 0x2e3   : > { %v3741_v23 = vpop.eup %3740  ;;  %3754 = vpow2.f32 %v3269_v61  ;;  %v1867_v41 = vpop.f32.mrb[48].mxu1  ;;  %v2531_v21 = vmul.f32 %v3739_v14, %v3737_v31 }
 0x2e4   : > { %v2342_v11 = vadd.f32 1.0, %v3741_v23  ;;  %v1869_v36 = vpop.f32.mrb[49].mxu1  ;;  %3756 = vtanh.f32 %v1848_v9  ;;  %v6048_v23 = vpack.c.bf16 %v5302_v10, %v5295_v29  ;;  %v1858_v9 = vadd.f32 %v1857_v25, %v5220_v5 }
 0x2e5   : > { %v3743_v40 = vpop.eup %3742  ;;  %v1870_v48 = vadd.f32 %v1869_v36, %v5191_v45  ;;  %v1871_v15 = vpop.f32.mrb[50].mxu1  ;;  %v2586_v13 = vpack.c.bf16 %v2531_v21, %v2530_v62 }
 0x2e6   : > { %3758 = vrcp.f32 %v2342_v11  ;;  %v2343_v42 = vadd.f32 1.0, %v3743_v40  ;;  %v1873_v49 = vpop.f32.mrb[51].mxu1  ;;  %v3745_v50 = vpop.eup %3744 }
 0x2e7   : > { %3760 = vtanh.f32 %v1852_v27  ;;  %v3270_v53 = vmul.f32 -1.442695, %v1870_v48  ;;  %v1874_v52 = vadd.f32 %v1873_v49, %v5191_v45  ;;  %3420 = vmatprep.subr.bf16.mxu1 %v2586_v13  ;;  %v1862_v27 = vadd.f32 %v1861_v22, %v5220_v5 }
 0x2e8   : > { %v3747_v30 = vpop.eup %3746  ;;  %3762 = vrcp.f32 %v2343_v42  ;;  %3421 = vmatpush3.bf16.xpose.msra.mxu1 %v6048_v23 }
 0x2e9   : > { %v3749_v31 = vpop.eup %3748  ;;  %3764 = vpow2.f32 %v3270_v53  ;;  %v3271_v61 = vmul.f32 -1.442695, %v1874_v52  ;;  %v2532_v11 = vmul.f32 %v3747_v30, %v3745_v50  ;;  %v6049_v30 = vpack.c.bf16 %v5334_v63, %v5328_v44 }
 0x2ea   : > { %v3751_v62 = vpop.eup %3750 }
 0x2eb   : > { %v3753_v14 = vpop.eup %3752  ;;  %3766 = vpow2.f32 %v3271_v61  ;;  %v1877_v21 = vpop.f32.mrb[52].mxu1  ;;  %v2533_v36 = vmul.f32 %v3751_v62, %v3749_v31  ;;  %v1868_v31 = vadd.f32 %v1867_v41, %v5220_v5 }
 0x2ec   : > { %v2344_v13 = vadd.f32 1.0, %v3753_v14  ;;  %v1879_v40 = vpop.f32.mrb[53].mxu1  ;;  %3768 = vtanh.f32 %v1858_v9  ;;  %v1872_v14 = vadd.f32 %v1871_v15, %v5220_v5 }
 0x2ed   : > { %v3755_v48 = vpop.eup %3754  ;;  %v1880_v29 = vadd.f32 %v1879_v40, %v5191_v45  ;;  %v1881_v10 = vpop.f32.mrb[54].mxu1  ;;  %v2587_v42 = vpack.c.bf16 %v2533_v36, %v2532_v11 }
 0x2ee   : > { %3770 = vrcp.f32 %v2344_v13  ;;  %v2345_v25 = vadd.f32 1.0, %v3755_v48  ;;  %v1883_v49 = vpop.f32.mrb[55].mxu1  ;;  %v3757_v53 = vpop.eup %3756 }
 0x2ef   : > { %3772 = vtanh.f32 %v1862_v27  ;;  %v3272_v50 = vmul.f32 -1.442695, %v1880_v29  ;;  %v1884_v52 = vadd.f32 %v1883_v49, %v5191_v45  ;;  %3422 = vmatprep.subr.bf16.mxu1 %v2587_v42 }
 0x2f0   : > { %v3759_v22 = vpop.eup %3758  ;;  %3774 = vrcp.f32 %v2345_v25  ;;  %3423 = vmatpush3.bf16.xpose.msra.mxu1 %v6049_v30 }
 0x2f1   : > { %v3761_v23 = vpop.eup %3760  ;;  %3776 = vpow2.f32 %v3272_v50  ;;  %v3273_v9 = vmul.f32 -1.442695, %v1884_v52  ;;  %v2534_v61 = vmul.f32 %v3759_v22, %v3757_v53  ;;  %v6050_v50 = vpack.c.bf16 %v5344_v0, %v5341_v18 }
 0x2f2   : > { %v3763_v11 = vpop.eup %3762  ;;  %v1878_v22 = vadd.f32 %v1877_v21, %v5220_v5 }
 0x2f3   : > { %v3765_v62 = vpop.eup %3764  ;;  %3778 = vpow2.f32 %v3273_v9  ;;  %v1887_v27 = vpop.f32.mrb[56].mxu1  ;;  %v2535_v36 = vmul.f32 %v3763_v11, %v3761_v23 }
 0x2f4   : > { %v2346_v13 = vadd.f32 1.0, %v3765_v62  ;;  %v1889_v40 = vpop.f32.mrb[57].mxu1  ;;  %3780 = vtanh.f32 %v1868_v31 }
 0x2f5   : > { %v3767_v48 = vpop.eup %3766  ;;  %v1890_v44 = vadd.f32 %v1889_v40, %v5191_v45  ;;  %v1891_v63 = vpop.f32.mrb[58].mxu1  ;;  %v2588_v29 = vpack.c.bf16 %v2535_v36, %v2534_v61  ;;  %v1882_v61 = vadd.f32 %v1881_v10, %v5220_v5 }
 0x2f6   : > { %3782 = vrcp.f32 %v2346_v13  ;;  %v2347_v41 = vadd.f32 1.0, %v3767_v48  ;;  %v1893_v42 = vpop.f32.mrb[59].mxu1  ;;  %v3769_v25 = vpop.eup %3768 }
 0x2f7   : > { %3784 = vtanh.f32 %v1872_v14  ;;  %v3274_v49 = vmul.f32 -1.442695, %v1890_v44  ;;  %v1894_v53 = vadd.f32 %v1893_v42, %v5191_v45  ;;  %3424 = vmatprep.subr.bf16.mxu1 %v2588_v29  ;;  %v6051_v42 = vpack.c.bf16 %v5354_v3, %v5351_v17 }
 0x2f8   : > { %v3771_v15 = vpop.eup %3770  ;;  %3786 = vrcp.f32 %v2347_v41  ;;  %3425 = vmatpush3.bf16.xpose.msra.mxu1 %v6050_v50 }
 0x2f9   : > { %v3773_v52 = vpop.eup %3772  ;;  %3788 = vpow2.f32 %v3274_v49  ;;  %v3275_v30 = vmul.f32 -1.442695, %v1894_v53  ;;  %v2536_v23 = vmul.f32 %v3771_v15, %v3769_v25  ;;  %v1888_v49 = vadd.f32 %v1887_v27, %v5220_v5 }
 0x2fa   : > { %v3775_v31 = vpop.eup %3774 }
 0x2fb   : > { %v3777_v9 = vpop.eup %3776  ;;  %3790 = vpow2.f32 %v3275_v30  ;;  %v1897_v11 = vpop.f32.mrb[60].mxu1  ;;  %v2537_v62 = vmul.f32 %v3775_v31, %v3773_v52 }
 0x2fc   : > { %v2348_v14 = vadd.f32 1.0, %v3777_v9  ;;  %v1899_v36 = vpop.f32.mrb[61].mxu1  ;;  %3792 = vtanh.f32 %v1878_v22  ;;  %v1892_v22 = vadd.f32 %v1891_v63, %v5220_v5 }
 0x2fd   : > { %v3779_v13 = vpop.eup %3778  ;;  %v1900_v0 = vadd.f32 %v1899_v36, %v5191_v45  ;;  %v1901_v18 = vpop.f32.mrb[62].mxu1  ;;  %v2589_v40 = vpack.c.bf16 %v2537_v62, %v2536_v23 }
 0x2fe   : > { %3794 = vrcp.f32 %v2348_v14  ;;  %v2349_v21 = vadd.f32 1.0, %v3779_v13  ;;  %v1903_v48 = vpop.f32.mrb[63].mxu1  ;;  %v3781_v44 = vpop.eup %3780 }
 0x2ff   : > { %3796 = vtanh.f32 %v1882_v61  ;;  %v3276_v29 = vmul.f32 -1.442695, %v1900_v0  ;;  %v1904_v41 = vadd.f32 %v1903_v48, %v5191_v45  ;;  %3426 = vmatprep.subr.bf16.mxu1 %v2589_v40  ;;  %v6052_v40 = vpack.c.bf16 %v5364_v24, %v5361_v1 }
 0x300   : > { %v3783_v10 = vpop.eup %3782  ;;  %3798 = vrcp.f32 %v2349_v21  ;;  %3427 = vmatpush3.bf16.xpose.msra.mxu1 %v6051_v42  ;;  %v1898_v48 = vadd.f32 %v1897_v11, %v5220_v5  ;;  %v1902_v42 = vadd.f32 %v1901_v18, %v5220_v5 }
 0x301   : > { %v3785_v25 = vpop.eup %3784  ;;  %3800 = vpow2.f32 %v3276_v29  ;;  %v3277_v53 = vmul.f32 -1.442695, %v1904_v41  ;;  %v2538_v15 = vmul.f32 %v3783_v10, %v3781_v44 }
 0x302   : > { %v3787_v50 = vpop.eup %3786 }
 0x303   : > { %v3789_v52 = vpop.eup %3788  ;;  %3802 = vpow2.f32 %v3277_v53  ;;  %v1907_v30 = vpop.f32.mrb[64].mxu1  ;;  %v2539_v23 = vmul.f32 %v3787_v50, %v3785_v25 }
 0x304   : > { %v2350_v31 = vadd.f32 1.0, %v3789_v52  ;;  %v1909_v9 = vpop.f32.mrb[65].mxu1  ;;  %3804 = vtanh.f32 %v1888_v49 }
 0x305   : > { %v3791_v61 = vpop.eup %3790  ;;  %v1910_v3 = vadd.f32 %v1909_v9, %v5191_v45  ;;  %v1911_v17 = vpop.f32.mrb[66].mxu1  ;;  %v2590_v62 = vpack.c.bf16 %v2539_v23, %v2538_v15 }
 0x306   : > { %3806 = vrcp.f32 %v2350_v31  ;;  %v2351_v27 = vadd.f32 1.0, %v3791_v61  ;;  %v1913_v14 = vpop.f32.mrb[67].mxu1  ;;  %v3793_v36 = vpop.eup %3792  ;;  %v6053_v61 = vpack.c.bf16 %v5374_v37, %v5371_v56 }
 0x307   : > { %3808 = vtanh.f32 %v1892_v22  ;;  %v3278_v13 = vmul.f32 -1.442695, %v1910_v3  ;;  %v1914_v0 = vadd.f32 %v1913_v14, %v5191_v45  ;;  %3428 = vmatprep.subr.bf16.mxu1 %v2590_v62  ;;  %v1908_v62 = vadd.f32 %v1907_v30, %v5220_v5 }
 0x308   : > { %v3795_v63 = vpop.eup %3794  ;;  %3810 = vrcp.f32 %v2351_v27  ;;  %3429 = vmatpush3.bf16.xpose.msra.mxu1 %v6052_v40 }
 0x309   : > { %v3797_v21 = vpop.eup %3796  ;;  %3812 = vpow2.f32 %v3278_v13  ;;  %v3279_v44 = vmul.f32 -1.442695, %v1914_v0  ;;  %v2540_v29 = vmul.f32 %v3795_v63, %v3793_v36  ;;  %v1912_v0 = vadd.f32 %v1911_v17, %v5220_v5 }
 0x30a   : > { %v3799_v41 = vpop.eup %3798 }
 0x30b   : > { %v3801_v10 = vpop.eup %3800  ;;  %3814 = vpow2.f32 %v3279_v44  ;;  %v1917_v25 = vpop.f32.mrb[68].mxu1  ;;  %v2541_v49 = vmul.f32 %v3799_v41, %v3797_v21 }
 0x30c   : > { %v2352_v53 = vadd.f32 1.0, %v3801_v10  ;;  %v1919_v15 = vpop.f32.mrb[69].mxu1  ;;  %3816 = vtanh.f32 %v1898_v48 }
 0x30d   : > { %v3803_v50 = vpop.eup %3802  ;;  %v1920_v24 = vadd.f32 %v1919_v15, %v5191_v45  ;;  %v1921_v1 = vpop.f32.mrb[70].mxu1  ;;  %v2591_v52 = vpack.c.bf16 %v2541_v49, %v2540_v29 }
 0x30e   : > { %3818 = vrcp.f32 %v2352_v53  ;;  %v2353_v11 = vadd.f32 1.0, %v3803_v50  ;;  %v1923_v22 = vpop.f32.mrb[71].mxu1  ;;  %v3805_v23 = vpop.eup %3804  ;;  %v6054_v53 = vpack.c.bf16 %v5384_v34, %v5381_v20  ;;  %v1918_v50 = vadd.f32 %v1917_v25, %v5220_v5 }
 0x30f   : > { %3820 = vtanh.f32 %v1902_v42  ;;  %v3280_v31 = vmul.f32 -1.442695, %v1920_v24  ;;  %v1924_v9 = vadd.f32 %v1923_v22, %v5191_v45  ;;  %3430 = vmatprep.subr.bf16.mxu1 %v2591_v52 }
 0x310   : > { %v3807_v18 = vpop.eup %3806  ;;  %3822 = vrcp.f32 %v2353_v11  ;;  %3431 = vmatpush3.bf16.xpose.msra.mxu1 %v6053_v61 }
 0x311   : > { %v3809_v3 = vpop.eup %3808  ;;  %3824 = vpow2.f32 %v3280_v31  ;;  %v3281_v27 = vmul.f32 -1.442695, %v1924_v9  ;;  %v2542_v14 = vmul.f32 %v3807_v18, %v3805_v23  ;;  %v1922_v23 = vadd.f32 %v1921_v1, %v5220_v5 }
 0x312   : > { %v3811_v36 = vpop.eup %3810 }
 0x313   : > { %v3813_v13 = vpop.eup %3812  ;;  %3826 = vpow2.f32 %v3281_v27  ;;  %v1927_v63 = vpop.f32.mrb[72].mxu1  ;;  %v2543_v40 = vmul.f32 %v3811_v36, %v3809_v3 }
 0x314   : > { %v2354_v21 = vadd.f32 1.0, %v3813_v13  ;;  %v1929_v48 = vpop.f32.mrb[73].mxu1  ;;  %3828 = vtanh.f32 %v1908_v62 }
 0x315   : > { %v3815_v44 = vpop.eup %3814  ;;  %v1930_v37 = vadd.f32 %v1929_v48, %v5191_v45  ;;  %v1931_v56 = vpop.f32.mrb[74].mxu1  ;;  %v2592_v29 = vpack.c.bf16 %v2543_v40, %v2542_v14 }
 0x316   : > { %3830 = vrcp.f32 %v2354_v21  ;;  %v2355_v30 = vadd.f32 1.0, %v3815_v44  ;;  %v1933_v41 = vpop.f32.mrb[75].mxu1  ;;  %v3817_v10 = vpop.eup %3816  ;;  %v1928_v21 = vadd.f32 %v1927_v63, %v5220_v5 }
 0x317   : > { %3832 = vtanh.f32 %v1912_v0  ;;  %v3282_v42 = vmul.f32 -1.442695, %v1930_v37  ;;  %v1934_v49 = vadd.f32 %v1933_v41, %v5191_v45  ;;  %3432 = vmatprep.subr.bf16.mxu1 %v2592_v29  ;;  %v6055_v0 = vpack.c.bf16 %v5394_v12, %v5391_v51 }
 0x318   : > { %v3819_v17 = vpop.eup %3818  ;;  %3834 = vrcp.f32 %v2355_v30  ;;  %3433 = vmatpush3.bf16.xpose.msra.mxu1 %v6054_v53  ;;  %v1932_v30 = vadd.f32 %v1931_v56, %v5220_v5 }
 0x319   : > { %v3821_v15 = vpop.eup %3820  ;;  %3836 = vpow2.f32 %v3282_v42  ;;  %v3283_v24 = vmul.f32 -1.442695, %v1934_v49  ;;  %v2544_v52 = vmul.f32 %v3819_v17, %v3817_v10 }
 0x31a   : > { %v3823_v11 = vpop.eup %3822 }
 0x31b   : > { %v3825_v22 = vpop.eup %3824  ;;  %3838 = vpow2.f32 %v3283_v24  ;;  %v1937_v31 = vpop.f32.mrb[76].mxu1  ;;  %v2545_v9 = vmul.f32 %v3823_v11, %v3821_v15 }
 0x31c   : > { %v2356_v18 = vadd.f32 1.0, %v3825_v22  ;;  %v1939_v61 = vpop.f32.mrb[77].mxu1  ;;  %3840 = vtanh.f32 %v1918_v50 }
 0x31d   : > { %v3827_v3 = vpop.eup %3826  ;;  %v1940_v34 = vadd.f32 %v1939_v61, %v5191_v45  ;;  %v1941_v20 = vpop.f32.mrb[78].mxu1  ;;  %v2593_v62 = vpack.c.bf16 %v2545_v9, %v2544_v52  ;;  %v1938_v52 = vadd.f32 %v1937_v31, %v5220_v5 }
 0x31e   : > { %3842 = vrcp.f32 %v2356_v18  ;;  %v2357_v25 = vadd.f32 1.0, %v3827_v3  ;;  %v1943_v27 = vpop.f32.mrb[79].mxu1  ;;  %v3829_v14 = vpop.eup %3828 }
 0x31f   : > { %3844 = vtanh.f32 %v1922_v23  ;;  %v3284_v36 = vmul.f32 -1.442695, %v1940_v34  ;;  %v1944_v13 = vadd.f32 %v1943_v27, %v5191_v45  ;;  %3434 = vmatprep.subr.bf16.mxu1 %v2593_v62 }
 0x320   : > { %v3831_v1 = vpop.eup %3830  ;;  %3846 = vrcp.f32 %v2357_v25  ;;  %3435 = vmatpush3.bf16.xpose.msra.mxu1 %v6055_v0 }
 0x321   : > { %v3833_v40 = vpop.eup %3832  ;;  %3848 = vpow2.f32 %v3284_v36  ;;  %v3285_v48 = vmul.f32 -1.442695, %v1944_v13  ;;  %3456 = vmatprep.subr.msk.bf16.mxu1 %vm4846_vm0, %v4850_v4  ;;  %v5460_v44 = vmul.f32 %v3831_v1, %v3829_v14 }
 0x322   : > { %v3835_v37 = vpop.eup %3834 }
 0x323   : > { %v3837_v29 = vpop.eup %3836  ;;  %3850 = vpow2.f32 %v3285_v48  ;;  %v1947_v41 = vpop.f32.mrb[80].mxu1  ;;  %v5463_v10 = vmul.f32 %v3835_v37, %v3833_v40 }
 0x324   : > { %v2358_v12 = vadd.f32 1.0, %v3837_v29  ;;  %v1949_v51 = vpop.f32.mrb[81].mxu1  ;;  %3852 = vtanh.f32 %v1928_v21  ;;  %v1948_v46 = vadd.f32 %v1947_v41, %v5220_v5 }
 0x325   : > { %v3839_v42 = vpop.eup %3838  ;;  %v1950_v63 = vadd.f32 %v1949_v51, %v5191_v45  ;;  %v1951_v49 = vpop.f32.mrb[82].mxu1  ;;  %v2594_v2 = vpack.c.bf16 %v5463_v10, %v5460_v44 }
 0x326   : > { %3854 = vrcp.f32 %v2358_v12  ;;  %v2359_v4 = vadd.f32 1.0, %v3839_v42  ;;  %v1953_v17 = vpop.f32.mrb[83].mxu1  ;;  %v3841_v53 = vpop.eup %3840  ;;  %v1952_v1 = vadd.f32 %v1951_v49, %v5220_v5 }
 0x327   : > { %3856 = vtanh.f32 %v1932_v30  ;;  %v3286_v56 = vmul.f32 -1.442695, %v1950_v63  ;;  %v1954_v15 = vadd.f32 %v1953_v17, %v5191_v45  ;;  %3437 = vmatmul.mubr.bf16.vlgmr.msra.gmra.mrb[128].mxu1 %v5324_v7  ;;  %v1942_v7 = vadd.f32 %v1941_v20, %v5220_v5 }
 0x328   : > { %v3843_v50 = vpop.eup %3842  ;;  %3858 = vrcp.f32 %v2359_v4  ;;  %3457 = vmatpush3.bf16.msk.msra.mxu1 %vm4688_vm3, %v4694_v38 }
 0x329   : > { %v3845_v24 = vpop.eup %3844  ;;  %3860 = vpow2.f32 %v3286_v56  ;;  %v3287_v11 = vmul.f32 -1.442695, %v1954_v15  ;;  %3458 = vmatprep.subr.msk.bf16.mxu1 %vm4864_vm5, %v4869_v28  ;;  %v5477_v22 = vmul.f32 %v3843_v50, %v3841_v53  ;;  %v6056_v53 = vld [vmem:[#allocation30_spill] sm:$0xff]  ;;  %v6058_v50 = vld [vmem:[#allocation36_spill] sm:$0xff] }
 0x32a   : > { %v3847_v23 = vpop.eup %3846 }
 0x32b   : > { %v3849_v9 = vpop.eup %3848  ;;  %3862 = vpow2.f32 %v3287_v11  ;;  %v1957_v18 = vpop.f32.mrb[84].mxu1  ;;  %v5480_v61 = vmul.f32 %v3847_v23, %v3845_v24  ;;  %v6059_v24 = vld [vmem:[#allocation35_spill] sm:$0xff] }
 0x32c   : > { %v2360_v35 = vadd.f32 1.0, %v3849_v9  ;;  %v1959_v38 = vpop.f32.mrb[85].mxu1  ;;  %3459 = vmatpush3.bf16.msk.msra.mxu1 %vm4710_vm6, %v4717_v59  ;;  %3864 = vtanh.f32 %v1938_v52  ;;  %v1958_v32 = vadd.f32 %v1957_v18, %v5220_v5  ;;  %vm6060_vm3 = vnez %v6059_v24 }
 0x32d   : > { %v3851_v31 = vpop.eup %3850  ;;  %v1960_v26 = vadd.f32 %v1959_v38, %v5191_v45  ;;  %v1961_v28 = vpop.f32.mrb[86].mxu1  ;;  %3460 = vmatprep.subr.msk.bf16.mxu1 %vm4882_vm13, %v4886_v47  ;;  %v2595_v3 = vpack.c.bf16 %v5480_v61, %v5477_v22  ;;  %v6061_v38 = vld [vmem:[#allocation32_spill] sm:$0xff] }
 0x32e   : > { %3866 = vrcp.f32 %v2360_v35  ;;  %v2361_v34 = vadd.f32 1.0, %v3851_v31  ;;  %v1963_v20 = vpop.f32.mrb[87].mxu1  ;;  %v3853_v62 = vpop.eup %3852  ;;  %v1962_v49 = vadd.f32 %v1961_v28, %v5220_v5  ;;  %v6062_v31 = vld [vmem:[#allocation31_spill] sm:$0xff] }
 0x32f   : > { %3868 = vtanh.f32 %v1942_v7  ;;  %v3288_v25 = vmul.f32 -1.442695, %v1960_v26  ;;  %v1964_v55 = vadd.f32 %v1963_v20, %v5191_v45  ;;  %vm6063_vm6 = vnez %v6062_v31  ;;  %v6064_v20 = vld [vmem:[#allocation38_spill] sm:$0xff] }
 0x330   : > { %v3855_v59 = vpop.eup %3854  ;;  %3870 = vrcp.f32 %v2361_v34  ;;  %3461 = vmatpush3.bf16.msk.msra.mxu1 %vm4732_vm9, %v4738_v19 }
 0x331   : > { %v3857_v27 = vpop.eup %3856  ;;  %3872 = vpow2.f32 %v3288_v25  ;;  %v3289_v47 = vmul.f32 -1.442695, %v1964_v55  ;;  %3462 = vmatprep.subr.msk.bf16.mxu1 %vm4900_vm4, %v4905_v8  ;;  %v5499_v14 = vmul.f32 %v3855_v59, %v3853_v62  ;;  %v6065_v62 = vld [vmem:[#allocation37_spill] sm:$0xff] }
 0x332   : > { %v3859_v36 = vpop.eup %3858  ;;  %vm6066_vm9 = vnez %v6065_v62 }
 0x333   : > { %v3861_v13 = vpop.eup %3860  ;;  %3874 = vpow2.f32 %v3289_v47  ;;  %v1967_v0 = vpop.f32.mrb[88].mxu1  ;;  %v5502_v40 = vmul.f32 %v3859_v36, %v3857_v27 }
 0x334   : > { %v2362_v16 = vadd.f32 1.0, %v3861_v13  ;;  %v1969_v19 = vpop.f32.mrb[89].mxu1  ;;  %3463 = vmatpush3.bf16.msk.msra.mxu1 %vm4754_vm12, %v4761_v43  ;;  %3876 = vtanh.f32 %v1948_v46  ;;  %v1968_v28 = vadd.f32 %v1967_v0, %v5220_v5  ;;  %v6068_v0 = vld [vmem:[#allocation33_spill] sm:$0xff] }
 0x335   : > { %v3863_v21 = vpop.eup %3862  ;;  %v1970_v6 = vadd.f32 %v1969_v19, %v5191_v45  ;;  %v1971_v8 = vpop.f32.mrb[90].mxu1  ;;  %3464 = vmatprep.subr.msk.bf16.mxu1 %vm4918_vm14, %v4922_v33  ;;  %v2596_v48 = vpack.c.bf16 %v5502_v40, %v5499_v14  ;;  %vm6069_vm12 = vnez %v6068_v0 }
 0x336   : > { %3878 = vrcp.f32 %v2362_v16  ;;  %v2363_v37 = vadd.f32 1.0, %v3863_v21  ;;  %v1973_v29 = vpop.f32.mrb[91].mxu1  ;;  %v3865_v30 = vpop.eup %3864  ;;  %v1972_v27 = vadd.f32 %v1971_v8, %v5220_v5  ;;  %v2611_v16 = vld [vmem:[%s5828_s7] sm:$0x3] }
 0x337   : > { %3880 = vtanh.f32 %v1952_v1  ;;  %v3290_v41 = vmul.f32 -1.442695, %v1970_v6  ;;  %v1974_v39 = vadd.f32 %v1973_v29, %v5191_v45  ;;  %v6067_v1 = vld [vmem:[#allocation34_spill] sm:$0xff]  ;;  %2614 = vperm.xlu0 %3586, %v2611_v16  }
 0x338   : > { %v3867_v43 = vpop.eup %3866  ;;  %3882 = vrcp.f32 %v2363_v37  ;;  %3465 = vmatpush3.bf16.msk.msra.mxu1 %vm4774_vm15, %v4778_v58 }
 0x339   : > { %v3869_v12 = vpop.eup %3868  ;;  %3884 = vpow2.f32 %v3290_v41  ;;  %v3291_v33 = vmul.f32 -1.442695, %v1974_v39  ;;  %3466 = vmatprep.subr.msk.bf16.mxu1 %vm4936_vm10, %v4941_v60  ;;  %v5521_v51 = vmul.f32 %v3867_v43, %v3865_v30 }
 0x33a   : > { %v3871_v42 = vpop.eup %3870 }
 0x33b   : > { %v3873_v63 = vpop.eup %3872  ;;  %3886 = vpow2.f32 %v3291_v33  ;;  %v1977_v4 = vpop.f32.mrb[92].mxu1  ;;  %v5524_v17 = vmul.f32 %v3871_v42, %v3869_v12 }
 0x33c   : > { %v2364_v57 = vadd.f32 1.0, %v3873_v63  ;;  %v1979_v58 = vpop.f32.mrb[93].mxu1  ;;  %3467 = vmatpush3.bf16.msk.msra.mxu1 %vm4792_vm2, %v6056_v53  ;;  %3888 = vtanh.f32 %v1958_v32  ;;  %v1978_v32 = vadd.f32 %v1977_v4, %v5220_v5 }
 0x33d   : > { %v3875_v15 = vpop.eup %3874  ;;  %v1980_v54 = vadd.f32 %v1979_v58, %v5191_v45  ;;  %v1981_v60 = vpop.f32.mrb[94].mxu1  ;;  %3468 = vmatprep.subr.msk.bf16.mxu1 %vm6060_vm3, %v6058_v50  ;;  %v2597_v52 = vpack.c.bf16 %v5524_v17, %v5521_v51 }
 0x33e   : > { %3890 = vrcp.f32 %v2364_v57  ;;  %v2365_v11 = vadd.f32 1.0, %v3875_v15  ;;  %v1983_v23 = vpop.f32.mrb[95].mxu1  ;;  %v3877_v9 = vpop.eup %3876  ;;  %v1982_v57 = vadd.f32 %v1981_v60, %v5220_v5 }
 0x33f   : > { %3892 = vtanh.f32 %v1962_v49  ;;  %v3292_v7 = vmul.f32 -1.442695, %v1980_v54  ;;  %v1984_v18 = vadd.f32 %v1983_v23, %v5191_v45 }
 0x340   : > { %v3879_v35 = vpop.eup %3878  ;;  %3894 = vrcp.f32 %v2365_v11  ;;  %3469 = vmatpush3.bf16.msk.msra.mxu1 %vm6063_vm6, %v6061_v38 }
 0x341   : > { %v3881_v26 = vpop.eup %3880  ;;  %3896 = vpow2.f32 %v3292_v7  ;;  %v3293_v34 = vmul.f32 -1.442695, %v1984_v18  ;;  %3470 = vmatprep.subr.msk.bf16.mxu1 %vm6066_vm9, %v6064_v20  ;;  %v5543_v25 = vmul.f32 %v3879_v35, %v3877_v9 }
 0x342   : > { %v3883_v55 = vpop.eup %3882 }
 0x343   : > { %v3885_v59 = vpop.eup %3884  ;;  %3898 = vpow2.f32 %v3293_v34  ;;  %v1987_v46 = vpop.f32.mrb[96].mxu1  ;;  %v5546_v47 = vmul.f32 %v3883_v55, %v3881_v26 }
 0x344   : > { %v2366_v36 = vadd.f32 1.0, %v3885_v59  ;;  %v1989_v13 = vpop.f32.mrb[97].mxu1  ;;  %3471 = vmatpush3.bf16.msk.msra.mxu1 %vm6069_vm12, %v6067_v1  ;;  %3900 = vtanh.f32 %v1968_v28  ;;  %v1988_v38 = vadd.f32 %v1987_v46, %v5220_v5 }
 0x345   : > { %v3887_v19 = vpop.eup %3886  ;;  %v1990_v21 = vadd.f32 %v1989_v13, %v5191_v45  ;;  %v1991_v6 = vpop.f32.mrb[98].mxu1  ;;  %v2598_v8 = vpack.c.bf16 %v5546_v47, %v5543_v25 }
 0x346   : > { %3902 = vrcp.f32 %v2366_v36  ;;  %v2367_v37 = vadd.f32 1.0, %v3887_v19  ;;  %v1993_v29 = vpop.f32.mrb[99].mxu1  ;;  %v3889_v30 = vpop.eup %3888  ;;  %v1992_v20 = vadd.f32 %v1991_v6, %v5220_v5 }
 0x347   : > { %3904 = vtanh.f32 %v1972_v27  ;;  %v3294_v41 = vmul.f32 -1.442695, %v1990_v21  ;;  %v1994_v39 = vadd.f32 %v1993_v29, %v5191_v45 }
 0x348   : > { %v3891_v43 = vpop.eup %3890  ;;  %3906 = vrcp.f32 %v2367_v37 }
 0x349   : > { %v3893_v12 = vpop.eup %3892  ;;  %3908 = vpow2.f32 %v3294_v41  ;;  %v3295_v33 = vmul.f32 -1.442695, %v1994_v39  ;;  %v5559_v42 = vmul.f32 %v3891_v43, %v3889_v30 }
 0x34a   : > { %v3895_v63 = vpop.eup %3894 }
 0x34b   : > { %v3897_v49 = vpop.eup %3896  ;;  %3910 = vpow2.f32 %v3295_v33  ;;  %v1997_v58 = vpop.f32.mrb[100].mxu1  ;;  %v5562_v53 = vmul.f32 %v3895_v63, %v3893_v12 }
 0x34c   : > { %v2368_v56 = vadd.f32 1.0, %v3897_v49  ;;  %v1999_v15 = vpop.f32.mrb[101].mxu1  ;;  %3912 = vtanh.f32 %v1978_v32  ;;  %v1998_v30 = vadd.f32 %v1997_v58, %v5220_v5 }
 0x34d   : > { %v3899_v54 = vpop.eup %3898  ;;  %v2000_v50 = vadd.f32 %v1999_v15, %v5191_v45  ;;  %v2001_v24 = vpop.f32.mrb[102].mxu1  ;;  %v2599_v4 = vpack.c.bf16 %v5562_v53, %v5559_v42  ;;  %v6070_v42 = vld [vmem:[#allocation56_spill] sm:$0xff] }
 0x34e   : > { %3914 = vrcp.f32 %v2368_v56  ;;  %v2369_v11 = vadd.f32 1.0, %v3899_v54  ;;  %v2003_v23 = vpop.f32.mrb[103].mxu1  ;;  %v3901_v9 = vpop.eup %3900  ;;  %v2002_v32 = vadd.f32 %v2001_v24, %v5220_v5 }
 0x34f   : > { %3916 = vtanh.f32 %v1982_v57  ;;  %v3296_v60 = vmul.f32 -1.442695, %v2000_v50  ;;  %v2004_v7 = vadd.f32 %v2003_v23, %v5191_v45 }
 0x350   : > { %v3903_v18 = vpop.eup %3902  ;;  %3918 = vrcp.f32 %v2369_v11 }
 0x351   : > { %v3905_v35 = vpop.eup %3904  ;;  %3920 = vpow2.f32 %v3296_v60  ;;  %v3297_v31 = vmul.f32 -1.442695, %v2004_v7  ;;  %v5569_v26 = vmul.f32 %v3903_v18, %v3901_v9 }
 0x352   : > { %v3907_v28 = vpop.eup %3906 }
 0x353   : > { %v3909_v34 = vpop.eup %3908  ;;  %3922 = vpow2.f32 %v3297_v31  ;;  %v2007_v62 = vpop.f32.mrb[104].mxu1  ;;  %v5572_v55 = vmul.f32 %v3907_v28, %v3905_v35 }
 0x354   : > { %v2370_v59 = vadd.f32 1.0, %v3909_v34  ;;  %v2009_v27 = vpop.f32.mrb[105].mxu1  ;;  %3924 = vtanh.f32 %v1988_v38  ;;  %v2008_v18 = vadd.f32 %v2007_v62, %v5220_v5 }
 0x355   : > { %v3911_v36 = vpop.eup %3910  ;;  %v2010_v13 = vadd.f32 %v2009_v27, %v5191_v45  ;;  %v2011_v1 = vpop.f32.mrb[106].mxu1  ;;  %v2600_v46 = vpack.c.bf16 %v5572_v55, %v5569_v26  ;;  %v6072_v26 = vld [vmem:[#allocation40_spill] sm:$0xff]  ;;  %v6073_v55 = vld [vmem:[#allocation39_spill] sm:$0xff] }
 0x356   : > { %3926 = vrcp.f32 %v2370_v59  ;;  %v2371_v0 = vadd.f32 1.0, %v3911_v36  ;;  %v2013_v16 = vpop.f32.mrb[107].mxu1  ;;  %v3913_v19 = vpop.eup %3912  ;;  %v2012_v34 = vadd.f32 %v2011_v1, %v5220_v5  ;;  %vm6074_vm15 = vnez %v6073_v55 }
 0x357   : > { %3928 = vtanh.f32 %v1992_v20  ;;  %v3298_v21 = vmul.f32 -1.442695, %v2010_v13  ;;  %v2014_v6 = vadd.f32 %v2013_v16, %v5191_v45 }
 0x358   : > { %v3915_v37 = vpop.eup %3914  ;;  %3930 = vrcp.f32 %v2371_v0 }
 0x359   : > { %v3917_v29 = vpop.eup %3916  ;;  %3932 = vpow2.f32 %v3298_v21  ;;  %v3299_v41 = vmul.f32 -1.442695, %v2014_v6  ;;  %v5579_v39 = vmul.f32 %v3915_v37, %v3913_v19 }
 0x35a   : > { %v3919_v43 = vpop.eup %3918 }
 0x35b   : > { %v3921_v12 = vpop.eup %3920  ;;  %3934 = vpow2.f32 %v3299_v41  ;;  %v2017_v33 = vpop.f32.mrb[108].mxu1  ;;  %v5582_v63 = vmul.f32 %v3919_v43, %v3917_v29 }
 0x35c   : > { %v2372_v49 = vadd.f32 1.0, %v3921_v12  ;;  %v2019_v57 = vpop.f32.mrb[109].mxu1  ;;  %3936 = vtanh.f32 %v1998_v30  ;;  %v2018_v41 = vadd.f32 %v2017_v33, %v5220_v5 }
 0x35d   : > { %v3923_v56 = vpop.eup %3922  ;;  %v2020_v15 = vadd.f32 %v2019_v57, %v5191_v45  ;;  %v2021_v54 = vpop.f32.mrb[110].mxu1  ;;  %v2601_v58 = vpack.c.bf16 %v5582_v63, %v5579_v39  ;;  %v6079_v39 = vld [vmem:[#allocation41_spill] sm:$0xff]  ;;  %v6081_v63 = vld [vmem:[#allocation60_spill] sm:$0xff] }
 0x35e   : > { %3938 = vrcp.f32 %v2372_v49  ;;  %v2373_v50 = vadd.f32 1.0, %v3923_v56  ;;  %v2023_v11 = vpop.f32.mrb[111].mxu1  ;;  %v3925_v23 = vpop.eup %3924  ;;  %v2022_v57 = vadd.f32 %v2021_v54, %v5220_v5  ;;  %vm6080_vm0 = vnez %v6079_v39 }
 0x35f   : > { %3940 = vtanh.f32 %v2002_v32  ;;  %v3300_v24 = vmul.f32 -1.442695, %v2020_v15  ;;  %v2024_v9 = vadd.f32 %v2023_v11, %v5191_v45 }
 0x360   : > { %v3927_v60 = vpop.eup %3926  ;;  %3942 = vrcp.f32 %v2373_v50 }
 0x361   : > { %v3929_v7 = vpop.eup %3928  ;;  %3944 = vpow2.f32 %v3300_v24  ;;  %v3301_v35 = vmul.f32 -1.442695, %v2024_v9  ;;  %v2562_v38 = vmul.f32 %v3927_v60, %v3925_v23 }
 0x362   : > { %v3931_v31 = vpop.eup %3930 }
 0x363   : > { %v3933_v28 = vpop.eup %3932  ;;  %3946 = vpow2.f32 %v3301_v35  ;;  %v2027_v20 = vpop.f32.mrb[112].mxu1  ;;  %v2563_v59 = vmul.f32 %v3931_v31, %v3929_v7 }
 0x364   : > { %v2374_v27 = vadd.f32 1.0, %v3933_v28  ;;  %v2029_v36 = vpop.f32.mrb[113].mxu1  ;;  %3948 = vtanh.f32 %v2008_v18  ;;  %v2028_v35 = vadd.f32 %v2027_v20, %v5220_v5 }
 0x365   : > { %v3935_v13 = vpop.eup %3934  ;;  %v2030_v0 = vadd.f32 %v2029_v36, %v5191_v45  ;;  %v2031_v16 = vpop.f32.mrb[114].mxu1  ;;  %v2602_v19 = vpack.c.bf16 %v2563_v59, %v2562_v38 }
 0x366   : > { %3950 = vrcp.f32 %v2374_v27  ;;  %v2375_v62 = vadd.f32 1.0, %v3935_v13  ;;  %v2033_v21 = vpop.f32.mrb[115].mxu1  ;;  %v3937_v6 = vpop.eup %3936  ;;  %v2032_v59 = vadd.f32 %v2031_v16, %v5220_v5 }
 0x367   : > { %3952 = vtanh.f32 %v2012_v34  ;;  %v3302_v37 = vmul.f32 -1.442695, %v2030_v0  ;;  %v2034_v29 = vadd.f32 %v2033_v21, %v5191_v45  ;;  %3438 = vmatprep.subr.bf16.mxu0 %v2602_v19 }
 0x368   : > { %v3939_v1 = vpop.eup %3938  ;;  %3954 = vrcp.f32 %v2375_v62  ;;  %3439 = vmatpush3.bf16.xpose.msra.mxu0 %v2594_v2 }
 0x369   : > { %v3941_v30 = vpop.eup %3940  ;;  %3956 = vpow2.f32 %v3302_v37  ;;  %v3303_v43 = vmul.f32 -1.442695, %v2034_v29  ;;  %v2564_v12 = vmul.f32 %v3939_v1, %v3937_v6 }
 0x36a   : > { %v3943_v32 = vpop.eup %3942 }
 0x36b   : > { %v3945_v49 = vpop.eup %3944  ;;  %3958 = vpow2.f32 %v3303_v43  ;;  %v2037_v56 = vpop.f32.mrb[116].mxu1  ;;  %v2565_v15 = vmul.f32 %v3943_v32, %v3941_v30 }
 0x36c   : > { %v2376_v50 = vadd.f32 1.0, %v3945_v49  ;;  %v2039_v11 = vpop.f32.mrb[117].mxu1  ;;  %3960 = vtanh.f32 %v2018_v41  ;;  %v2038_v1 = vadd.f32 %v2037_v56, %v5220_v5 }
 0x36d   : > { %v3947_v23 = vpop.eup %3946  ;;  %v2040_v44 = vadd.f32 %v2039_v11, %v5191_v45  ;;  %v2041_v10 = vpop.f32.mrb[118].mxu1  ;;  %v2603_v2 = vpack.c.bf16 %v2565_v15, %v2564_v12 }
 0x36e   : > { %3962 = vrcp.f32 %v2376_v50  ;;  %v2377_v33 = vadd.f32 1.0, %v3947_v23  ;;  %v2043_v24 = vpop.f32.mrb[119].mxu1  ;;  %v3949_v9 = vpop.eup %3948  ;;  %v2042_v32 = vadd.f32 %v2041_v10, %v5220_v5 }
 0x36f   : > { %3964 = vtanh.f32 %v2022_v57  ;;  %v3304_v60 = vmul.f32 -1.442695, %v2040_v44  ;;  %v2044_v7 = vadd.f32 %v2043_v24, %v5191_v45  ;;  %3440 = vmatprep.subr.bf16.mxu0 %v2603_v2 }
 0x370   : > { %v3951_v54 = vpop.eup %3950  ;;  %3966 = vrcp.f32 %v2377_v33  ;;  %3441 = vmatpush3.bf16.xpose.msra.mxu0 %v2595_v3 }
 0x371   : > { %v3953_v18 = vpop.eup %3952  ;;  %3968 = vpow2.f32 %v3304_v60  ;;  %v3305_v38 = vmul.f32 -1.442695, %v2044_v7  ;;  %v2566_v31 = vmul.f32 %v3951_v54, %v3949_v9 }
 0x372   : > { %v3955_v28 = vpop.eup %3954 }
 0x373   : > { %v3957_v34 = vpop.eup %3956  ;;  %3970 = vpow2.f32 %v3305_v38  ;;  %v2047_v27 = vpop.f32.mrb[120].mxu1  ;;  %v2567_v36 = vmul.f32 %v3955_v28, %v3953_v18 }
 0x374   : > { %v2378_v13 = vadd.f32 1.0, %v3957_v34  ;;  %v2049_v0 = vpop.f32.mrb[121].mxu1  ;;  %3972 = vtanh.f32 %v2028_v35  ;;  %v2048_v9 = vadd.f32 %v2047_v27, %v5220_v5 }
 0x375   : > { %v3959_v19 = vpop.eup %3958  ;;  %v2050_v22 = vadd.f32 %v2049_v0, %v5191_v45  ;;  %v2051_v61 = vpop.f32.mrb[122].mxu1  ;;  %v2604_v3 = vpack.c.bf16 %v2567_v36, %v2566_v31 }
 0x376   : > { %3974 = vrcp.f32 %v2378_v13  ;;  %v2379_v20 = vadd.f32 1.0, %v3959_v19  ;;  %v2053_v62 = vpop.f32.mrb[123].mxu1  ;;  %v3961_v21 = vpop.eup %3960  ;;  %v2052_v35 = vadd.f32 %v2051_v61, %v5220_v5 }
 0x377   : > { %3976 = vtanh.f32 %v2032_v59  ;;  %v3306_v6 = vmul.f32 -1.442695, %v2050_v22  ;;  %v2054_v37 = vadd.f32 %v2053_v62, %v5191_v45  ;;  %3442 = vmatprep.subr.bf16.mxu0 %v2604_v3 }
 0x378   : > { %v3963_v16 = vpop.eup %3962  ;;  %3978 = vrcp.f32 %v2379_v20  ;;  %3443 = vmatpush3.bf16.xpose.msra.mxu0 %v2596_v48 }
 0x379   : > { %v3965_v29 = vpop.eup %3964  ;;  %3980 = vpow2.f32 %v3306_v6  ;;  %v3307_v30 = vmul.f32 -1.442695, %v2054_v37  ;;  %v2568_v41 = vmul.f32 %v3963_v16, %v3961_v21 }
 0x37a   : > { %v3967_v43 = vpop.eup %3966 }
 0x37b   : > { %v3969_v12 = vpop.eup %3968  ;;  %3982 = vpow2.f32 %v3307_v30  ;;  %v2057_v49 = vpop.f32.mrb[124].mxu1  ;;  %v2569_v57 = vmul.f32 %v3967_v43, %v3965_v29 }
 0x37c   : > { %v2380_v15 = vadd.f32 1.0, %v3969_v12  ;;  %v2059_v50 = vpop.f32.mrb[125].mxu1  ;;  %3984 = vtanh.f32 %v2038_v1  ;;  %v2058_v59 = vadd.f32 %v2057_v49, %v5220_v5  ;;  %v6076_v12 = vld [vmem:[#allocation57_spill] sm:$0xff]  ;;  %v6084_v49 = vld [vmem:[#allocation44_spill] sm:$0xff] }
 0x37d   : > { %v3971_v11 = vpop.eup %3970  ;;  %v2060_v14 = vadd.f32 %v2059_v50, %v5191_v45  ;;  %v2061_v40 = vpop.f32.mrb[126].mxu1  ;;  %v2605_v48 = vpack.c.bf16 %v2569_v57, %v2568_v41  ;;  %vm6077_vm2 = vnez %v6076_v12  ;;  %v6085_v57 = vld [vmem:[#allocation43_spill] sm:$0xff]  ;;  %v6088_v50 = vld [vmem:[#allocation61_spill] sm:$0xff] }
 0x37e   : > { %3986 = vrcp.f32 %v2380_v15  ;;  %v2381_v56 = vadd.f32 1.0, %v3971_v11  ;;  %v2063_v23 = vpop.f32.mrb[127].mxu1  ;;  %v3973_v44 = vpop.eup %3972  ;;  %v2062_v0 = vadd.f32 %v2061_v40, %v5220_v5  ;;  %vm6086_vm5 = vnez %v6085_v57  ;;  %v6087_v15 = vld [vmem:[#allocation62_spill] sm:$0xff]  ;;  %v6093_v40 = vld [vmem:[#allocation64_spill] sm:$0xff] }
 0x37f   : > { %3988 = vtanh.f32 %v2042_v32  ;;  %v3308_v2 = vmul.f32 -1.442695, %v2060_v14  ;;  %v2064_v33 = vadd.f32 %v2063_v23, %v5191_v45  ;;  %3444 = vmatprep.subr.bf16.mxu0 %v2605_v48  ;;  %v6078_v32 = vld [vmem:[#allocation42_spill] sm:$0xff]  ;;  %vm6089_vm13 = vnez %v6088_v50  ;;  %v6091_v14 = vld [vmem:[#allocation45_spill] sm:$0xff]  ;;  %v6094_v48 = vld [vmem:[#allocation63_spill] sm:$0xff] }
 0x380   : > { %v3975_v10 = vpop.eup %3974  ;;  %3990 = vrcp.f32 %v2381_v56  ;;  %3445 = vmatpush3.bf16.xpose.msra.mxu0 %v2597_v52  ;;  %v6090_v11 = vld [vmem:[#allocation46_spill] sm:$0xff]  ;;  %vm6092_vm4 = vnez %v6091_v14  ;;  %vm6095_vm14 = vnez %v6094_v48  ;;  %v6096_v56 = vld [vmem:[#allocation48_spill] sm:$0xff]  ;;  %v6097_v23 = vld [vmem:[#allocation47_spill] sm:$0xff] }
 0x381   : > { %v3977_v24 = vpop.eup %3976  ;;  %3992 = vpow2.f32 %v3308_v2  ;;  %v3309_v60 = vmul.f32 -1.442695, %v2064_v33  ;;  %v2570_v7 = vmul.f32 %v3975_v10, %v3973_v44  ;;  %vm6098_vm10 = vnez %v6097_v23  ;;  %v6099_v44 = vld [vmem:[#allocation66_spill] sm:$0xff]  ;;  %v6100_v2 = vld [vmem:[#allocation65_spill] sm:$0xff] }
 0x382   : > { %v3979_v54 = vpop.eup %3978  ;;  %vm6101_vm1 = vnez %v6100_v2  ;;  %v6102_v33 = vld [vmem:[#allocation50_spill] sm:$0xff]  ;;  %v6103_v10 = vld [vmem:[#allocation49_spill] sm:$0xff] }
 0x383   : > { %v3981_v18 = vpop.eup %3980  ;;  %3994 = vpow2.f32 %v3309_v60  ;;  %v2571_v38 = vmul.f32 %v3979_v54, %v3977_v24  ;;  %vm6104_vm8 = vnez %v6103_v10  ;;  %v6105_v24 = vld [vmem:[#allocation68_spill] sm:$0xff]  ;;  %v6111_v54 = vld [vmem:[#allocation70_spill] sm:$0xff] }
 0x384   : > { %v2382_v45 = vadd.f32 1.0, %v3981_v18  ;;  %3996 = vtanh.f32 %v2048_v9  ;;  %v6106_v9 = vld [vmem:[#allocation67_spill] sm:$0xff]  ;;  %v6108_v60 = vld [vmem:[#allocation52_spill] sm:$0xff]  ;;  %v2739_v50 = vld [vmem:[#allocation2] sm:$0x3] }
 0x385   : > { %v3983_v31 = vpop.eup %3982  ;;  %v2606_v28 = vpack.c.bf16 %v2571_v38, %v2570_v7  ;;  %vm6107_vm3 = vnez %v6106_v9  ;;  %v6109_v7 = vld [vmem:[#allocation51_spill] sm:$0xff]  ;;  %v6114_v38 = vld [vmem:[#allocation53_spill] sm:$0xff] }
 0x386   : > { %3998 = vrcp.f32 %v2382_v45  ;;  %v2383_v34 = vadd.f32 1.0, %v3983_v31  ;;  %v3985_v51 = vpop.eup %3984  ;;  %vm6110_vm6 = vnez %v6109_v7  ;;  %vm6115_vm9 = vnez %v6114_v38 }
 0x387   : > { %4000 = vtanh.f32 %v2052_v35  ;;  %3446 = vmatprep.subr.bf16.mxu0 %v2606_v28  ;;  %v6113_v35 = vld [vmem:[#allocation54_spill] sm:$0xff] }
 0x388   : > { %v3987_v17 = vpop.eup %3986  ;;  %4002 = vrcp.f32 %v2383_v34  ;;  %3447 = vmatpush3.bf16.xpose.msra.mxu0 %v2598_v8 }
 0x389   : > { %v3989_v52 = vpop.eup %3988  ;;  %v2572_v27 = vmul.f32 %v3987_v17, %v3985_v51  ;;  %4004 = vtanh.f32 %v2058_v59 }
 0x38a   : > { %v3991_v36 = vpop.eup %3990 }
 0x38b   : > { %v3993_v13 = vpop.eup %3992  ;;  %v2573_v19 = vmul.f32 %v3991_v36, %v3989_v52 }
 0x38c   : > { %v2384_v22 = vadd.f32 1.0, %v3993_v13 }
 0x38d   : > { %v3995_v61 = vpop.eup %3994  ;;  %v2607_v3 = vpack.c.bf16 %v2573_v19, %v2572_v27  ;;  %v6116_v27 = vlaneseq }
 0x38e   : > { %4006 = vrcp.f32 %v2384_v22  ;;  %v2385_v20 = vadd.f32 1.0, %v3995_v61  ;;  %v3997_v62 = vpop.eup %3996  ;;  %v6117_v22 = vld [vmem:[#allocation27_spill] sm:$0xff] }
 0x38f   : > { %4008 = vtanh.f32 %v2062_v0  ;;  %3448 = vmatprep.subr.bf16.mxu0 %v2607_v3  ;;  %v2723_v36 = vand.u32 127, %v6116_v27  ;;  %v4259_v0 = vmov 1983009808  }
 0x390   : > { %v3999_v25 = vpop.eup %3998  ;;  %4010 = vrcp.f32 %v2385_v20  ;;  %3449 = vmatpush3.bf16.xpose.msra.mxu0 %v2599_v4  ;;  %v4023_v4 = vld [vmem:[%s5827_s6] sm:$0x1]  ;;  %v2706_v19 = vunpack.c.l.s4 %v4259_v0  ;;  %v2771_v0 = vld [vmem:[#allocation3] sm:$0x3] }
 0x391   : > { %v4001_v47 = vpop.eup %4000  ;;  %v2574_v8 = vmul.f32 %v3999_v25, %v3997_v62  ;;  %v2724_v13 = vadd.s32 128, %v2723_v36  ;;  %v2727_v3 = vadd.s32 %v2723_v36, %v6117_v22  ;;  %v2725_v20 = vadd.s32 256, %v2723_v36 }
 0x392   : > { %v4003_v21 = vpop.eup %4002  ;;  %v2726_v62 = vadd.s32 384, %v2723_v36  ;;  %v2707_v25 = vunpack.c.0.s8 %v2706_v19 }
 0x393   : > { %v2575_v5 = vmul.f32 %v4003_v21, %v4001_v47  ;;  %v4005_v37 = vpop.eup %4004  ;;  %v2728_v61 = vadd.s32 %v2724_v13, %v6117_v22  ;;  %v6118_v47 = vld [vmem:[#allocation28_spill] sm:$0xff] }
 0x394   : > { %vm2731_vm12 = vcmp.lt.s32.totalorder %v2727_v3, %v6118_v47  ;;  %v2730_v21 = vadd.s32 %v2726_v62, %v6117_v22 }
 0x395   : > { %v2608_v6 = vpack.c.bf16 %v2575_v5, %v2574_v8  ;;  %v2729_v8 = vadd.s32 %v2725_v20, %v6117_v22 }
 0x397   : > { %3450 = vmatprep.subr.bf16.mxu0 %v2608_v6 }
 0x398   : > { %v4007_v16 = vpop.eup %4006  ;;  %3451 = vmatpush3.bf16.xpose.msra.mxu0 %v2600_v46  ;;  %v6075_v46 = vld [vmem:[#allocation58_spill] sm:$0xff] }
 0x399   : > { %v4009_v29 = vpop.eup %4008  ;;  %v2576_v1 = vmul.f32 %v4007_v16, %v4005_v37  ;;  %v6119_v37 = vld [vmem:[#allocation26_spill] sm:$0xff] }
 0x39a   : > { %v4011_v30 = vpop.eup %4010  ;;  %v2710_v16 = vsub.s32 %v2707_v25, %v6119_v37 }
 0x39b   : > { %v2577_v41 = vmul.f32 %v4011_v30, %v4009_v29 }
 0x39d   : > { %v2609_v43 = vpack.c.bf16 %v2577_v41, %v2576_v1 }
 0x39f   : > { %3452 = vmatprep.subr.bf16.mxu0 %v2609_v43 }
 0x3a0   : > { %3453 = vmatpush3.bf16.xpose.msra.mxu0 %v2601_v58  ;;  %v6082_v58 = vld [vmem:[#allocation59_spill] sm:$0xff] }
 0x3a1   : > { %3478 = vmatprep.subr.msk.bf16.mxu0 %vm5134_vm11, %v6070_v42  ;;  %vm6083_vm11 = vnez %v6082_v58 }
 0x3a7   : > { %3455 = vmatmul.mubr.bf16.vlgmr.msra.gmra.mrb[128].mxu0 %v4023_v4 }
 0x3a8   : > { %3479 = vmatpush3.bf16.msk.msra.mxu0 %vm6074_vm15, %v6072_v26  ;;  %vm2740_vm15 = vcmask 1041408  }
 0x3a9   : > { %3480 = vmatprep.subr.msk.bf16.mxu0 %vm6077_vm2, %v6075_v46  ;;  %vm2733_vm2 = vcmp.lt.s32.totalorder %v2729_v8, %v6118_v47 }
 0x3ac   : > { %3481 = vmatpush3.bf16.msk.msra.mxu0 %vm6080_vm0, %v6078_v32  ;;  %vm2734_vm0 = vcmp.lt.s32.totalorder %v2730_v21, %v6118_v47  ;;  %v2785_v21 = vld [vmem:[#allocation4] sm:$0x3] }
 0x3ad   : > { %3482 = vmatprep.subr.msk.bf16.mxu0 %vm6083_vm11, %v6081_v63  ;;  %vm2783_vm11 = vcmask 1024  }
 0x3b0   : > { %3483 = vmatpush3.bf16.msk.msra.mxu0 %vm6086_vm5, %v6084_v49 }
 0x3b1   : > { %3484 = vmatprep.subr.msk.bf16.mxu0 %vm6089_vm13, %v6087_v15 }
 0x3b4   : > { %3485 = vmatpush3.bf16.msk.msra.mxu0 %vm6092_vm4, %v6090_v11 }
 0x3b5   : > { %3486 = vmatprep.subr.msk.bf16.mxu0 %vm6095_vm14, %v6093_v40  ;;  %vm2933_vm14 = vcmask (!%p3406_p10), 0  }
 0x3b6   : > { %v2615_v31 = vpop.permute.xlu0 %2614 }
 0x3b8   : > { %3487 = vmatpush3.bf16.msk.msra.mxu0 %vm6098_vm10, %v6096_v56 }
 0x3b9   : > { %3488 = vmatprep.subr.msk.bf16.mxu0 %vm6101_vm1, %v6099_v44 }
 0x3bc   : > { %3489 = vmatpush3.bf16.msk.msra.mxu0 %vm6104_vm8, %v6102_v33 }
 0x3bd   : > { %3490 = vmatprep.subr.msk.bf16.mxu0 %vm6107_vm3, %v6105_v24 }
 0x3c0   : > { %3491 = vmatpush3.bf16.msk.msra.mxu0 %vm6110_vm6, %v6108_v60 }
 0x3c1   : > { %3492 = vmatprep.subr.msk.bf16.mxu0 %vm5309_vm7, %v6111_v54  ;;  %vm2732_vm7 = vcmp.lt.s32.totalorder %v2728_v61, %v6118_v47 }
 0x3c4   : > { %3493 = vmatpush3.bf16.msk.msra.mxu0 %vm6115_vm9, %v6113_v35 }
 0x3fa   : > { %v2651_v45 = vpop.f32.mrb[128].mxu1 }
 0x3fb   : > { %v2652_v28 = vadd.f32 %v2651_v45, %v2615_v31  ;;  %v2653_v34 = vpop.f32.mrb[129].mxu1 }
 0x3fc   : > { %v2654_v51 = vadd.f32 %v2653_v34, %v2615_v31  ;;  %v2655_v17 = vpop.f32.mrb[130].mxu1 }
 0x3fd   : > { %v2656_v52 = vpop.f32.mrb[131].mxu1  ;;  %v2735_v6 = vsel %vm2731_vm12, %v2652_v28, -1e+30 }
 0x3fe   : > { %v2703_v59 = vcombine.low %v2652_v28, %v2654_v51  ;;  %v2736_v5 = vsel %vm2732_vm7, %v2654_v51, -1e+30  ;;  %v2741_v43 = vsel %vm2740_vm15, %v2735_v6, -inf }
 0x3ff   : > { %v2742_v1 = vsel %vm2740_vm15, %v2736_v5, -inf }
 0x400   : > { %v2711_v4 = vrot.slane %v2703_v59, %v2710_v16  ;;  %v2745_v39 = vmax.f32 %v2741_v43, %v2742_v1 }
 0x47a   : > { %v2692_v29 = vpop.f32.mrb[128].mxu0 }
 0x47b   : > { %v2693_v30 = vadd.f32 %v2692_v29, %v2615_v31  ;;  %v2694_v41 = vpop.f32.mrb[129].mxu0 }
 0x47c   : > { %v2695_v42 = vadd.f32 %v2694_v41, %v2615_v31  ;;  %v2696_v53 = vpop.f32.mrb[130].mxu0 }
 0x47d   : > { %v2737_v26 = vsel %vm2733_vm2, %v2693_v30, -1e+30  ;;  %v2697_v55 = vpop.f32.mrb[131].mxu0 }
 0x47e   : > { %v2704_v46 = vcombine.low %v2693_v30, %v2695_v42  ;;  %v2738_v12 = vsel %vm2734_vm0, %v2695_v42, -1e+30  ;;  %v2743_v32 = vsel %vm2740_vm15, %v2737_v26, -inf  ;;  %v4260_v42 = vmov (!%p3406_p10), 0   ;;  %v2893_v55 = vld [vmem:[%s5829_s8] sm:$0x3] (!%p3406_p10) }
 0x47f   : > { %v2744_v63 = vsel %vm2740_vm15, %v2738_v12, -inf }
 0x480   : > { %v2718_v58 = vrot.slane %v2704_v46, %v2710_v16  ;;  %v2746_v49 = vmax.f32 %v2743_v32, %v2744_v63 }
 0x482   : > { %v2719_v57 = vcombine.low %v2711_v4, %v2718_v58  ;;  %v2747_v15 = vmax.f32 %v2745_v39, %v2746_v49  ;;  %v2898_v39 = vld [vmem:[%s5830_s9] sm:$0x3] (!%p3406_p10) }
 0x484   : > { %2721 = vst [vmem:[%s4527_s27] sm:$0xff] %v2719_v57  ;;  %2748 = vmax.xlane.f32.xlu0 %v2747_v15 }
 0x511   : > { %v2749_v11 = vpop.xlane.xlu0 %2748 }
 0x512   : > { %v2750_v14 = vmax.f32 %v2739_v50, %v2749_v11 }
 0x514   : > { %v2751_v40 = vsub.f32 %v2739_v50, %v2750_v14  ;;  %2878 = vst.msk [vmem:[#allocation2] sm:$0x3] %vm2783_vm11, %v2750_v14  ;;  %2756 = vperm.xlu1 %3587, %v2750_v14  }
 0x516   : > { %v2752_v48 = vmul.f32 1.442695, %v2751_v40 }
 0x518   : > { %4012 = vpow2.f32 %v2752_v48 }
 0x522   : > { %v4013_v56 = vpop.eup %4012 }
 0x523   : > { %2788 = vperm.xlu0 %3586, %v4013_v56   ;;  %v2772_v19 = vmul.f32 %v4013_v56, %v2771_v0  ;;  %v6120_v56 = vld [vmem:[#allocation26_spill] sm:$0xff] (!%p3406_p10) }
 0x527   : > { %4024 = vset.pattern.permute.xlu0 (!%p3406_p10), %v4260_v42 }
 0x593   : > { %v2757_v23 = vpop.permute.xlu1 %2756 }
 0x594   : > { %v2759_v44 = vsub.f32 %v2735_v6, %v2757_v23  ;;  %v2760_v2 = vsub.f32 %v2736_v5, %v2757_v23  ;;  %v2761_v33 = vsub.f32 %v2737_v26, %v2757_v23  ;;  %v2762_v10 = vsub.f32 %v2738_v12, %v2757_v23 }
 0x596   : > { %v2763_v24 = vmul.f32 1.442695, %v2759_v44  ;;  %v2765_v9 = vmul.f32 1.442695, %v2760_v2  ;;  %v2767_v60 = vmul.f32 1.442695, %v2761_v33 }
 0x597   : > { %v2769_v7 = vmul.f32 1.442695, %v2762_v10 }
 0x598   : > { %4014 = vpow2.f32 %v2763_v24 }
 0x599   : > { %4016 = vpow2.f32 %v2765_v9 }
 0x59a   : > { %4018 = vpow2.f32 %v2767_v60 }
 0x59b   : > { %4020 = vpow2.f32 %v2769_v7 }
 0x5a2   : > { %v4015_v54 = vpop.eup %4014  ;;  %v2789_v20 = vpop.permute.xlu0 %2788 }
 0x5a3   : > { %v4017_v18 = vpop.eup %4016  ;;  %v2792_v35 = vpack.c.bf16 %v4015_v54, %v4015_v54  ;;  %v2773_v38 = vsel %vm2740_vm15, %v4015_v54, 0.0  ;;  %v2791_v1 = vmul.f32 %v2789_v20, %v2785_v21 }
 0x5a4   : > { %v4019_v45 = vpop.eup %4018  ;;  %v2793_v31 = vpack.c.bf16 %v4017_v18, %v4017_v18  ;;  %v2774_v28 = vsel %vm2740_vm15, %v4017_v18, 0.0 }
 0x5a5   : > { %v4021_v34 = vpop.eup %4020  ;;  %v2794_v51 = vpack.c.bf16 %v4019_v45, %v4019_v45  ;;  %v2775_v17 = vadd.f32 %v2774_v28, %v2773_v38  ;;  %v2776_v59 = vsel %vm2740_vm15, %v4019_v45, 0.0 }
 0x5a6   : > { %2828 = vmatprep.mubr.bf16.mxu1 %v2793_v31  ;;  %v2795_v52 = vpack.c.bf16 %v4021_v34, %v4021_v34  ;;  %v2778_v36 = vsel %vm2740_vm15, %v4021_v34, 0.0 }
 0x5a7   : > { %2829 = vmatmul.mubr.bf16.vlgmr.msra.gmra.mrb[132].mxu1 %v2792_v35  ;;  %v2777_v27 = vadd.f32 %v2776_v59, %v2775_v17 }
 0x5a8   : > { %2868 = vmatprep.mubr.bf16.mxu0 %v2795_v52 }
 0x5a9   : > { %2869 = vmatmul.mubr.bf16.vlgmr.msra.gmra.mrb[132].mxu0 %v2794_v51  ;;  %v2779_v13 = vadd.f32 %v2778_v36, %v2777_v27 }
 0x5ab   : > { %2780 = vadd.xlane.f32.xlu1 %v2779_v13 }
 0x638   : > { %v2781_v22 = vpop.xlane.xlu1 %2780 }
 0x639   : > { %v2782_v61 = vadd.f32 %v2781_v22, %v2772_v19 }
 0x63b   : > { %2784 = vst.msk [vmem:[#allocation3] sm:$0x3] %vm2783_vm11, %v2782_v61 }
 0x642   : > { %v2884_v43 = vld [vmem:[#allocation3] sm:$0x3] (!%p3406_p10) }
 0x643   : > { %2887 = vperm.xlu0 (!%p3406_p10), %4024, %v2884_v43  }
 0x67a   : > { %v3472_v3 = vpop.f32.mrb[132].mxu1 }
 0x67b   : > { %v3473_v62 = vpop.f32.mrb[133].mxu1 }
 0x67c   : > { %v3494_v25 = vpop.f32.mrb[132].mxu0  ;;  %v3474_v47 = vadd.f32 %v3473_v62, %v3472_v3  ;;  %v3475_v8 = vpop.f32.mrb[134].mxu1 }
 0x67d   : > { %v3495_v5 = vpop.f32.mrb[133].mxu0  ;;  %v3476_v6 = vpop.f32.mrb[135].mxu1 }
 0x67e   : > { %v3496_v37 = vadd.f32 %v3495_v5, %v3494_v25  ;;  %v3497_v16 = vpop.f32.mrb[134].mxu0  ;;  %2882 = sbr.rel (%p3406_p10) target bundleno = 1946 (0x79a), region = 76 }
 0x67f   : > { %v3498_v29 = vpop.f32.mrb[135].mxu0 }
 0x680   : > { %v2871_v30 = vadd.f32 %v3496_v37, %v3474_v47 }
 0x682   : > { %v2876_v41 = vadd.f32 %v2871_v30, %v2791_v1 }
 0x684   : > { %2877 = vst [vmem:[#allocation4] sm:$0x3] %v2876_v41 }
 0x68b   : > { %v2883_v4 = vld [vmem:[#allocation4] sm:$0x3] }
 0x6c2   : > { %v2888_v53 = vpop.permute.xlu0 %2887 }
 0x6c3   : > { %4025 = vrcp.f32 %v2888_v53 }
 0x6cd   : > { %v4026_v26 = vpop.eup %4025 }
 0x6ce   : > { %v2891_v46 = vmul.f32 %v4026_v26, %v2883_v4 }
 0x6d0   : > { %v2894_v12 = vmul.f32 %v2893_v55, %v2891_v46  ;;  %2892 = vst [vmem:[#allocation16] sm:$0x3] %v2891_v46 }
 0x6d2   : > { %v2895_v32 = vsel %vm2740_vm15, %v2894_v12, 0.0 }
 0x6d3   : > { %2896 = vadd.xlane.f32.xlu0 %v2895_v32 }
 0x760   : > { %v2897_v63 = vpop.xlane.xlu0 %2896 }
 0x761   : > { %v2899_v58 = vadd.f32 %v2898_v39, %v2897_v63 }
 0x763   : > { %2900 = vst.msk [vmem:[%s5831_s10] sm:$0x3] %vm2783_vm11, %v2899_v58  ;;  %v2901_v49 = vsel %vm2783_vm11, %v2899_v58, -inf }
 0x764   : > { %v2902_v57 = vrot.slane %v2901_v49, 4 }
 0x766   : > { %v2903_v15 = vmax.f32 %v2901_v49, %v2902_v57 }
 0x768   : > { %v2904_v50 = vrot.slane %v2903_v15, 2 }
 0x76a   : > { %v2905_v11 = vmax.f32 %v2903_v15, %v2904_v50 }
 0x76c   : > { %v2906_v14 = vrot.slane %v2905_v11, 1 }
 0x76e   : > { %v2907_v40 = vmax.f32 %v2905_v11, %v2906_v14 }
 0x770   : > { %v2908_v48 = vsub.f32 %v2899_v58, %v2907_v40  ;;  %vm2921_vm5 = vcmp.eq.f32.partialorder %v2899_v58, %v2907_v40 }
 0x771   : > { %v2922_v23 = vsel %vm2921_vm5, %v6120_v56, 2 }
 0x772   : > { %v2909_v44 = vmul.f32 1.442695, %v2908_v48  ;;  %v2923_v2 = vsel %vm2783_vm11, %v2922_v23, 2147483647 }
 0x773   : > { %v2924_v33 = vrot.slane %v2923_v2, 4 }
 0x774   : > { %4027 = vpow2.f32 %v2909_v44 }
 0x775   : > { %vm2925_vm13 = vcmp.lt.s32.totalorder %v2923_v2, %v2924_v33 }
 0x776   : > { %v2926_v10 = vsel %vm2925_vm13, %v2923_v2, %v2924_v33 }
 0x777   : > { %v2927_v24 = vrot.slane %v2926_v10, 2 }
 0x779   : > { %vm2928_vm4 = vcmp.lt.s32.totalorder %v2926_v10, %v2927_v24 }
 0x77a   : > { %v2929_v9 = vsel %vm2928_vm4, %v2926_v10, %v2927_v24 }
 0x77b   : > { %v2930_v60 = vrot.slane %v2929_v9, 1 }
 0x77d   : > { %vm2931_vm10 = vcmp.lt.s32.totalorder %v2929_v9, %v2930_v60 }
 0x77e   : > { %v4028_v7 = vpop.eup %4027  ;;  %v2932_v54 = vsel %vm2931_vm10, %v2929_v9, %v2930_v60 }
 0x77f   : > { %v2911_v18 = vsel %vm2783_vm11, %v4028_v7, 0.0  ;;  %2934 = vst.msk [vmem:[#allocation13] sm:$0x1] %vm2933_vm14, %v2932_v54 }
 0x780   : > { %v2912_v35 = vrot.slane %v2911_v18, 4 }
 0x782   : > { %v2913_v38 = vadd.f32 %v2912_v35, %v2911_v18 }
 0x784   : > { %v2914_v45 = vrot.slane %v2913_v38, 2 }
 0x786   : > { %v2915_v31 = vadd.f32 %v2914_v45, %v2913_v38 }
 0x788   : > { %v2916_v28 = vrot.slane %v2915_v31, 1 }
 0x78a   : > { %v2917_v34 = vadd.f32 %v2916_v28, %v2915_v31 }
 0x78c   : > { %4029 = vrcp.f32 %v2917_v34 }
 0x796   : > { %v4030_v51 = vpop.eup %4029 }
 0x797   : > { %v2919_v17 = vmul.f32 %v4030_v51, %v4028_v7 }
 0x799   : > { %2920 = vst.msk [vmem:[%s6121_s29] sm:$0x3] %vm2783_vm11, %v2919_v17 }
 0x79a PF: > { %s6122_s24 = sld [smem:[#allocation24_spill]]  ;;  %s2935_s21 = sand.u32 1, %s4361_s0  }
 0x79b   : > { %s3419_s30 = sshll.u32 %s4361_s0, 7  ;;  %s6123_s19 = sld [smem:[#allocation73_spill]] }
 0x79c   : > { %s2967_s20 = sshll.u32 %s4527_s27, 4  ;;  %s4261_s28 = smov [#allocation13]   ;;  %s5732_s20 = int_to_ptr.vmem [resolvable:$true] %s2967_s20 }
 0x79d   : > { %s5734_s15 = sshll.u32 %s4261_s28, 4  ;;  %s2936_s25 = scalar_lea.sflag [#allocation15], %s2935_s21  ;;  %s2954_s15 = int_to_ptr.vmem [resolvable:$true] %s5734_s15 }
 0x79e   : > { %s4115_s11 = scalar_lea.vmem %s5732_s20, 128  ;;  %s4262_s13 = smov [#allocation14]  }
 0x79f   : > { %p4116_p2 = scmp.ne.s32.totalorder %s5732_s20, %s4115_s11  ;;  %s4119_s23 = sshll.u32 %s4262_s13, 4  ;;  %s4120_s23 = int_to_ptr.vmem [resolvable:$false] %s4119_s23 }
 0x7a0   : > { %p6124_p8 = scmp.ne.s32.totalorder %s6122_s24, 0  ;;  %s4121_s22 = scalar_lea.vmem %s4120_s23, 256 }
 0x7a1   : > { %s5729_s12 = scalar_lea.hbm %s6123_s19, %s3419_s30  ;;  %p4122_p7 = scmp.lt.s32.totalorder %s5732_s20, %s4120_s23 }
 0x7a2   : > { %p4117_p5 = pnand %p4116_p2, %p6124_p8  ;;  %p4123_p12 = scmp.lt.s32.totalorder %s4121_s22, %s4115_s11 }
 0x7a4   : > { %p4118_p6 = pneg %p4117_p5  ;;  %p4124_p13 = por %p4123_p12, %p4122_p7 }
 0x7a6   : > { %p4125_p11 = pnand %p4124_p13, %p4118_p6 }
 0x7a8   : > { %4128 = shalt.err (!%p4125_p11)
}
 0x7a9   : > { %s4129_s27 = scalar_lea.hbm %s5729_s12, 128  ;;  %s4133_s30 = scalar_lea.hbm %s6123_s19, 256 }
 0x7aa   : > { %p4130_p1 = scmp.ne.s32.totalorder %s5729_s12, %s4129_s27  ;;  %p4134_p9 = scmp.lt.u32.totalorder %s5729_s12, %s6123_s19 }
 0x7ab   : > { %p4135_p10 = scmp.lt.u32.totalorder %s4133_s30, %s4129_s27  ;;  %p4137_p5 = scmp.lt.u32.totalorder %s4129_s27, %s5729_s12 }
 0x7ac   : > { %p4131_p3 = pnand %p4130_p1, %p6124_p8 }
 0x7ad   : > { %p4136_p2 = por %p4135_p10, %p4134_p9 }
 0x7ae   : > { %p4132_p0 = pneg %p4131_p3 }
 0x7af   : > { %p4138_p6 = por %p4137_p5, %p4136_p2 }
 0x7b1   : > { %p4139_p7 = pnand %p4138_p6, %p4132_p0 }
 0x7b3   : > { %4142 = shalt.err (!%p4139_p7)
}
 0x7b4   : > { %3511 = dma.vmem_to_hbm [thread:$0]  (%p6124_p8), %s5732_s20, 128, %s5729_s12, %s2936_s25  }
 0x7b5   : > { %s4143_s28 = scalar_lea.vmem %s2954_s15, 16  ;;  %p6125_p13 = scmp.eq.s32.totalorder %s4361_s0, 1 }
 0x7b6   : > { %p4144_p12 = scmp.ne.s32.totalorder %s2954_s15, %s4143_s28  ;;  %s4149_s11 = scalar_lea.vmem %s2954_s15, 32 }
 0x7b7   : > { %p4150_p3 = scmp.lt.s32.totalorder %s2954_s15, %s2954_s15  ;;  %p4151_p9 = scmp.lt.s32.totalorder %s4149_s11, %s4143_s28 }
 0x7b8   : > { %p4145_p11 = pnand %p4144_p12, %p6125_p13 }
 0x7b9   : > { %p4152_p10 = por %p4151_p9, %p4150_p3 }
 0x7ba   : > { %p4146_p1 = pneg %p4145_p11 }
 0x7bc   : > { %p4153_p2 = pnand %p4152_p10, %p4146_p1 }
 0x7be   : > { %4156 = shalt.err (!%p4153_p2)
}
 0x7bf   : > { %s6126_s24 = sld [smem:[#allocation72_spill]]  ;;  %p6127_p0 = pmov %p6125_p13 }
 0x7c5   : > { %s4157_s22 = scalar_lea.hbm %s6126_s24, 16 }
 0x7c6   : > { %p4158_p8 = scmp.ne.s32.totalorder %s6126_s24, %s4157_s22  ;;  %p4163_p7 = scmp.lt.u32.totalorder %s4157_s22, %s6126_s24 }
 0x7c8   : > { %p4159_p5 = pnand %p4158_p8, %p6127_p0 }
 0x7ca   : > { %p4160_p6 = pneg %p4159_p5 }
 0x7cc   : > { %p4165_p12 = pnand %p4163_p7, %p4160_p6 }
 0x7ce   : > { %4168 = shalt.err (!%p4165_p12)
}
 0x7cf   : > { %p6128_p13 = pmov %p6127_p0  ;;  %s4263_s30 = smov [#allocation16]  }
 0x7d0   : > { %s2978_s26 = sshll.u32 %s4263_s30, 4  ;;  %p6129_p1 = pmov %p6127_p0  ;;  %s2979_s26 = int_to_ptr.vmem [resolvable:$true] %s2978_s26 }
 0x7d1   : > { %3510 = dma.vmem_to_hbm [thread:$0]  (%p6128_p13), %s2954_s15, 16, %s6126_s24, [#allocation9]  }
 0x7d2   : > { %s4169_s14 = scalar_lea.vmem %s2979_s26, 32  ;;  %p4176_p10 = scmp.lt.s32.totalorder %s2979_s26, %s2979_s26 }
 0x7d3   : > { %p4170_p11 = scmp.ne.s32.totalorder %s2979_s26, %s4169_s14  ;;  %p4177_p2 = scmp.lt.s32.totalorder %s4169_s14, %s4169_s14 }
 0x7d5   : > { %p4171_p3 = pnand %p4170_p11, %p6129_p1  ;;  %p4178_p8 = por %p4177_p2, %p4176_p10 }
 0x7d7   : > { %p4172_p9 = pneg %p4171_p3 }
 0x7d9   : > { %p4179_p0 = pnand %p4178_p8, %p4172_p9 }
 0x7db   : > { %4182 = shalt.err (!%p4179_p0)
}
 0x7dc   : > { %s6130_s13 = sld [smem:[#allocation74_spill]]  ;;  %p6131_p6 = pmov %p6129_p1 }
 0x7e2   : > { %s4183_s23 = scalar_lea.hbm %s6130_s13, 32 }
 0x7e3   : > { %p4184_p5 = scmp.ne.s32.totalorder %s6130_s13, %s4183_s23  ;;  %p4189_p13 = scmp.lt.u32.totalorder %s4183_s23, %s6130_s13 }
 0x7e5   : > { %p4185_p7 = pnand %p4184_p5, %p6131_p6 }
 0x7e7   : > { %p4186_p12 = pneg %p4185_p7 }
 0x7e9   : > { %p4191_p11 = pnand %p4189_p13, %p4186_p12 }
 0x7eb   : > { %4194 = shalt.err (!%p4191_p11)
}
 0x7ec   : > { %3513 = dma.vmem_to_hbm [thread:$0]  (%p6129_p1), %s2979_s26, 32, %s6130_s13, [#allocation15]  }
 0x7ed   : > { %p6132_p3 = pmov %p6129_p1 }
 0x7ee   : > { %p6133_p9 = pmov %p6129_p1 }
 0x7ef   : > { %4220 = dma.done.wait (%p6132_p3), [#allocation9], 16  }
 0x7f0   : > { %4222 = vsyncadd (%p6133_p9), [#allocation9], 4294967280  ;;  %p6134_p10 = pmov %p6129_p1 }
 0x7f1   : > { %p6135_p2 = pmov %p6129_p1 }
 0x7f2   : > { %4224 = dma.done.wait (%p6134_p10), [#allocation15], 32  }
 0x7f3   : > { %4226 = vsyncadd (%p6135_p2), [#allocation15], 4294967264 }
 0x7f4 PF: > { %s6136_s25 = sadd.s32 4294967294, %s4245_s18   ;;  %s6137_s21 = sld [smem:[#allocation25_spill]] }
 0x7f5   : > { %s3004_s30 = sand.u32 1, %s6136_s25  }
 0x7f6   : > { %s3005_s26 = scalar_lea.sflag [#allocation15], %s3004_s30 }
 0x7fa   : > { %p6138_p8 = scmp.ne.s32.totalorder %s6137_s21, 0 }
 0x7fc   : > { %p3527_p0 = pnand %p3100_p4, %p6138_p8 }
 0x7fe   : > { %4228 = dma.done.wait (!%p3527_p0), %s3005_s26, 128  }
 0x7ff   : > { %4230 = vsyncadd (!%p3527_p0), %s3005_s26, 4294967168  ;;  %s6139_s18 = sld [smem:[#allocation22_spill]]  ;;  %s6140_s14 = sld [smem:[#allocation23_spill]] }
 0x800   : > { %s6141_s15 = smov %s4237_s16  ;;  %s6142_s16 = smov %s4241_s17 }
 0x805   : > { %p31_p5 = scmp.ge.s32.totalorder %s6139_s18, 4   ;;  %s6143_s17 = smov %s6140_s14 }
 0x807   :  { %33 = sbr.rel (!%p31_p5) target bundleno = 13 (0xd), region = 150 }
 0x80e   :  { %3010 = vsyncpa [#allocation8], 1 }
 0x80f   :  { %3012 = vsyncpa [#allocation8 + $0x1], 1 }
 0x810   :  { %3013 = vsyncpa [#allocation11], 1 }
 0x811   :  { %3014 = vsyncpa [#allocation9], 1 }
 0x812   :  { %3016 = vsyncpa [#allocation9 + $0x1], 1 }
 0x813   :  { %3017 = vsyncpa [#allocation15], 1 }
 0x814   :  { %3019 = vsyncpa [#allocation15 + $0x1], 1 }

</bundles_post_ra>
